<compile_context>
chip_gen: v7x
topology: tpu7x:2x2x1
jax: 0.10.0
libtpu: 0.0.40
codegen_flags: <defaults>
</compile_context>

<pallas_src>
import math
import jax
import jax.numpy as jnp
from jax import lax
from jax.experimental import pallas as pl
from jax.experimental.pallas import tpu as pltpu

# Small, module-consistent shapes (TQ == TK so the three masks pack into one operand).
B, TQ, TK, D, H, DFF = 2, 8, 8, 32, 4, 64
DK = D // H
BTQ, BTK = B * TQ, B * TK
SCALE = 1.0 / math.sqrt(DK)
EPS = 1e-6

# ---- packed-weight column layout: a single bf16 [D, 16*D] operand --------------------------
C_SA_QKV = 0 * D      # self-attn  Wq|Wk|Wv  (fused QKV)   width 3D
C_SA_O   = 3 * D      # self-attn  Wo                      width D
C_C1_Q   = 4 * D      # cascade-1  Wq                      width D
C_C1_KV  = 5 * D      # cascade-1  Wk|Wv     (fused KV)    width 2D
C_C1_O   = 7 * D      # cascade-1  Wo                      width D
C_C2_Q   = 8 * D      # cascade-2  Wq                      width D
C_C2_KV  = 9 * D      # cascade-2  Wk|Wv     (fused KV)    width 2D
C_C2_O   = 11 * D     # cascade-2  Wo                      width D
C_W1     = 12 * D     # FFN W1                             width DFF
C_W2T    = 14 * D     # FFN W2 stored transposed (contracted via trans-B dot, no in-kernel .T)
W_COLS   = 16 * D

# ---- packed bias / LayerNorm row layout: a single f32 [20, DFF] operand ----------------------
R_SA_B = 0    # rows 0..3   self-attn  bq, bk, bv, bo   (D-wide, zero-padded to DFF)
R_C1_B = 4    # rows 4..7   cascade-1  bq, bk, bv, bo
R_C2_B = 8    # rows 8..11  cascade-2  bq, bk, bv, bo
R_LN_A = 12   # rows 12..14 LayerNorm a_2 (x3)
R_LN_B = 15   # rows 15..17 LayerNorm b_2 (x3)
R_B2   = 18   # row  18     FFN b2
R_B1   = 19   # row  19     FFN b1 (full DFF width)
V_ROWS = 20

BF16 = jnp.bfloat16


def _dot(a, b):
    """a[m,k] @ b[k,n] on the MXU, f32 accumulation."""
    return lax.dot_general(a, b, (((1,), (0,)), ((), ())),
                           preferred_element_type=jnp.float32)


def _dot_tb(a, b):
    """a[m,k] · b[n,k]^T -> [m,n]: contraction on last dims of BOTH (no explicit transpose)."""
    return lax.dot_general(a, b, (((1,), (1,)), ((), ())),
                           preferred_element_type=jnp.float32)


# ---------------------------------------------------------------------------------------------
# Pallas kernel: whole (batch-folded) decoder layer in one grid step, everything VMEM-resident
# ---------------------------------------------------------------------------------------------
def cascade_decoder_kernel(x_ref, m1_ref, m2_ref, mask_ref, w_ref, vec_ref, out_ref):
    x = x_ref[...]                        # [BTQ, D] f32 (residual stream stays f32)
    m1b = m1_ref[...].astype(BF16)        # [BTK, D] bf16 (MXU operand)
    m2b = m2_ref[...].astype(BF16)
    neg_tgt = mask_ref[0]                 # [BTQ, BTK] additive (-1e9 / 0), block-diagonal
    neg_s1 = mask_ref[1]
    neg_s2 = mask_ref[2]

    def wcol(c, width):                   # bf16 weight-slab column window (ref slice -> load)
        return w_ref[:, c:c + width]

    def bias(r):                          # f32 [1, D]
        return vec_ref[r:r + 1, 0:D]

    def ln(t, idx):
        """LayerNorm matching the PyTorch module (unbiased std, eps added to std). Exact f32."""
        a = vec_ref[R_LN_A + idx:R_LN_A + idx + 1, 0:D]
        b = vec_ref[R_LN_B + idx:R_LN_B + idx + 1, 0:D]
        mean = jnp.sum(t, axis=-1, keepdims=True) * (1.0 / D)
        xc = t - mean
        var = jnp.sum(xc * xc, axis=-1, keepdims=True) * (1.0 / (D - 1))
        return a * xc / (jnp.sqrt(var) + EPS) + b

    def attend(q, k, v, neg_mask, wo):
        """Multi-head attention incl. output projection (bias added by caller).
        Heads are accumulated through Wo row-slices -> no lane concat, no explicit transposes."""
        qb = q.astype(BF16)
        kb = k.astype(BF16)
        vb = v.astype(BF16)
        acc = None
        for i in range(H):                              # static unroll over heads
            sl = slice(i * DK, (i + 1) * DK)
            s = _dot_tb(qb[:, sl], kb[:, sl]) * SCALE + neg_mask
            s = s - jnp.max(s, axis=-1, keepdims=True)
            e = jnp.exp(s)
            p = e * pl.reciprocal(jnp.sum(e, axis=-1, keepdims=True), approx=True)
            ctx = _dot(p.astype(BF16), vb[:, sl])       # [BTQ, DK] f32
            contrib = _dot(ctx.astype(BF16), wo[sl, :]) # Wo row-slice (sublane slice)
            acc = contrib if acc is None else acc + contrib
        return acc

    # ---- sublayer 0: self-attention with fused QKV projection --------------------------------
    xn = ln(x, 0)
    qkv = _dot(xn.astype(BF16), wcol(C_SA_QKV, 3 * D))
    q = qkv[:, 0:D] + bias(R_SA_B + 0)
    k = qkv[:, D:2 * D] + bias(R_SA_B + 1)
    v = qkv[:, 2 * D:3 * D] + bias(R_SA_B + 2)
    sa = attend(q, k, v, neg_tgt, wcol(C_SA_O, D)) + bias(R_SA_B + 3)
    x1 = x + sa

    # ---- sublayer 1: cascade source attention -------------------------------------------------
    xn = ln(x1, 1)
    # stage 1: attend to memory1 (key == value == m1 -> fused KV projection)
    q = _dot(xn.astype(BF16), wcol(C_C1_Q, D)) + bias(R_C1_B + 0)
    kv = _dot(m1b, wcol(C_C1_KV, 2 * D))
    k = kv[:, 0:D] + bias(R_C1_B + 1)
    v = kv[:, D:2 * D] + bias(R_C1_B + 2)
    a1 = attend(q, k, v, neg_s1, wcol(C_C1_O, D)) + bias(R_C1_B + 3)
    # stage 2: cascade — stage-1 output queries memory2 (fused KV projection)
    q = _dot(a1.astype(BF16), wcol(C_C2_Q, D)) + bias(R_C2_B + 0)
    kv = _dot(m2b, wcol(C_C2_KV, 2 * D))
    k = kv[:, 0:D] + bias(R_C2_B + 1)
    v = kv[:, D:2 * D] + bias(R_C2_B + 2)
    a2 = attend(q, k, v, neg_s2, wcol(C_C2_O, D)) + bias(R_C2_B + 3)
    x2 = x1 + a2

    # ---- sublayer 2: position-wise feed-forward ------------------------------------------------
    xn = ln(x2, 2)
    h = jnp.maximum(_dot(xn.astype(BF16), wcol(C_W1, DFF)) + vec_ref[R_B1:R_B1 + 1, :], 0.0)
    # W2 is stored transposed; contract last dims of both -> plain h @ W2 with no in-kernel .T
    ff = _dot_tb(h.astype(BF16), wcol(C_W2T, DFF)) + bias(R_B2)
    out_ref[...] = x2 + ff


# ---------------------------------------------------------------------------------------------
# wrapper: pack parameters / masks, fold batch, call pallas_call (single grid step)
# ---------------------------------------------------------------------------------------------
def _pack_params(params):
    (sa_w, sa_b, c1_w, c1_b, c2_w, c2_b, ln_a, ln_b, w1, b1, w2, b2) = params
    w_all = jnp.concatenate(
        [sa_w[0], sa_w[1], sa_w[2], sa_w[3],
         c1_w[0], c1_w[1], c1_w[2], c1_w[3],
         c2_w[0], c2_w[1], c2_w[2], c2_w[3],
         w1, w2.T], axis=1).astype(BF16)                             # [D, 16D] bf16 MXU operand

    def pad_row(vec):                                                # [D] -> [1, DFF]
        return jnp.pad(vec, (0, DFF - D))[None, :]

    rows = ([pad_row(sa_b[i]) for i in range(4)]
            + [pad_row(c1_b[i]) for i in range(4)]
            + [pad_row(c2_b[i]) for i in range(4)]
            + [pad_row(ln_a[i]) for i in range(3)]
            + [pad_row(ln_b[i]) for i in range(3)]
            + [pad_row(b2), b1[None, :]])
    vec_all = jnp.concatenate(rows, axis=0).astype(jnp.float32)      # [20, DFF] f32
    return w_all, vec_all


def _block_diag_additive(mask):
    """[B, ?, TK] 0/1 mask -> [B*TQ, B*TK] additive mask, -1e9 off the batch block-diagonal."""
    add = jnp.where(jnp.broadcast_to(mask, (B, TQ, TK)) == 0.0, -1e9, 0.0).astype(jnp.float32)
    full = jnp.full((BTQ, BTK), -1e9, jnp.float32)
    for b in range(B):
        full = full.at[b * TQ:(b + 1) * TQ, b * TK:(b + 1) * TK].set(add[b])
    return full


def cascade_decoder_layer(x, memory1, src_mask1, memory2, src_mask2, tgt_mask, params):
    w_all, vec_all = _pack_params(params)

    x2d = x.reshape(BTQ, D)
    m1_2d = memory1.reshape(BTK, D)
    m2_2d = memory2.reshape(BTK, D)
    masks = jnp.stack([_block_diag_additive(tgt_mask),
                       _block_diag_additive(src_mask1),
                       _block_diag_additive(src_mask2)], axis=0)     # [3, BTQ, BTK] additive

    out2d = pl.pallas_call(
        cascade_decoder_kernel,
        out_shape=jax.ShapeDtypeStruct((BTQ, D), jnp.float32),
        grid_spec=pltpu.PrefetchScalarGridSpec(
            num_scalar_prefetch=0,
            grid=(1,),                                               # batch folded: ONE step
            in_specs=[
                pl.BlockSpec((BTQ, D), lambda i: (0, 0)),            # x   (batch-folded)
                pl.BlockSpec((BTK, D), lambda i: (0, 0)),            # memory1
                pl.BlockSpec((BTK, D), lambda i: (0, 0)),            # memory2
                pl.BlockSpec((3, BTQ, BTK), lambda i: (0, 0, 0)),    # packed additive masks
                pl.BlockSpec((D, W_COLS), lambda i: (0, 0)),         # packed proj weights (bf16)
                pl.BlockSpec((V_ROWS, DFF), lambda i: (0, 0)),       # packed biases / LN (f32)
            ],
            out_specs=pl.BlockSpec((BTQ, D), lambda i: (0, 0)),
        ),
        compiler_params=pltpu.CompilerParams(dimension_semantics=("arbitrary",)),
    )(x2d, m1_2d, m2_2d, masks, w_all, vec_all)
    return out2d.reshape(B, TQ, D)


# ---------------------------------------------------------------------------------------------
# pure-JAX reference (exact-divide f32 math, looped over batch)
# ---------------------------------------------------------------------------------------------
def ref_layer(x, memory1, src_mask1, memory2, src_mask2, tgt_mask, params):
    (sa_w, sa_b, c1_w, c1_b, c2_w, c2_b, ln_a, ln_b, w1, b1, w2, b2) = params

    def ln(t, a, b_):
        mean = jnp.mean(t, axis=-1, keepdims=True)
        xc = t - mean
        std = jnp.sqrt(jnp.sum(xc * xc, axis=-1, keepdims=True) / (t.shape[-1] - 1))
        return a * xc / (std + EPS) + b_

    def mha(q_in, k_in, v_in, mask, w, bb):
        q = q_in @ w[0] + bb[0]
        k = k_in @ w[1] + bb[1]
        v = v_in @ w[2] + bb[2]
        heads = []
        for i in range(H):
            sl = slice(i * DK, (i + 1) * DK)
            s = (q[:, sl] @ k[:, sl].T) / math.sqrt(DK)
            s = jnp.where(mask == 0.0, -1e9, s)
            heads.append(jax.nn.softmax(s, axis=-1) @ v[:, sl])
        return jnp.concatenate(heads, axis=-1) @ w[3] + bb[3]

    outs = []
    for bi in range(B):
        xb = x[bi]
        xn = ln(xb, ln_a[0], ln_b[0])
        x1 = xb + mha(xn, xn, xn, tgt_mask[bi], sa_w, sa_b)
        xn = ln(x1, ln_a[1], ln_b[1])
        a1 = mha(xn, memory1[bi], memory1[bi], src_mask1[bi], c1_w, c1_b)
        a2 = mha(a1, memory2[bi], memory2[bi], src_mask2[bi], c2_w, c2_b)
        x2 = x1 + a2
        xn = ln(x2, ln_a[2], ln_b[2])
        h = jnp.maximum(xn @ w1 + b1, 0.0)
        outs.append(x2 + h @ w2 + b2)
    return jnp.stack(outs)


if __name__ == "__main__":
    root = jax.random.PRNGKey(0)
    ks = jax.random.split(root, 16)

    # deterministic synthetic parameters
    sa_w = 0.1 * jax.random.normal(ks[0], (4, D, D), jnp.float32)
    sa_b = 0.1 * jax.random.normal(ks[1], (4, D), jnp.float32)
    c1_w = 0.1 * jax.random.normal(ks[2], (4, D, D), jnp.float32)
    c1_b = 0.1 * jax.random.normal(ks[3], (4, D), jnp.float32)
    c2_w = 0.1 * jax.random.normal(ks[4], (4, D, D), jnp.float32)
    c2_b = 0.1 * jax.random.normal(ks[5], (4, D), jnp.float32)
    ln_a = jnp.ones((3, D), jnp.float32)       # LayerNorm a_2 init
    ln_b = jnp.zeros((3, D), jnp.float32)      # LayerNorm b_2 init
    w1 = 0.1 * jax.random.normal(ks[6], (D, DFF), jnp.float32)
    b1 = 0.1 * jax.random.normal(ks[7], (DFF,), jnp.float32)
    w2 = 0.1 * jax.random.normal(ks[8], (DFF, D), jnp.float32)
    b2 = 0.1 * jax.random.normal(ks[9], (D,), jnp.float32)
    params = (sa_w, sa_b, c1_w, c1_b, c2_w, c2_b, ln_a, ln_b, w1, b1, w2, b2)

    # inputs
    x = jax.random.normal(ks[10], (B, TQ, D), jnp.float32)
    memory1 = jax.random.normal(ks[11], (B, TK, D), jnp.float32)
    memory2 = jax.random.normal(ks[12], (B, TK, D), jnp.float32)
    tgt_mask = jnp.broadcast_to(
        jnp.tril(jnp.ones((TQ, TQ), jnp.float32)), (B, TQ, TQ))       # causal
    src_mask1 = jnp.ones((B, 1, TK), jnp.float32).at[1, 0, TK - 2:].set(0.0)
    src_mask2 = jnp.ones((B, 1, TK), jnp.float32).at[0, 0, TK - 3:].set(0.0)

    out = cascade_decoder_layer(x, memory1, src_mask1, memory2, src_mask2, tgt_mask, params)
    out = jax.block_until_ready(out)

    ref = ref_layer(x, memory1, src_mask1, memory2, src_mask2, tgt_mask, params)
    assert out.shape == (B, TQ, D)
    max_err = float(jnp.max(jnp.abs(out - ref)))
    # bf16 MXU inputs (f32 accumulation) + approx EUP reciprocal in softmax → looser than the
    # exact-f32 reference; residual path / LayerNorm stay exact f32.
    assert jnp.allclose(out, ref, rtol=3e-2, atol=3e-2), max_err

    print("KERNEL_OK")
</pallas_src>

<mosaic_0001>
module attributes {stable_mosaic.version = 11 : i64} {
  func.func @cascade_decoder_kernel(%arg0: i32, %arg1: memref<16x32xf32, #tpu.memory_space<vmem>>, %arg2: memref<16x32xf32, #tpu.memory_space<vmem>>, %arg3: memref<16x32xf32, #tpu.memory_space<vmem>>, %arg4: memref<3x16x16xf32, #tpu.memory_space<vmem>>, %arg5: memref<32x512xbf16, #tpu.memory_space<vmem>>, %arg6: memref<20x64xf32, #tpu.memory_space<vmem>>, %arg7: memref<16x32xf32, #tpu.memory_space<vmem>>) attributes {dimension_semantics = [#tpu.dimension_semantics<arbitrary>], iteration_bounds = array<i64: 1>, scalar_prefetch = 0 : i64, scratch_operands = 0 : i64, tpu.core_type = #tpu.core_type<tc>, window_params = [{pipeline_mode = #tpu.pipeline_mode<synchronous>, transform_indices = @transform_0, window_bounds = array<i64: 16, 32>}, {pipeline_mode = #tpu.pipeline_mode<synchronous>, transform_indices = @transform_1, window_bounds = array<i64: 16, 32>}, {pipeline_mode = #tpu.pipeline_mode<synchronous>, transform_indices = @transform_2, window_bounds = array<i64: 16, 32>}, {pipeline_mode = #tpu.pipeline_mode<synchronous>, transform_indices = @transform_3, window_bounds = array<i64: 3, 16, 16>}, {pipeline_mode = #tpu.pipeline_mode<synchronous>, transform_indices = @transform_4, window_bounds = array<i64: 32, 512>}, {pipeline_mode = #tpu.pipeline_mode<synchronous>, transform_indices = @transform_5, window_bounds = array<i64: 20, 64>}, {pipeline_mode = #tpu.pipeline_mode<synchronous>, transform_indices = @transform_6, window_bounds = array<i64: 16, 32>}]} {
    %c0 = arith.constant 0 : index
    %c0_0 = arith.constant 0 : index
    %0 = vector.load %arg1[%c0, %c0_0] : memref<16x32xf32, #tpu.memory_space<vmem>>, vector<16x32xf32>
    %c0_1 = arith.constant 0 : index
    %c0_2 = arith.constant 0 : index
    %1 = vector.load %arg2[%c0_1, %c0_2] : memref<16x32xf32, #tpu.memory_space<vmem>>, vector<16x32xf32>
    %2 = arith.truncf %1 : vector<16x32xf32> to vector<16x32xbf16>
    %c0_3 = arith.constant 0 : index
    %c0_4 = arith.constant 0 : index
    %3 = vector.load %arg3[%c0_3, %c0_4] : memref<16x32xf32, #tpu.memory_space<vmem>>, vector<16x32xf32>
    %4 = arith.truncf %3 : vector<16x32xf32> to vector<16x32xbf16>
    %c0_5 = arith.constant 0 : index
    %c0_6 = arith.constant 0 : index
    %c0_7 = arith.constant 0 : index
    %5 = vector.load %arg4[%c0_5, %c0_6, %c0_7] : memref<3x16x16xf32, #tpu.memory_space<vmem>>, vector<1x16x16xf32>
    %6 = vector.shape_cast %5 : vector<1x16x16xf32> to vector<16x16xf32>
    %c1 = arith.constant 1 : index
    %c0_8 = arith.constant 0 : index
    %c0_9 = arith.constant 0 : index
    %7 = vector.load %arg4[%c1, %c0_8, %c0_9] : memref<3x16x16xf32, #tpu.memory_space<vmem>>, vector<1x16x16xf32>
    %8 = vector.shape_cast %7 : vector<1x16x16xf32> to vector<16x16xf32>
    %c2 = arith.constant 2 : index
    %c0_10 = arith.constant 0 : index
    %c0_11 = arith.constant 0 : index
    %9 = vector.load %arg4[%c2, %c0_10, %c0_11] : memref<3x16x16xf32, #tpu.memory_space<vmem>>, vector<1x16x16xf32>
    %10 = vector.shape_cast %9 : vector<1x16x16xf32> to vector<16x16xf32>
    %c12 = arith.constant 12 : index
    %c0_12 = arith.constant 0 : index
    %11 = vector.load %arg6[%c12, %c0_12] : memref<20x64xf32, #tpu.memory_space<vmem>>, vector<1x32xf32>
    %c15 = arith.constant 15 : index
    %c0_13 = arith.constant 0 : index
    %12 = vector.load %arg6[%c15, %c0_13] : memref<20x64xf32, #tpu.memory_space<vmem>>, vector<1x32xf32>
    %cst = arith.constant dense<0.000000e+00> : vector<16xf32>
    %13 = vector.multi_reduction <add>, %0, %cst [1] : vector<16x32xf32> to vector<16xf32>
    %14 = vector.shape_cast %13 : vector<16xf32> to vector<16x1xf32>
    %cst_14 = arith.constant 3.125000e-02 : f32
    %15 = vector.broadcast %cst_14 : f32 to vector<16x1xf32>
    %16 = arith.mulf %14, %15 : vector<16x1xf32>
    %17 = vector.broadcast %16 : vector<16x1xf32> to vector<16x32xf32>
    %18 = arith.subf %0, %17 : vector<16x32xf32>
    %19 = arith.mulf %18, %18 : vector<16x32xf32>
    %cst_15 = arith.constant dense<0.000000e+00> : vector<16xf32>
    %20 = vector.multi_reduction <add>, %19, %cst_15 [1] : vector<16x32xf32> to vector<16xf32>
    %21 = vector.shape_cast %20 : vector<16xf32> to vector<16x1xf32>
    %cst_16 = arith.constant 0.0322580636 : f32
    %22 = vector.broadcast %cst_16 : f32 to vector<16x1xf32>
    %23 = arith.mulf %21, %22 : vector<16x1xf32>
    %24 = vector.broadcast %11 : vector<1x32xf32> to vector<16x32xf32>
    %25 = arith.mulf %24, %18 : vector<16x32xf32>
    %26 = math.sqrt %23 : vector<16x1xf32>
    %cst_17 = arith.constant 9.99999997E-7 : f32
    %27 = vector.broadcast %cst_17 : f32 to vector<16x1xf32>
    %28 = arith.addf %26, %27 : vector<16x1xf32>
    %29 = vector.broadcast %28 : vector<16x1xf32> to vector<16x32xf32>
    %30 = arith.divf %25, %29 : vector<16x32xf32>
    %31 = vector.broadcast %12 : vector<1x32xf32> to vector<16x32xf32>
    %32 = arith.addf %30, %31 : vector<16x32xf32>
    %33 = arith.truncf %32 : vector<16x32xf32> to vector<16x32xbf16>
    %c0_18 = arith.constant 0 : index
    %c0_19 = arith.constant 0 : index
    %34 = vector.load %arg5[%c0_18, %c0_19] : memref<32x512xbf16, #tpu.memory_space<vmem>>, vector<32x96xbf16>
    %cst_20 = arith.constant dense<0.000000e+00> : vector<16x96xf32>
    %35 = tpu.matmul %33, %34, %cst_20 {dimension_numbers = #tpu.dot_dimension_numbers<[1], [0], [0], [1], [0, 0, 1, 1], [], []>} : vector<16x32xbf16>, vector<32x96xbf16>, vector<16x96xf32> -> vector<16x96xf32>
    %36 = vector.extract_strided_slice %35 {offsets = [0, 0], sizes = [16, 32], strides = [1, 1]} : vector<16x96xf32> to vector<16x32xf32>
    %c0_21 = arith.constant 0 : index
    %c0_22 = arith.constant 0 : index
    %37 = vector.load %arg6[%c0_21, %c0_22] : memref<20x64xf32, #tpu.memory_space<vmem>>, vector<1x32xf32>
    %38 = vector.broadcast %37 : vector<1x32xf32> to vector<16x32xf32>
    %39 = arith.addf %36, %38 : vector<16x32xf32>
    %40 = vector.extract_strided_slice %35 {offsets = [0, 32], sizes = [16, 32], strides = [1, 1]} : vector<16x96xf32> to vector<16x32xf32>
    %c1_23 = arith.constant 1 : index
    %c0_24 = arith.constant 0 : index
    %41 = vector.load %arg6[%c1_23, %c0_24] : memref<20x64xf32, #tpu.memory_space<vmem>>, vector<1x32xf32>
    %42 = vector.broadcast %41 : vector<1x32xf32> to vector<16x32xf32>
    %43 = arith.addf %40, %42 : vector<16x32xf32>
    %44 = vector.extract_strided_slice %35 {offsets = [0, 64], sizes = [16, 32], strides = [1, 1]} : vector<16x96xf32> to vector<16x32xf32>
    %c2_25 = arith.constant 2 : index
    %c0_26 = arith.constant 0 : index
    %45 = vector.load %arg6[%c2_25, %c0_26] : memref<20x64xf32, #tpu.memory_space<vmem>>, vector<1x32xf32>
    %46 = vector.broadcast %45 : vector<1x32xf32> to vector<16x32xf32>
    %47 = arith.addf %44, %46 : vector<16x32xf32>
    %c0_27 = arith.constant 0 : index
    %c96 = arith.constant 96 : index
    %48 = vector.load %arg5[%c0_27, %c96] : memref<32x512xbf16, #tpu.memory_space<vmem>>, vector<32x32xbf16>
    %49 = arith.truncf %39 : vector<16x32xf32> to vector<16x32xbf16>
    %50 = arith.truncf %43 : vector<16x32xf32> to vector<16x32xbf16>
    %51 = arith.truncf %47 : vector<16x32xf32> to vector<16x32xbf16>
    %52 = vector.extract_strided_slice %49 {offsets = [0, 0], sizes = [16, 8], strides = [1, 1]} : vector<16x32xbf16> to vector<16x8xbf16>
    %53 = vector.extract_strided_slice %50 {offsets = [0, 0], sizes = [16, 8], strides = [1, 1]} : vector<16x32xbf16> to vector<16x8xbf16>
    %cst_28 = arith.constant dense<0.000000e+00> : vector<16x16xf32>
    %54 = tpu.matmul %52, %53, %cst_28 {dimension_numbers = #tpu.dot_dimension_numbers<[1], [1], [0], [0], [0, 0, 1, 0], [], []>} : vector<16x8xbf16>, vector<16x8xbf16>, vector<16x16xf32> -> vector<16x16xf32>
    %cst_29 = arith.constant 0.353553385 : f32
    %55 = vector.broadcast %cst_29 : f32 to vector<16x16xf32>
    %56 = arith.mulf %54, %55 : vector<16x16xf32>
    %57 = arith.addf %56, %6 : vector<16x16xf32>
    %cst_30 = arith.constant dense<0xFF800000> : vector<16xf32>
    %58 = vector.multi_reduction <maximumf>, %57, %cst_30 [1] : vector<16x16xf32> to vector<16xf32>
    %59 = vector.shape_cast %58 : vector<16xf32> to vector<16x1xf32>
    %60 = vector.broadcast %59 : vector<16x1xf32> to vector<16x16xf32>
    %61 = arith.subf %57, %60 : vector<16x16xf32>
    %62 = math.exp %61 : vector<16x16xf32>
    %cst_31 = arith.constant dense<0.000000e+00> : vector<16xf32>
    %63 = vector.multi_reduction <add>, %62, %cst_31 [1] : vector<16x16xf32> to vector<16xf32>
    %64 = vector.shape_cast %63 : vector<16xf32> to vector<16x1xf32>
    %65 = tpu.reciprocal %64 {approx = true} : vector<16x1xf32> -> vector<16x1xf32>
    %66 = vector.broadcast %65 : vector<16x1xf32> to vector<16x16xf32>
    %67 = arith.mulf %62, %66 : vector<16x16xf32>
    %68 = arith.truncf %67 : vector<16x16xf32> to vector<16x16xbf16>
    %69 = vector.extract_strided_slice %51 {offsets = [0, 0], sizes = [16, 8], strides = [1, 1]} : vector<16x32xbf16> to vector<16x8xbf16>
    %cst_32 = arith.constant dense<0.000000e+00> : vector<16x8xf32>
    %70 = tpu.matmul %68, %69, %cst_32 {dimension_numbers = #tpu.dot_dimension_numbers<[1], [0], [0], [1], [0, 0, 1, 1], [], []>} : vector<16x16xbf16>, vector<16x8xbf16>, vector<16x8xf32> -> vector<16x8xf32>
    %71 = arith.truncf %70 : vector<16x8xf32> to vector<16x8xbf16>
    %72 = vector.extract_strided_slice %48 {offsets = [0, 0], sizes = [8, 32], strides = [1, 1]} : vector<32x32xbf16> to vector<8x32xbf16>
    %cst_33 = arith.constant dense<0.000000e+00> : vector<16x32xf32>
    %73 = tpu.matmul %71, %72, %cst_33 {dimension_numbers = #tpu.dot_dimension_numbers<[1], [0], [0], [1], [0, 0, 1, 1], [], []>} : vector<16x8xbf16>, vector<8x32xbf16>, vector<16x32xf32> -> vector<16x32xf32>
    %74 = vector.extract_strided_slice %49 {offsets = [0, 8], sizes = [16, 8], strides = [1, 1]} : vector<16x32xbf16> to vector<16x8xbf16>
    %75 = vector.extract_strided_slice %50 {offsets = [0, 8], sizes = [16, 8], strides = [1, 1]} : vector<16x32xbf16> to vector<16x8xbf16>
    %cst_34 = arith.constant dense<0.000000e+00> : vector<16x16xf32>
    %76 = tpu.matmul %74, %75, %cst_34 {dimension_numbers = #tpu.dot_dimension_numbers<[1], [1], [0], [0], [0, 0, 1, 0], [], []>} : vector<16x8xbf16>, vector<16x8xbf16>, vector<16x16xf32> -> vector<16x16xf32>
    %cst_35 = arith.constant 0.353553385 : f32
    %77 = vector.broadcast %cst_35 : f32 to vector<16x16xf32>
    %78 = arith.mulf %76, %77 : vector<16x16xf32>
    %79 = arith.addf %78, %6 : vector<16x16xf32>
    %cst_36 = arith.constant dense<0xFF800000> : vector<16xf32>
    %80 = vector.multi_reduction <maximumf>, %79, %cst_36 [1] : vector<16x16xf32> to vector<16xf32>
    %81 = vector.shape_cast %80 : vector<16xf32> to vector<16x1xf32>
    %82 = vector.broadcast %81 : vector<16x1xf32> to vector<16x16xf32>
    %83 = arith.subf %79, %82 : vector<16x16xf32>
    %84 = math.exp %83 : vector<16x16xf32>
    %cst_37 = arith.constant dense<0.000000e+00> : vector<16xf32>
    %85 = vector.multi_reduction <add>, %84, %cst_37 [1] : vector<16x16xf32> to vector<16xf32>
    %86 = vector.shape_cast %85 : vector<16xf32> to vector<16x1xf32>
    %87 = tpu.reciprocal %86 {approx = true} : vector<16x1xf32> -> vector<16x1xf32>
    %88 = vector.broadcast %87 : vector<16x1xf32> to vector<16x16xf32>
    %89 = arith.mulf %84, %88 : vector<16x16xf32>
    %90 = arith.truncf %89 : vector<16x16xf32> to vector<16x16xbf16>
    %91 = vector.extract_strided_slice %51 {offsets = [0, 8], sizes = [16, 8], strides = [1, 1]} : vector<16x32xbf16> to vector<16x8xbf16>
    %cst_38 = arith.constant dense<0.000000e+00> : vector<16x8xf32>
    %92 = tpu.matmul %90, %91, %cst_38 {dimension_numbers = #tpu.dot_dimension_numbers<[1], [0], [0], [1], [0, 0, 1, 1], [], []>} : vector<16x16xbf16>, vector<16x8xbf16>, vector<16x8xf32> -> vector<16x8xf32>
    %93 = arith.truncf %92 : vector<16x8xf32> to vector<16x8xbf16>
    %94 = vector.extract_strided_slice %48 {offsets = [8, 0], sizes = [8, 32], strides = [1, 1]} : vector<32x32xbf16> to vector<8x32xbf16>
    %cst_39 = arith.constant dense<0.000000e+00> : vector<16x32xf32>
    %95 = tpu.matmul %93, %94, %cst_39 {dimension_numbers = #tpu.dot_dimension_numbers<[1], [0], [0], [1], [0, 0, 1, 1], [], []>} : vector<16x8xbf16>, vector<8x32xbf16>, vector<16x32xf32> -> vector<16x32xf32>
    %96 = arith.addf %73, %95 : vector<16x32xf32>
    %97 = vector.extract_strided_slice %49 {offsets = [0, 16], sizes = [16, 8], strides = [1, 1]} : vector<16x32xbf16> to vector<16x8xbf16>
    %98 = vector.extract_strided_slice %50 {offsets = [0, 16], sizes = [16, 8], strides = [1, 1]} : vector<16x32xbf16> to vector<16x8xbf16>
    %cst_40 = arith.constant dense<0.000000e+00> : vector<16x16xf32>
    %99 = tpu.matmul %97, %98, %cst_40 {dimension_numbers = #tpu.dot_dimension_numbers<[1], [1], [0], [0], [0, 0, 1, 0], [], []>} : vector<16x8xbf16>, vector<16x8xbf16>, vector<16x16xf32> -> vector<16x16xf32>
    %cst_41 = arith.constant 0.353553385 : f32
    %100 = vector.broadcast %cst_41 : f32 to vector<16x16xf32>
    %101 = arith.mulf %99, %100 : vector<16x16xf32>
    %102 = arith.addf %101, %6 : vector<16x16xf32>
    %cst_42 = arith.constant dense<0xFF800000> : vector<16xf32>
    %103 = vector.multi_reduction <maximumf>, %102, %cst_42 [1] : vector<16x16xf32> to vector<16xf32>
    %104 = vector.shape_cast %103 : vector<16xf32> to vector<16x1xf32>
    %105 = vector.broadcast %104 : vector<16x1xf32> to vector<16x16xf32>
    %106 = arith.subf %102, %105 : vector<16x16xf32>
    %107 = math.exp %106 : vector<16x16xf32>
    %cst_43 = arith.constant dense<0.000000e+00> : vector<16xf32>
    %108 = vector.multi_reduction <add>, %107, %cst_43 [1] : vector<16x16xf32> to vector<16xf32>
    %109 = vector.shape_cast %108 : vector<16xf32> to vector<16x1xf32>
    %110 = tpu.reciprocal %109 {approx = true} : vector<16x1xf32> -> vector<16x1xf32>
    %111 = vector.broadcast %110 : vector<16x1xf32> to vector<16x16xf32>
    %112 = arith.mulf %107, %111 : vector<16x16xf32>
    %113 = arith.truncf %112 : vector<16x16xf32> to vector<16x16xbf16>
    %114 = vector.extract_strided_slice %51 {offsets = [0, 16], sizes = [16, 8], strides = [1, 1]} : vector<16x32xbf16> to vector<16x8xbf16>
    %cst_44 = arith.constant dense<0.000000e+00> : vector<16x8xf32>
    %115 = tpu.matmul %113, %114, %cst_44 {dimension_numbers = #tpu.dot_dimension_numbers<[1], [0], [0], [1], [0, 0, 1, 1], [], []>} : vector<16x16xbf16>, vector<16x8xbf16>, vector<16x8xf32> -> vector<16x8xf32>
    %116 = arith.truncf %115 : vector<16x8xf32> to vector<16x8xbf16>
    %117 = vector.extract_strided_slice %48 {offsets = [16, 0], sizes = [8, 32], strides = [1, 1]} : vector<32x32xbf16> to vector<8x32xbf16>
    %cst_45 = arith.constant dense<0.000000e+00> : vector<16x32xf32>
    %118 = tpu.matmul %116, %117, %cst_45 {dimension_numbers = #tpu.dot_dimension_numbers<[1], [0], [0], [1], [0, 0, 1, 1], [], []>} : vector<16x8xbf16>, vector<8x32xbf16>, vector<16x32xf32> -> vector<16x32xf32>
    %119 = arith.addf %96, %118 : vector<16x32xf32>
    %120 = vector.extract_strided_slice %49 {offsets = [0, 24], sizes = [16, 8], strides = [1, 1]} : vector<16x32xbf16> to vector<16x8xbf16>
    %121 = vector.extract_strided_slice %50 {offsets = [0, 24], sizes = [16, 8], strides = [1, 1]} : vector<16x32xbf16> to vector<16x8xbf16>
    %cst_46 = arith.constant dense<0.000000e+00> : vector<16x16xf32>
    %122 = tpu.matmul %120, %121, %cst_46 {dimension_numbers = #tpu.dot_dimension_numbers<[1], [1], [0], [0], [0, 0, 1, 0], [], []>} : vector<16x8xbf16>, vector<16x8xbf16>, vector<16x16xf32> -> vector<16x16xf32>
    %cst_47 = arith.constant 0.353553385 : f32
    %123 = vector.broadcast %cst_47 : f32 to vector<16x16xf32>
    %124 = arith.mulf %122, %123 : vector<16x16xf32>
    %125 = arith.addf %124, %6 : vector<16x16xf32>
    %cst_48 = arith.constant dense<0xFF800000> : vector<16xf32>
    %126 = vector.multi_reduction <maximumf>, %125, %cst_48 [1] : vector<16x16xf32> to vector<16xf32>
    %127 = vector.shape_cast %126 : vector<16xf32> to vector<16x1xf32>
    %128 = vector.broadcast %127 : vector<16x1xf32> to vector<16x16xf32>
    %129 = arith.subf %125, %128 : vector<16x16xf32>
    %130 = math.exp %129 : vector<16x16xf32>
    %cst_49 = arith.constant dense<0.000000e+00> : vector<16xf32>
    %131 = vector.multi_reduction <add>, %130, %cst_49 [1] : vector<16x16xf32> to vector<16xf32>
    %132 = vector.shape_cast %131 : vector<16xf32> to vector<16x1xf32>
    %133 = tpu.reciprocal %132 {approx = true} : vector<16x1xf32> -> vector<16x1xf32>
    %134 = vector.broadcast %133 : vector<16x1xf32> to vector<16x16xf32>
    %135 = arith.mulf %130, %134 : vector<16x16xf32>
    %136 = arith.truncf %135 : vector<16x16xf32> to vector<16x16xbf16>
    %137 = vector.extract_strided_slice %51 {offsets = [0, 24], sizes = [16, 8], strides = [1, 1]} : vector<16x32xbf16> to vector<16x8xbf16>
    %cst_50 = arith.constant dense<0.000000e+00> : vector<16x8xf32>
    %138 = tpu.matmul %136, %137, %cst_50 {dimension_numbers = #tpu.dot_dimension_numbers<[1], [0], [0], [1], [0, 0, 1, 1], [], []>} : vector<16x16xbf16>, vector<16x8xbf16>, vector<16x8xf32> -> vector<16x8xf32>
    %139 = arith.truncf %138 : vector<16x8xf32> to vector<16x8xbf16>
    %140 = vector.extract_strided_slice %48 {offsets = [24, 0], sizes = [8, 32], strides = [1, 1]} : vector<32x32xbf16> to vector<8x32xbf16>
    %cst_51 = arith.constant dense<0.000000e+00> : vector<16x32xf32>
    %141 = tpu.matmul %139, %140, %cst_51 {dimension_numbers = #tpu.dot_dimension_numbers<[1], [0], [0], [1], [0, 0, 1, 1], [], []>} : vector<16x8xbf16>, vector<8x32xbf16>, vector<16x32xf32> -> vector<16x32xf32>
    %142 = arith.addf %119, %141 : vector<16x32xf32>
    %c3 = arith.constant 3 : index
    %c0_52 = arith.constant 0 : index
    %143 = vector.load %arg6[%c3, %c0_52] : memref<20x64xf32, #tpu.memory_space<vmem>>, vector<1x32xf32>
    %144 = vector.broadcast %143 : vector<1x32xf32> to vector<16x32xf32>
    %145 = arith.addf %142, %144 : vector<16x32xf32>
    %146 = arith.addf %0, %145 : vector<16x32xf32>
    %c13 = arith.constant 13 : index
    %c0_53 = arith.constant 0 : index
    %147 = vector.load %arg6[%c13, %c0_53] : memref<20x64xf32, #tpu.memory_space<vmem>>, vector<1x32xf32>
    %c16 = arith.constant 16 : index
    %c0_54 = arith.constant 0 : index
    %148 = vector.load %arg6[%c16, %c0_54] : memref<20x64xf32, #tpu.memory_space<vmem>>, vector<1x32xf32>
    %cst_55 = arith.constant dense<0.000000e+00> : vector<16xf32>
    %149 = vector.multi_reduction <add>, %146, %cst_55 [1] : vector<16x32xf32> to vector<16xf32>
    %150 = vector.shape_cast %149 : vector<16xf32> to vector<16x1xf32>
    %cst_56 = arith.constant 3.125000e-02 : f32
    %151 = vector.broadcast %cst_56 : f32 to vector<16x1xf32>
    %152 = arith.mulf %150, %151 : vector<16x1xf32>
    %153 = vector.broadcast %152 : vector<16x1xf32> to vector<16x32xf32>
    %154 = arith.subf %146, %153 : vector<16x32xf32>
    %155 = arith.mulf %154, %154 : vector<16x32xf32>
    %cst_57 = arith.constant dense<0.000000e+00> : vector<16xf32>
    %156 = vector.multi_reduction <add>, %155, %cst_57 [1] : vector<16x32xf32> to vector<16xf32>
    %157 = vector.shape_cast %156 : vector<16xf32> to vector<16x1xf32>
    %cst_58 = arith.constant 0.0322580636 : f32
    %158 = vector.broadcast %cst_58 : f32 to vector<16x1xf32>
    %159 = arith.mulf %157, %158 : vector<16x1xf32>
    %160 = vector.broadcast %147 : vector<1x32xf32> to vector<16x32xf32>
    %161 = arith.mulf %160, %154 : vector<16x32xf32>
    %162 = math.sqrt %159 : vector<16x1xf32>
    %cst_59 = arith.constant 9.99999997E-7 : f32
    %163 = vector.broadcast %cst_59 : f32 to vector<16x1xf32>
    %164 = arith.addf %162, %163 : vector<16x1xf32>
    %165 = vector.broadcast %164 : vector<16x1xf32> to vector<16x32xf32>
    %166 = arith.divf %161, %165 : vector<16x32xf32>
    %167 = vector.broadcast %148 : vector<1x32xf32> to vector<16x32xf32>
    %168 = arith.addf %166, %167 : vector<16x32xf32>
    %169 = arith.truncf %168 : vector<16x32xf32> to vector<16x32xbf16>
    %c0_60 = arith.constant 0 : index
    %c128 = arith.constant 128 : index
    %170 = vector.load %arg5[%c0_60, %c128] : memref<32x512xbf16, #tpu.memory_space<vmem>>, vector<32x32xbf16>
    %cst_61 = arith.constant dense<0.000000e+00> : vector<16x32xf32>
    %171 = tpu.matmul %169, %170, %cst_61 {dimension_numbers = #tpu.dot_dimension_numbers<[1], [0], [0], [1], [0, 0, 1, 1], [], []>} : vector<16x32xbf16>, vector<32x32xbf16>, vector<16x32xf32> -> vector<16x32xf32>
    %c4 = arith.constant 4 : index
    %c0_62 = arith.constant 0 : index
    %172 = vector.load %arg6[%c4, %c0_62] : memref<20x64xf32, #tpu.memory_space<vmem>>, vector<1x32xf32>
    %173 = vector.broadcast %172 : vector<1x32xf32> to vector<16x32xf32>
    %174 = arith.addf %171, %173 : vector<16x32xf32>
    %c0_63 = arith.constant 0 : index
    %c160 = arith.constant 160 : index
    %175 = vector.load %arg5[%c0_63, %c160] : memref<32x512xbf16, #tpu.memory_space<vmem>>, vector<32x64xbf16>
    %cst_64 = arith.constant dense<0.000000e+00> : vector<16x64xf32>
    %176 = tpu.matmul %2, %175, %cst_64 {dimension_numbers = #tpu.dot_dimension_numbers<[1], [0], [0], [1], [0, 0, 1, 1], [], []>} : vector<16x32xbf16>, vector<32x64xbf16>, vector<16x64xf32> -> vector<16x64xf32>
    %177 = vector.extract_strided_slice %176 {offsets = [0, 0], sizes = [16, 32], strides = [1, 1]} : vector<16x64xf32> to vector<16x32xf32>
    %c5 = arith.constant 5 : index
    %c0_65 = arith.constant 0 : index
    %178 = vector.load %arg6[%c5, %c0_65] : memref<20x64xf32, #tpu.memory_space<vmem>>, vector<1x32xf32>
    %179 = vector.broadcast %178 : vector<1x32xf32> to vector<16x32xf32>
    %180 = arith.addf %177, %179 : vector<16x32xf32>
    %181 = vector.extract_strided_slice %176 {offsets = [0, 32], sizes = [16, 32], strides = [1, 1]} : vector<16x64xf32> to vector<16x32xf32>
    %c6 = arith.constant 6 : index
    %c0_66 = arith.constant 0 : index
    %182 = vector.load %arg6[%c6, %c0_66] : memref<20x64xf32, #tpu.memory_space<vmem>>, vector<1x32xf32>
    %183 = vector.broadcast %182 : vector<1x32xf32> to vector<16x32xf32>
    %184 = arith.addf %181, %183 : vector<16x32xf32>
    %c0_67 = arith.constant 0 : index
    %c224 = arith.constant 224 : index
    %185 = vector.load %arg5[%c0_67, %c224] : memref<32x512xbf16, #tpu.memory_space<vmem>>, vector<32x32xbf16>
    %186 = arith.truncf %174 : vector<16x32xf32> to vector<16x32xbf16>
    %187 = arith.truncf %180 : vector<16x32xf32> to vector<16x32xbf16>
    %188 = arith.truncf %184 : vector<16x32xf32> to vector<16x32xbf16>
    %189 = vector.extract_strided_slice %186 {offsets = [0, 0], sizes = [16, 8], strides = [1, 1]} : vector<16x32xbf16> to vector<16x8xbf16>
    %190 = vector.extract_strided_slice %187 {offsets = [0, 0], sizes = [16, 8], strides = [1, 1]} : vector<16x32xbf16> to vector<16x8xbf16>
    %cst_68 = arith.constant dense<0.000000e+00> : vector<16x16xf32>
    %191 = tpu.matmul %189, %190, %cst_68 {dimension_numbers = #tpu.dot_dimension_numbers<[1], [1], [0], [0], [0, 0, 1, 0], [], []>} : vector<16x8xbf16>, vector<16x8xbf16>, vector<16x16xf32> -> vector<16x16xf32>
    %cst_69 = arith.constant 0.353553385 : f32
    %192 = vector.broadcast %cst_69 : f32 to vector<16x16xf32>
    %193 = arith.mulf %191, %192 : vector<16x16xf32>
    %194 = arith.addf %193, %8 : vector<16x16xf32>
    %cst_70 = arith.constant dense<0xFF800000> : vector<16xf32>
    %195 = vector.multi_reduction <maximumf>, %194, %cst_70 [1] : vector<16x16xf32> to vector<16xf32>
    %196 = vector.shape_cast %195 : vector<16xf32> to vector<16x1xf32>
    %197 = vector.broadcast %196 : vector<16x1xf32> to vector<16x16xf32>
    %198 = arith.subf %194, %197 : vector<16x16xf32>
    %199 = math.exp %198 : vector<16x16xf32>
    %cst_71 = arith.constant dense<0.000000e+00> : vector<16xf32>
    %200 = vector.multi_reduction <add>, %199, %cst_71 [1] : vector<16x16xf32> to vector<16xf32>
    %201 = vector.shape_cast %200 : vector<16xf32> to vector<16x1xf32>
    %202 = tpu.reciprocal %201 {approx = true} : vector<16x1xf32> -> vector<16x1xf32>
    %203 = vector.broadcast %202 : vector<16x1xf32> to vector<16x16xf32>
    %204 = arith.mulf %199, %203 : vector<16x16xf32>
    %205 = arith.truncf %204 : vector<16x16xf32> to vector<16x16xbf16>
    %206 = vector.extract_strided_slice %188 {offsets = [0, 0], sizes = [16, 8], strides = [1, 1]} : vector<16x32xbf16> to vector<16x8xbf16>
    %cst_72 = arith.constant dense<0.000000e+00> : vector<16x8xf32>
    %207 = tpu.matmul %205, %206, %cst_72 {dimension_numbers = #tpu.dot_dimension_numbers<[1], [0], [0], [1], [0, 0, 1, 1], [], []>} : vector<16x16xbf16>, vector<16x8xbf16>, vector<16x8xf32> -> vector<16x8xf32>
    %208 = arith.truncf %207 : vector<16x8xf32> to vector<16x8xbf16>
    %209 = vector.extract_strided_slice %185 {offsets = [0, 0], sizes = [8, 32], strides = [1, 1]} : vector<32x32xbf16> to vector<8x32xbf16>
    %cst_73 = arith.constant dense<0.000000e+00> : vector<16x32xf32>
    %210 = tpu.matmul %208, %209, %cst_73 {dimension_numbers = #tpu.dot_dimension_numbers<[1], [0], [0], [1], [0, 0, 1, 1], [], []>} : vector<16x8xbf16>, vector<8x32xbf16>, vector<16x32xf32> -> vector<16x32xf32>
    %211 = vector.extract_strided_slice %186 {offsets = [0, 8], sizes = [16, 8], strides = [1, 1]} : vector<16x32xbf16> to vector<16x8xbf16>
    %212 = vector.extract_strided_slice %187 {offsets = [0, 8], sizes = [16, 8], strides = [1, 1]} : vector<16x32xbf16> to vector<16x8xbf16>
    %cst_74 = arith.constant dense<0.000000e+00> : vector<16x16xf32>
    %213 = tpu.matmul %211, %212, %cst_74 {dimension_numbers = #tpu.dot_dimension_numbers<[1], [1], [0], [0], [0, 0, 1, 0], [], []>} : vector<16x8xbf16>, vector<16x8xbf16>, vector<16x16xf32> -> vector<16x16xf32>
    %cst_75 = arith.constant 0.353553385 : f32
    %214 = vector.broadcast %cst_75 : f32 to vector<16x16xf32>
    %215 = arith.mulf %213, %214 : vector<16x16xf32>
    %216 = arith.addf %215, %8 : vector<16x16xf32>
    %cst_76 = arith.constant dense<0xFF800000> : vector<16xf32>
    %217 = vector.multi_reduction <maximumf>, %216, %cst_76 [1] : vector<16x16xf32> to vector<16xf32>
    %218 = vector.shape_cast %217 : vector<16xf32> to vector<16x1xf32>
    %219 = vector.broadcast %218 : vector<16x1xf32> to vector<16x16xf32>
    %220 = arith.subf %216, %219 : vector<16x16xf32>
    %221 = math.exp %220 : vector<16x16xf32>
    %cst_77 = arith.constant dense<0.000000e+00> : vector<16xf32>
    %222 = vector.multi_reduction <add>, %221, %cst_77 [1] : vector<16x16xf32> to vector<16xf32>
    %223 = vector.shape_cast %222 : vector<16xf32> to vector<16x1xf32>
    %224 = tpu.reciprocal %223 {approx = true} : vector<16x1xf32> -> vector<16x1xf32>
    %225 = vector.broadcast %224 : vector<16x1xf32> to vector<16x16xf32>
    %226 = arith.mulf %221, %225 : vector<16x16xf32>
    %227 = arith.truncf %226 : vector<16x16xf32> to vector<16x16xbf16>
    %228 = vector.extract_strided_slice %188 {offsets = [0, 8], sizes = [16, 8], strides = [1, 1]} : vector<16x32xbf16> to vector<16x8xbf16>
    %cst_78 = arith.constant dense<0.000000e+00> : vector<16x8xf32>
    %229 = tpu.matmul %227, %228, %cst_78 {dimension_numbers = #tpu.dot_dimension_numbers<[1], [0], [0], [1], [0, 0, 1, 1], [], []>} : vector<16x16xbf16>, vector<16x8xbf16>, vector<16x8xf32> -> vector<16x8xf32>
    %230 = arith.truncf %229 : vector<16x8xf32> to vector<16x8xbf16>
    %231 = vector.extract_strided_slice %185 {offsets = [8, 0], sizes = [8, 32], strides = [1, 1]} : vector<32x32xbf16> to vector<8x32xbf16>
    %cst_79 = arith.constant dense<0.000000e+00> : vector<16x32xf32>
    %232 = tpu.matmul %230, %231, %cst_79 {dimension_numbers = #tpu.dot_dimension_numbers<[1], [0], [0], [1], [0, 0, 1, 1], [], []>} : vector<16x8xbf16>, vector<8x32xbf16>, vector<16x32xf32> -> vector<16x32xf32>
    %233 = arith.addf %210, %232 : vector<16x32xf32>
    %234 = vector.extract_strided_slice %186 {offsets = [0, 16], sizes = [16, 8], strides = [1, 1]} : vector<16x32xbf16> to vector<16x8xbf16>
    %235 = vector.extract_strided_slice %187 {offsets = [0, 16], sizes = [16, 8], strides = [1, 1]} : vector<16x32xbf16> to vector<16x8xbf16>
    %cst_80 = arith.constant dense<0.000000e+00> : vector<16x16xf32>
    %236 = tpu.matmul %234, %235, %cst_80 {dimension_numbers = #tpu.dot_dimension_numbers<[1], [1], [0], [0], [0, 0, 1, 0], [], []>} : vector<16x8xbf16>, vector<16x8xbf16>, vector<16x16xf32> -> vector<16x16xf32>
    %cst_81 = arith.constant 0.353553385 : f32
    %237 = vector.broadcast %cst_81 : f32 to vector<16x16xf32>
    %238 = arith.mulf %236, %237 : vector<16x16xf32>
    %239 = arith.addf %238, %8 : vector<16x16xf32>
    %cst_82 = arith.constant dense<0xFF800000> : vector<16xf32>
    %240 = vector.multi_reduction <maximumf>, %239, %cst_82 [1] : vector<16x16xf32> to vector<16xf32>
    %241 = vector.shape_cast %240 : vector<16xf32> to vector<16x1xf32>
    %242 = vector.broadcast %241 : vector<16x1xf32> to vector<16x16xf32>
    %243 = arith.subf %239, %242 : vector<16x16xf32>
    %244 = math.exp %243 : vector<16x16xf32>
    %cst_83 = arith.constant dense<0.000000e+00> : vector<16xf32>
    %245 = vector.multi_reduction <add>, %244, %cst_83 [1] : vector<16x16xf32> to vector<16xf32>
    %246 = vector.shape_cast %245 : vector<16xf32> to vector<16x1xf32>
    %247 = tpu.reciprocal %246 {approx = true} : vector<16x1xf32> -> vector<16x1xf32>
    %248 = vector.broadcast %247 : vector<16x1xf32> to vector<16x16xf32>
    %249 = arith.mulf %244, %248 : vector<16x16xf32>
    %250 = arith.truncf %249 : vector<16x16xf32> to vector<16x16xbf16>
    %251 = vector.extract_strided_slice %188 {offsets = [0, 16], sizes = [16, 8], strides = [1, 1]} : vector<16x32xbf16> to vector<16x8xbf16>
    %cst_84 = arith.constant dense<0.000000e+00> : vector<16x8xf32>
    %252 = tpu.matmul %250, %251, %cst_84 {dimension_numbers = #tpu.dot_dimension_numbers<[1], [0], [0], [1], [0, 0, 1, 1], [], []>} : vector<16x16xbf16>, vector<16x8xbf16>, vector<16x8xf32> -> vector<16x8xf32>
    %253 = arith.truncf %252 : vector<16x8xf32> to vector<16x8xbf16>
    %254 = vector.extract_strided_slice %185 {offsets = [16, 0], sizes = [8, 32], strides = [1, 1]} : vector<32x32xbf16> to vector<8x32xbf16>
    %cst_85 = arith.constant dense<0.000000e+00> : vector<16x32xf32>
    %255 = tpu.matmul %253, %254, %cst_85 {dimension_numbers = #tpu.dot_dimension_numbers<[1], [0], [0], [1], [0, 0, 1, 1], [], []>} : vector<16x8xbf16>, vector<8x32xbf16>, vector<16x32xf32> -> vector<16x32xf32>
    %256 = arith.addf %233, %255 : vector<16x32xf32>
    %257 = vector.extract_strided_slice %186 {offsets = [0, 24], sizes = [16, 8], strides = [1, 1]} : vector<16x32xbf16> to vector<16x8xbf16>
    %258 = vector.extract_strided_slice %187 {offsets = [0, 24], sizes = [16, 8], strides = [1, 1]} : vector<16x32xbf16> to vector<16x8xbf16>
    %cst_86 = arith.constant dense<0.000000e+00> : vector<16x16xf32>
    %259 = tpu.matmul %257, %258, %cst_86 {dimension_numbers = #tpu.dot_dimension_numbers<[1], [1], [0], [0], [0, 0, 1, 0], [], []>} : vector<16x8xbf16>, vector<16x8xbf16>, vector<16x16xf32> -> vector<16x16xf32>
    %cst_87 = arith.constant 0.353553385 : f32
    %260 = vector.broadcast %cst_87 : f32 to vector<16x16xf32>
    %261 = arith.mulf %259, %260 : vector<16x16xf32>
    %262 = arith.addf %261, %8 : vector<16x16xf32>
    %cst_88 = arith.constant dense<0xFF800000> : vector<16xf32>
    %263 = vector.multi_reduction <maximumf>, %262, %cst_88 [1] : vector<16x16xf32> to vector<16xf32>
    %264 = vector.shape_cast %263 : vector<16xf32> to vector<16x1xf32>
    %265 = vector.broadcast %264 : vector<16x1xf32> to vector<16x16xf32>
    %266 = arith.subf %262, %265 : vector<16x16xf32>
    %267 = math.exp %266 : vector<16x16xf32>
    %cst_89 = arith.constant dense<0.000000e+00> : vector<16xf32>
    %268 = vector.multi_reduction <add>, %267, %cst_89 [1] : vector<16x16xf32> to vector<16xf32>
    %269 = vector.shape_cast %268 : vector<16xf32> to vector<16x1xf32>
    %270 = tpu.reciprocal %269 {approx = true} : vector<16x1xf32> -> vector<16x1xf32>
    %271 = vector.broadcast %270 : vector<16x1xf32> to vector<16x16xf32>
    %272 = arith.mulf %267, %271 : vector<16x16xf32>
    %273 = arith.truncf %272 : vector<16x16xf32> to vector<16x16xbf16>
    %274 = vector.extract_strided_slice %188 {offsets = [0, 24], sizes = [16, 8], strides = [1, 1]} : vector<16x32xbf16> to vector<16x8xbf16>
    %cst_90 = arith.constant dense<0.000000e+00> : vector<16x8xf32>
    %275 = tpu.matmul %273, %274, %cst_90 {dimension_numbers = #tpu.dot_dimension_numbers<[1], [0], [0], [1], [0, 0, 1, 1], [], []>} : vector<16x16xbf16>, vector<16x8xbf16>, vector<16x8xf32> -> vector<16x8xf32>
    %276 = arith.truncf %275 : vector<16x8xf32> to vector<16x8xbf16>
    %277 = vector.extract_strided_slice %185 {offsets = [24, 0], sizes = [8, 32], strides = [1, 1]} : vector<32x32xbf16> to vector<8x32xbf16>
    %cst_91 = arith.constant dense<0.000000e+00> : vector<16x32xf32>
    %278 = tpu.matmul %276, %277, %cst_91 {dimension_numbers = #tpu.dot_dimension_numbers<[1], [0], [0], [1], [0, 0, 1, 1], [], []>} : vector<16x8xbf16>, vector<8x32xbf16>, vector<16x32xf32> -> vector<16x32xf32>
    %279 = arith.addf %256, %278 : vector<16x32xf32>
    %c7 = arith.constant 7 : index
    %c0_92 = arith.constant 0 : index
    %280 = vector.load %arg6[%c7, %c0_92] : memref<20x64xf32, #tpu.memory_space<vmem>>, vector<1x32xf32>
    %281 = vector.broadcast %280 : vector<1x32xf32> to vector<16x32xf32>
    %282 = arith.addf %279, %281 : vector<16x32xf32>
    %283 = arith.truncf %282 : vector<16x32xf32> to vector<16x32xbf16>
    %c0_93 = arith.constant 0 : index
    %c256 = arith.constant 256 : index
    %284 = vector.load %arg5[%c0_93, %c256] : memref<32x512xbf16, #tpu.memory_space<vmem>>, vector<32x32xbf16>
    %cst_94 = arith.constant dense<0.000000e+00> : vector<16x32xf32>
    %285 = tpu.matmul %283, %284, %cst_94 {dimension_numbers = #tpu.dot_dimension_numbers<[1], [0], [0], [1], [0, 0, 1, 1], [], []>} : vector<16x32xbf16>, vector<32x32xbf16>, vector<16x32xf32> -> vector<16x32xf32>
    %c8 = arith.constant 8 : index
    %c0_95 = arith.constant 0 : index
    %286 = vector.load %arg6[%c8, %c0_95] : memref<20x64xf32, #tpu.memory_space<vmem>>, vector<1x32xf32>
    %287 = vector.broadcast %286 : vector<1x32xf32> to vector<16x32xf32>
    %288 = arith.addf %285, %287 : vector<16x32xf32>
    %c0_96 = arith.constant 0 : index
    %c288 = arith.constant 288 : index
    %289 = vector.load %arg5[%c0_96, %c288] : memref<32x512xbf16, #tpu.memory_space<vmem>>, vector<32x64xbf16>
    %cst_97 = arith.constant dense<0.000000e+00> : vector<16x64xf32>
    %290 = tpu.matmul %4, %289, %cst_97 {dimension_numbers = #tpu.dot_dimension_numbers<[1], [0], [0], [1], [0, 0, 1, 1], [], []>} : vector<16x32xbf16>, vector<32x64xbf16>, vector<16x64xf32> -> vector<16x64xf32>
    %291 = vector.extract_strided_slice %290 {offsets = [0, 0], sizes = [16, 32], strides = [1, 1]} : vector<16x64xf32> to vector<16x32xf32>
    %c9 = arith.constant 9 : index
    %c0_98 = arith.constant 0 : index
    %292 = vector.load %arg6[%c9, %c0_98] : memref<20x64xf32, #tpu.memory_space<vmem>>, vector<1x32xf32>
    %293 = vector.broadcast %292 : vector<1x32xf32> to vector<16x32xf32>
    %294 = arith.addf %291, %293 : vector<16x32xf32>
    %295 = vector.extract_strided_slice %290 {offsets = [0, 32], sizes = [16, 32], strides = [1, 1]} : vector<16x64xf32> to vector<16x32xf32>
    %c10 = arith.constant 10 : index
    %c0_99 = arith.constant 0 : index
    %296 = vector.load %arg6[%c10, %c0_99] : memref<20x64xf32, #tpu.memory_space<vmem>>, vector<1x32xf32>
    %297 = vector.broadcast %296 : vector<1x32xf32> to vector<16x32xf32>
    %298 = arith.addf %295, %297 : vector<16x32xf32>
    %c0_100 = arith.constant 0 : index
    %c352 = arith.constant 352 : index
    %299 = vector.load %arg5[%c0_100, %c352] : memref<32x512xbf16, #tpu.memory_space<vmem>>, vector<32x32xbf16>
    %300 = arith.truncf %288 : vector<16x32xf32> to vector<16x32xbf16>
    %301 = arith.truncf %294 : vector<16x32xf32> to vector<16x32xbf16>
    %302 = arith.truncf %298 : vector<16x32xf32> to vector<16x32xbf16>
    %303 = vector.extract_strided_slice %300 {offsets = [0, 0], sizes = [16, 8], strides = [1, 1]} : vector<16x32xbf16> to vector<16x8xbf16>
    %304 = vector.extract_strided_slice %301 {offsets = [0, 0], sizes = [16, 8], strides = [1, 1]} : vector<16x32xbf16> to vector<16x8xbf16>
    %cst_101 = arith.constant dense<0.000000e+00> : vector<16x16xf32>
    %305 = tpu.matmul %303, %304, %cst_101 {dimension_numbers = #tpu.dot_dimension_numbers<[1], [1], [0], [0], [0, 0, 1, 0], [], []>} : vector<16x8xbf16>, vector<16x8xbf16>, vector<16x16xf32> -> vector<16x16xf32>
    %cst_102 = arith.constant 0.353553385 : f32
    %306 = vector.broadcast %cst_102 : f32 to vector<16x16xf32>
    %307 = arith.mulf %305, %306 : vector<16x16xf32>
    %308 = arith.addf %307, %10 : vector<16x16xf32>
    %cst_103 = arith.constant dense<0xFF800000> : vector<16xf32>
    %309 = vector.multi_reduction <maximumf>, %308, %cst_103 [1] : vector<16x16xf32> to vector<16xf32>
    %310 = vector.shape_cast %309 : vector<16xf32> to vector<16x1xf32>
    %311 = vector.broadcast %310 : vector<16x1xf32> to vector<16x16xf32>
    %312 = arith.subf %308, %311 : vector<16x16xf32>
    %313 = math.exp %312 : vector<16x16xf32>
    %cst_104 = arith.constant dense<0.000000e+00> : vector<16xf32>
    %314 = vector.multi_reduction <add>, %313, %cst_104 [1] : vector<16x16xf32> to vector<16xf32>
    %315 = vector.shape_cast %314 : vector<16xf32> to vector<16x1xf32>
    %316 = tpu.reciprocal %315 {approx = true} : vector<16x1xf32> -> vector<16x1xf32>
    %317 = vector.broadcast %316 : vector<16x1xf32> to vector<16x16xf32>
    %318 = arith.mulf %313, %317 : vector<16x16xf32>
    %319 = arith.truncf %318 : vector<16x16xf32> to vector<16x16xbf16>
    %320 = vector.extract_strided_slice %302 {offsets = [0, 0], sizes = [16, 8], strides = [1, 1]} : vector<16x32xbf16> to vector<16x8xbf16>
    %cst_105 = arith.constant dense<0.000000e+00> : vector<16x8xf32>
    %321 = tpu.matmul %319, %320, %cst_105 {dimension_numbers = #tpu.dot_dimension_numbers<[1], [0], [0], [1], [0, 0, 1, 1], [], []>} : vector<16x16xbf16>, vector<16x8xbf16>, vector<16x8xf32> -> vector<16x8xf32>
    %322 = arith.truncf %321 : vector<16x8xf32> to vector<16x8xbf16>
    %323 = vector.extract_strided_slice %299 {offsets = [0, 0], sizes = [8, 32], strides = [1, 1]} : vector<32x32xbf16> to vector<8x32xbf16>
    %cst_106 = arith.constant dense<0.000000e+00> : vector<16x32xf32>
    %324 = tpu.matmul %322, %323, %cst_106 {dimension_numbers = #tpu.dot_dimension_numbers<[1], [0], [0], [1], [0, 0, 1, 1], [], []>} : vector<16x8xbf16>, vector<8x32xbf16>, vector<16x32xf32> -> vector<16x32xf32>
    %325 = vector.extract_strided_slice %300 {offsets = [0, 8], sizes = [16, 8], strides = [1, 1]} : vector<16x32xbf16> to vector<16x8xbf16>
    %326 = vector.extract_strided_slice %301 {offsets = [0, 8], sizes = [16, 8], strides = [1, 1]} : vector<16x32xbf16> to vector<16x8xbf16>
    %cst_107 = arith.constant dense<0.000000e+00> : vector<16x16xf32>
    %327 = tpu.matmul %325, %326, %cst_107 {dimension_numbers = #tpu.dot_dimension_numbers<[1], [1], [0], [0], [0, 0, 1, 0], [], []>} : vector<16x8xbf16>, vector<16x8xbf16>, vector<16x16xf32> -> vector<16x16xf32>
    %cst_108 = arith.constant 0.353553385 : f32
    %328 = vector.broadcast %cst_108 : f32 to vector<16x16xf32>
    %329 = arith.mulf %327, %328 : vector<16x16xf32>
    %330 = arith.addf %329, %10 : vector<16x16xf32>
    %cst_109 = arith.constant dense<0xFF800000> : vector<16xf32>
    %331 = vector.multi_reduction <maximumf>, %330, %cst_109 [1] : vector<16x16xf32> to vector<16xf32>
    %332 = vector.shape_cast %331 : vector<16xf32> to vector<16x1xf32>
    %333 = vector.broadcast %332 : vector<16x1xf32> to vector<16x16xf32>
    %334 = arith.subf %330, %333 : vector<16x16xf32>
    %335 = math.exp %334 : vector<16x16xf32>
    %cst_110 = arith.constant dense<0.000000e+00> : vector<16xf32>
    %336 = vector.multi_reduction <add>, %335, %cst_110 [1] : vector<16x16xf32> to vector<16xf32>
    %337 = vector.shape_cast %336 : vector<16xf32> to vector<16x1xf32>
    %338 = tpu.reciprocal %337 {approx = true} : vector<16x1xf32> -> vector<16x1xf32>
    %339 = vector.broadcast %338 : vector<16x1xf32> to vector<16x16xf32>
    %340 = arith.mulf %335, %339 : vector<16x16xf32>
    %341 = arith.truncf %340 : vector<16x16xf32> to vector<16x16xbf16>
    %342 = vector.extract_strided_slice %302 {offsets = [0, 8], sizes = [16, 8], strides = [1, 1]} : vector<16x32xbf16> to vector<16x8xbf16>
    %cst_111 = arith.constant dense<0.000000e+00> : vector<16x8xf32>
    %343 = tpu.matmul %341, %342, %cst_111 {dimension_numbers = #tpu.dot_dimension_numbers<[1], [0], [0], [1], [0, 0, 1, 1], [], []>} : vector<16x16xbf16>, vector<16x8xbf16>, vector<16x8xf32> -> vector<16x8xf32>
    %344 = arith.truncf %343 : vector<16x8xf32> to vector<16x8xbf16>
    %345 = vector.extract_strided_slice %299 {offsets = [8, 0], sizes = [8, 32], strides = [1, 1]} : vector<32x32xbf16> to vector<8x32xbf16>
    %cst_112 = arith.constant dense<0.000000e+00> : vector<16x32xf32>
    %346 = tpu.matmul %344, %345, %cst_112 {dimension_numbers = #tpu.dot_dimension_numbers<[1], [0], [0], [1], [0, 0, 1, 1], [], []>} : vector<16x8xbf16>, vector<8x32xbf16>, vector<16x32xf32> -> vector<16x32xf32>
    %347 = arith.addf %324, %346 : vector<16x32xf32>
    %348 = vector.extract_strided_slice %300 {offsets = [0, 16], sizes = [16, 8], strides = [1, 1]} : vector<16x32xbf16> to vector<16x8xbf16>
    %349 = vector.extract_strided_slice %301 {offsets = [0, 16], sizes = [16, 8], strides = [1, 1]} : vector<16x32xbf16> to vector<16x8xbf16>
    %cst_113 = arith.constant dense<0.000000e+00> : vector<16x16xf32>
    %350 = tpu.matmul %348, %349, %cst_113 {dimension_numbers = #tpu.dot_dimension_numbers<[1], [1], [0], [0], [0, 0, 1, 0], [], []>} : vector<16x8xbf16>, vector<16x8xbf16>, vector<16x16xf32> -> vector<16x16xf32>
    %cst_114 = arith.constant 0.353553385 : f32
    %351 = vector.broadcast %cst_114 : f32 to vector<16x16xf32>
    %352 = arith.mulf %350, %351 : vector<16x16xf32>
    %353 = arith.addf %352, %10 : vector<16x16xf32>
    %cst_115 = arith.constant dense<0xFF800000> : vector<16xf32>
    %354 = vector.multi_reduction <maximumf>, %353, %cst_115 [1] : vector<16x16xf32> to vector<16xf32>
    %355 = vector.shape_cast %354 : vector<16xf32> to vector<16x1xf32>
    %356 = vector.broadcast %355 : vector<16x1xf32> to vector<16x16xf32>
    %357 = arith.subf %353, %356 : vector<16x16xf32>
    %358 = math.exp %357 : vector<16x16xf32>
    %cst_116 = arith.constant dense<0.000000e+00> : vector<16xf32>
    %359 = vector.multi_reduction <add>, %358, %cst_116 [1] : vector<16x16xf32> to vector<16xf32>
    %360 = vector.shape_cast %359 : vector<16xf32> to vector<16x1xf32>
    %361 = tpu.reciprocal %360 {approx = true} : vector<16x1xf32> -> vector<16x1xf32>
    %362 = vector.broadcast %361 : vector<16x1xf32> to vector<16x16xf32>
    %363 = arith.mulf %358, %362 : vector<16x16xf32>
    %364 = arith.truncf %363 : vector<16x16xf32> to vector<16x16xbf16>
    %365 = vector.extract_strided_slice %302 {offsets = [0, 16], sizes = [16, 8], strides = [1, 1]} : vector<16x32xbf16> to vector<16x8xbf16>
    %cst_117 = arith.constant dense<0.000000e+00> : vector<16x8xf32>
    %366 = tpu.matmul %364, %365, %cst_117 {dimension_numbers = #tpu.dot_dimension_numbers<[1], [0], [0], [1], [0, 0, 1, 1], [], []>} : vector<16x16xbf16>, vector<16x8xbf16>, vector<16x8xf32> -> vector<16x8xf32>
    %367 = arith.truncf %366 : vector<16x8xf32> to vector<16x8xbf16>
    %368 = vector.extract_strided_slice %299 {offsets = [16, 0], sizes = [8, 32], strides = [1, 1]} : vector<32x32xbf16> to vector<8x32xbf16>
    %cst_118 = arith.constant dense<0.000000e+00> : vector<16x32xf32>
    %369 = tpu.matmul %367, %368, %cst_118 {dimension_numbers = #tpu.dot_dimension_numbers<[1], [0], [0], [1], [0, 0, 1, 1], [], []>} : vector<16x8xbf16>, vector<8x32xbf16>, vector<16x32xf32> -> vector<16x32xf32>
    %370 = arith.addf %347, %369 : vector<16x32xf32>
    %371 = vector.extract_strided_slice %300 {offsets = [0, 24], sizes = [16, 8], strides = [1, 1]} : vector<16x32xbf16> to vector<16x8xbf16>
    %372 = vector.extract_strided_slice %301 {offsets = [0, 24], sizes = [16, 8], strides = [1, 1]} : vector<16x32xbf16> to vector<16x8xbf16>
    %cst_119 = arith.constant dense<0.000000e+00> : vector<16x16xf32>
    %373 = tpu.matmul %371, %372, %cst_119 {dimension_numbers = #tpu.dot_dimension_numbers<[1], [1], [0], [0], [0, 0, 1, 0], [], []>} : vector<16x8xbf16>, vector<16x8xbf16>, vector<16x16xf32> -> vector<16x16xf32>
    %cst_120 = arith.constant 0.353553385 : f32
    %374 = vector.broadcast %cst_120 : f32 to vector<16x16xf32>
    %375 = arith.mulf %373, %374 : vector<16x16xf32>
    %376 = arith.addf %375, %10 : vector<16x16xf32>
    %cst_121 = arith.constant dense<0xFF800000> : vector<16xf32>
    %377 = vector.multi_reduction <maximumf>, %376, %cst_121 [1] : vector<16x16xf32> to vector<16xf32>
    %378 = vector.shape_cast %377 : vector<16xf32> to vector<16x1xf32>
    %379 = vector.broadcast %378 : vector<16x1xf32> to vector<16x16xf32>
    %380 = arith.subf %376, %379 : vector<16x16xf32>
    %381 = math.exp %380 : vector<16x16xf32>
    %cst_122 = arith.constant dense<0.000000e+00> : vector<16xf32>
    %382 = vector.multi_reduction <add>, %381, %cst_122 [1] : vector<16x16xf32> to vector<16xf32>
    %383 = vector.shape_cast %382 : vector<16xf32> to vector<16x1xf32>
    %384 = tpu.reciprocal %383 {approx = true} : vector<16x1xf32> -> vector<16x1xf32>
    %385 = vector.broadcast %384 : vector<16x1xf32> to vector<16x16xf32>
    %386 = arith.mulf %381, %385 : vector<16x16xf32>
    %387 = arith.truncf %386 : vector<16x16xf32> to vector<16x16xbf16>
    %388 = vector.extract_strided_slice %302 {offsets = [0, 24], sizes = [16, 8], strides = [1, 1]} : vector<16x32xbf16> to vector<16x8xbf16>
    %cst_123 = arith.constant dense<0.000000e+00> : vector<16x8xf32>
    %389 = tpu.matmul %387, %388, %cst_123 {dimension_numbers = #tpu.dot_dimension_numbers<[1], [0], [0], [1], [0, 0, 1, 1], [], []>} : vector<16x16xbf16>, vector<16x8xbf16>, vector<16x8xf32> -> vector<16x8xf32>
    %390 = arith.truncf %389 : vector<16x8xf32> to vector<16x8xbf16>
    %391 = vector.extract_strided_slice %299 {offsets = [24, 0], sizes = [8, 32], strides = [1, 1]} : vector<32x32xbf16> to vector<8x32xbf16>
    %cst_124 = arith.constant dense<0.000000e+00> : vector<16x32xf32>
    %392 = tpu.matmul %390, %391, %cst_124 {dimension_numbers = #tpu.dot_dimension_numbers<[1], [0], [0], [1], [0, 0, 1, 1], [], []>} : vector<16x8xbf16>, vector<8x32xbf16>, vector<16x32xf32> -> vector<16x32xf32>
    %393 = arith.addf %370, %392 : vector<16x32xf32>
    %c11 = arith.constant 11 : index
    %c0_125 = arith.constant 0 : index
    %394 = vector.load %arg6[%c11, %c0_125] : memref<20x64xf32, #tpu.memory_space<vmem>>, vector<1x32xf32>
    %395 = vector.broadcast %394 : vector<1x32xf32> to vector<16x32xf32>
    %396 = arith.addf %393, %395 : vector<16x32xf32>
    %397 = arith.addf %146, %396 : vector<16x32xf32>
    %c14 = arith.constant 14 : index
    %c0_126 = arith.constant 0 : index
    %398 = vector.load %arg6[%c14, %c0_126] : memref<20x64xf32, #tpu.memory_space<vmem>>, vector<1x32xf32>
    %c17 = arith.constant 17 : index
    %c0_127 = arith.constant 0 : index
    %399 = vector.load %arg6[%c17, %c0_127] : memref<20x64xf32, #tpu.memory_space<vmem>>, vector<1x32xf32>
    %cst_128 = arith.constant dense<0.000000e+00> : vector<16xf32>
    %400 = vector.multi_reduction <add>, %397, %cst_128 [1] : vector<16x32xf32> to vector<16xf32>
    %401 = vector.shape_cast %400 : vector<16xf32> to vector<16x1xf32>
    %cst_129 = arith.constant 3.125000e-02 : f32
    %402 = vector.broadcast %cst_129 : f32 to vector<16x1xf32>
    %403 = arith.mulf %401, %402 : vector<16x1xf32>
    %404 = vector.broadcast %403 : vector<16x1xf32> to vector<16x32xf32>
    %405 = arith.subf %397, %404 : vector<16x32xf32>
    %406 = arith.mulf %405, %405 : vector<16x32xf32>
    %cst_130 = arith.constant dense<0.000000e+00> : vector<16xf32>
    %407 = vector.multi_reduction <add>, %406, %cst_130 [1] : vector<16x32xf32> to vector<16xf32>
    %408 = vector.shape_cast %407 : vector<16xf32> to vector<16x1xf32>
    %cst_131 = arith.constant 0.0322580636 : f32
    %409 = vector.broadcast %cst_131 : f32 to vector<16x1xf32>
    %410 = arith.mulf %408, %409 : vector<16x1xf32>
    %411 = vector.broadcast %398 : vector<1x32xf32> to vector<16x32xf32>
    %412 = arith.mulf %411, %405 : vector<16x32xf32>
    %413 = math.sqrt %410 : vector<16x1xf32>
    %cst_132 = arith.constant 9.99999997E-7 : f32
    %414 = vector.broadcast %cst_132 : f32 to vector<16x1xf32>
    %415 = arith.addf %413, %414 : vector<16x1xf32>
    %416 = vector.broadcast %415 : vector<16x1xf32> to vector<16x32xf32>
    %417 = arith.divf %412, %416 : vector<16x32xf32>
    %418 = vector.broadcast %399 : vector<1x32xf32> to vector<16x32xf32>
    %419 = arith.addf %417, %418 : vector<16x32xf32>
    %420 = arith.truncf %419 : vector<16x32xf32> to vector<16x32xbf16>
    %c0_133 = arith.constant 0 : index
    %c384 = arith.constant 384 : index
    %421 = vector.load %arg5[%c0_133, %c384] : memref<32x512xbf16, #tpu.memory_space<vmem>>, vector<32x64xbf16>
    %cst_134 = arith.constant dense<0.000000e+00> : vector<16x64xf32>
    %422 = tpu.matmul %420, %421, %cst_134 {dimension_numbers = #tpu.dot_dimension_numbers<[1], [0], [0], [1], [0, 0, 1, 1], [], []>} : vector<16x32xbf16>, vector<32x64xbf16>, vector<16x64xf32> -> vector<16x64xf32>
    %c19 = arith.constant 19 : index
    %c0_135 = arith.constant 0 : index
    %423 = vector.load %arg6[%c19, %c0_135] : memref<20x64xf32, #tpu.memory_space<vmem>>, vector<1x64xf32>
    %424 = vector.broadcast %423 : vector<1x64xf32> to vector<16x64xf32>
    %425 = arith.addf %422, %424 : vector<16x64xf32>
    %cst_136 = arith.constant 0.000000e+00 : f32
    %426 = vector.broadcast %cst_136 : f32 to vector<16x64xf32>
    %427 = arith.maximumf %425, %426 : vector<16x64xf32>
    %428 = arith.truncf %427 : vector<16x64xf32> to vector<16x64xbf16>
    %c0_137 = arith.constant 0 : index
    %c448 = arith.constant 448 : index
    %429 = vector.load %arg5[%c0_137, %c448] : memref<32x512xbf16, #tpu.memory_space<vmem>>, vector<32x64xbf16>
    %cst_138 = arith.constant dense<0.000000e+00> : vector<16x32xf32>
    %430 = tpu.matmul %428, %429, %cst_138 {dimension_numbers = #tpu.dot_dimension_numbers<[1], [1], [0], [0], [0, 0, 1, 0], [], []>} : vector<16x64xbf16>, vector<32x64xbf16>, vector<16x32xf32> -> vector<16x32xf32>
    %c18 = arith.constant 18 : index
    %c0_139 = arith.constant 0 : index
    %431 = vector.load %arg6[%c18, %c0_139] : memref<20x64xf32, #tpu.memory_space<vmem>>, vector<1x32xf32>
    %432 = vector.broadcast %431 : vector<1x32xf32> to vector<16x32xf32>
    %433 = arith.addf %430, %432 : vector<16x32xf32>
    %434 = arith.addf %397, %433 : vector<16x32xf32>
    %c0_140 = arith.constant 0 : index
    %c0_141 = arith.constant 0 : index
    %435 = vector.load %arg7[%c0_140, %c0_141] : memref<16x32xf32, #tpu.memory_space<vmem>>, vector<16x32xf32>
    tpu.vector_store %arg7[%c0_140, %c0_141], %434 {strides = array<i32>} : memref<16x32xf32, #tpu.memory_space<vmem>>, vector<16x32xf32>,
    return
  }
  func.func @transform_0(%arg0: i32) -> (i32, i32) {
    %c0_i32 = arith.constant 0 : i32
    %c0_i32_0 = arith.constant 0 : i32
    %c0_i32_1 = arith.constant 0 : i32
    return %c0_i32, %c0_i32_0 : i32, i32
  }
  func.func @transform_1(%arg0: i32) -> (i32, i32) {
    %c0_i32 = arith.constant 0 : i32
    %c0_i32_0 = arith.constant 0 : i32
    %c0_i32_1 = arith.constant 0 : i32
    return %c0_i32, %c0_i32_0 : i32, i32
  }
  func.func @transform_2(%arg0: i32) -> (i32, i32) {
    %c0_i32 = arith.constant 0 : i32
    %c0_i32_0 = arith.constant 0 : i32
    %c0_i32_1 = arith.constant 0 : i32
    return %c0_i32, %c0_i32_0 : i32, i32
  }
  func.func @transform_3(%arg0: i32) -> (i32, i32, i32) {
    %c0_i32 = arith.constant 0 : i32
    %c0_i32_0 = arith.constant 0 : i32
    %c0_i32_1 = arith.constant 0 : i32
    %c0_i32_2 = arith.constant 0 : i32
    return %c0_i32, %c0_i32_0, %c0_i32_1 : i32, i32, i32
  }
  func.func @transform_4(%arg0: i32) -> (i32, i32) {
    %c0_i32 = arith.constant 0 : i32
    %c0_i32_0 = arith.constant 0 : i32
    %c0_i32_1 = arith.constant 0 : i32
    return %c0_i32, %c0_i32_0 : i32, i32
  }
  func.func @transform_5(%arg0: i32) -> (i32, i32) {
    %c0_i32 = arith.constant 0 : i32
    %c0_i32_0 = arith.constant 0 : i32
    %c0_i32_1 = arith.constant 0 : i32
    return %c0_i32, %c0_i32_0 : i32, i32
  }
  func.func @transform_6(%arg0: i32) -> (i32, i32) {
    %c0_i32 = arith.constant 0 : i32
    %c0_i32_0 = arith.constant 0 : i32
    %c0_i32_1 = arith.constant 0 : i32
    return %c0_i32, %c0_i32_0 : i32, i32
  }
}

</mosaic_0001>

<bundles_post_ra>
// kernel: tpu_custom_call.1
= control target key start
LH: loop header
LB: loop body
LE: loop exit
PB: predicated region body
PF: predicated region fallthrough
CT: control target
= control target key end

     0   :  { %11 = vsyncpa [#allocation3], 0  ;;  %s4484_s0 = inlined_call_operand.hbm [shape: f32[16,32], index: 0, kind: input, shape index: {}]   ;;  %s4485_s1 = inlined_call_operand.hbm [shape: f32[16,32], index: 1, kind: input, shape index: {}]   ;;  %s4486_s2 = inlined_call_operand.hbm [shape: f32[16,32], index: 2, kind: input, shape index: {}]   ;;  %s4487_s3 = inlined_call_operand.hbm [shape: f32[3,16,16], index: 3, kind: input, shape index: {}]   ;;  %s4488_s4 = inlined_call_operand.hbm [shape: bf16[32,512], index: 4, kind: input, shape index: {}]   ;;  %s4489_s5 = inlined_call_operand.hbm [shape: f32[20,64], index: 5, kind: input, shape index: {}]   ;;  %s4490_s6 = inlined_call_operand.hbm [shape: f32[16,32], index: 6, kind: output, shape index: {}]  }
   0x1   :  { %12 = vsyncpa [#allocation6], 0 }
   0x2   :  { %13 = vsyncpa [#allocation9], 0 }
   0x3   :  { %14 = vsyncpa [#allocation12], 0 }
   0x4   :  { %15 = vsyncpa [#allocation4], 0  ;;  %s3734_s21 = smov [#allocation5]   ;;  %s3735_s23 = smov [#allocation8]  }
   0x5   :  { %s33_s22 = sshll.u32 %s3734_s21, 4  ;;  %s57_s24 = sshll.u32 %s3735_s23, 4  ;;  %s34_s22 = int_to_ptr.vmem [resolvable:$true] %s33_s22  ;;  %s3794_s24 = int_to_ptr.vmem [resolvable:$true] %s57_s24 }
   0x6   :  { %s3570_s27 = scalar_lea.hbm %s4485_s1, 256 }
   0x7   :  { %p3571_p0 = scmp.ne.s32.totalorder %s4485_s1, %s3570_s27  ;;  %p3574_p1 = scmp.lt.u32.totalorder %s3570_s27, %s4485_s1 }
   0x9   :  { %p3576_p2 = pnand %p3574_p1, %p3571_p0 }
   0xb   :  { %3579 = shalt.err (!%p3576_p2)
}
   0xc   :  { %s3580_s8 = scalar_lea.vmem %s34_s22, 256  ;;  %p3585_p4 = scmp.lt.s32.totalorder %s34_s22, %s34_s22 }
   0xd   :  { %p3581_p3 = scmp.ne.s32.totalorder %s34_s22, %s3580_s8  ;;  %p3586_p5 = scmp.lt.s32.totalorder %s3580_s8, %s3580_s8 }
   0xf   :  { %p3587_p6 = por %p3586_p5, %p3585_p4 }
  0x11   :  { %p3588_p7 = pnand %p3587_p6, %p3581_p3 }
  0x13   :  { %3591 = shalt.err (!%p3588_p7)
}
  0x14   :  { %s3736_s9 = smov 128   ;;  %s3737_s10 = smov 8  }
  0x15   :  { %39 = dma.hbm_to_vmem [thread:$0]  %s4485_s1, 256, %s34_s22, [#allocation6], %s3736_s9, %s3736_s9, %s3737_s10  }
  0x16   :  { %s3592_s15 = scalar_lea.hbm %s4487_s3, 768 }
  0x17   :  { %p3593_p8 = scmp.ne.s32.totalorder %s4487_s3, %s3592_s15  ;;  %p3596_p9 = scmp.lt.u32.totalorder %s3592_s15, %s4487_s3 }
  0x19   :  { %p3598_p10 = pnand %p3596_p9, %p3593_p8 }
  0x1b   :  { %3601 = shalt.err (!%p3598_p10)
}
  0x1c   :  { %s3602_s20 = scalar_lea.vmem %s3794_s24, 768  ;;  %p3607_p12 = scmp.lt.s32.totalorder %s3794_s24, %s3794_s24 }
  0x1d   :  { %p3603_p11 = scmp.ne.s32.totalorder %s3794_s24, %s3602_s20  ;;  %p3608_p13 = scmp.lt.s32.totalorder %s3602_s20, %s3602_s20 }
  0x1f   :  { %p3609_p0 = por %p3608_p13, %p3607_p12 }
  0x21   :  { %p3610_p1 = pnand %p3609_p0, %p3603_p11 }
  0x23   :  { %3613 = shalt.err (!%p3610_p1)
}
  0x24   :  { %63 = dma.hbm_to_vmem [thread:$0]  %s4487_s3, 768, %s3794_s24, [#allocation9], %s3736_s9, %s3736_s9, %s3737_s10  }
  0x25   :  { %s3738_s22 = smov [#allocation2]   ;;  %s3739_s25 = smov [#allocation7]  }
  0x26   :  { %s21_s23 = sshll.u32 %s3738_s22, 4  ;;  %s45_s26 = sshll.u32 %s3739_s25, 4  ;;  %s22_s23 = int_to_ptr.vmem [resolvable:$true] %s21_s23  ;;  %s3831_s26 = int_to_ptr.vmem [resolvable:$true] %s45_s26 }
  0x27   :  { %s3614_s29 = scalar_lea.hbm %s4484_s0, 256 }
  0x28   :  { %p3615_p2 = scmp.ne.s32.totalorder %s4484_s0, %s3614_s29  ;;  %p3618_p3 = scmp.lt.u32.totalorder %s3614_s29, %s4484_s0 }
  0x2a   :  { %p3620_p4 = pnand %p3618_p3, %p3615_p2 }
  0x2c   :  { %3623 = shalt.err (!%p3620_p4)
}
  0x2d   :  { %s3624_s3 = scalar_lea.vmem %s22_s23, 256  ;;  %p3629_p6 = scmp.lt.s32.totalorder %s22_s23, %s22_s23 }
  0x2e   :  { %p3625_p5 = scmp.ne.s32.totalorder %s22_s23, %s3624_s3  ;;  %p3630_p7 = scmp.lt.s32.totalorder %s3624_s3, %s3624_s3 }
  0x30   :  { %p3631_p8 = por %p3630_p7, %p3629_p6 }
  0x32   :  { %p3632_p9 = pnand %p3631_p8, %p3625_p5 }
  0x34   :  { %3635 = shalt.err (!%p3632_p9)
}
  0x35   :  { %27 = dma.hbm_to_vmem [thread:$0]  %s4484_s0, 256, %s22_s23, [#allocation3], %s3736_s9, %s3736_s9, %s3737_s10  }
  0x36   :  { %s3636_s15 = scalar_lea.hbm %s4486_s2, 256 }
  0x37   :  { %p3637_p10 = scmp.ne.s32.totalorder %s4486_s2, %s3636_s15  ;;  %p3640_p11 = scmp.lt.u32.totalorder %s3636_s15, %s4486_s2 }
  0x39   :  { %p3642_p12 = pnand %p3640_p11, %p3637_p10 }
  0x3b   :  { %3645 = shalt.err (!%p3642_p12)
}
  0x3c   :  { %s3646_s20 = scalar_lea.vmem %s3831_s26, 256  ;;  %p3651_p0 = scmp.lt.s32.totalorder %s3831_s26, %s3831_s26 }
  0x3d   :  { %p3647_p13 = scmp.ne.s32.totalorder %s3831_s26, %s3646_s20  ;;  %p3652_p1 = scmp.lt.s32.totalorder %s3646_s20, %s3646_s20 }
  0x3f   :  { %p3653_p2 = por %p3652_p1, %p3651_p0 }
  0x41   :  { %p3654_p3 = pnand %p3653_p2, %p3647_p13 }
  0x43   :  { %3657 = shalt.err (!%p3654_p3)
}
  0x44   :  { %51 = dma.hbm_to_vmem [thread:$0]  %s4486_s2, 256, %s3831_s26, [#allocation6], %s3736_s9, %s3736_s9, %s3737_s10  }
  0x45   :  { %s3740_s21 = smov [#allocation10]   ;;  %s3658_s27 = scalar_lea.hbm %s4488_s4, 1024 }
  0x46   :  { %s69_s22 = sshll.u32 %s3740_s21, 4  ;;  %p3659_p4 = scmp.ne.s32.totalorder %s4488_s4, %s3658_s27  ;;  %s70_s22 = int_to_ptr.vmem [resolvable:$true] %s69_s22 }
  0x47   :  { %p3662_p5 = scmp.lt.u32.totalorder %s3658_s27, %s4488_s4 }
  0x49   :  { %p3664_p6 = pnand %p3662_p5, %p3659_p4 }
  0x4b   :  { %3667 = shalt.err (!%p3664_p6)
}
  0x4c   :  { %s3668_s8 = scalar_lea.vmem %s70_s22, 1024  ;;  %p3673_p8 = scmp.lt.s32.totalorder %s70_s22, %s70_s22 }
  0x4d   :  { %p3669_p7 = scmp.ne.s32.totalorder %s70_s22, %s3668_s8  ;;  %p3674_p9 = scmp.lt.s32.totalorder %s3668_s8, %s3668_s8 }
  0x4f   :  { %p3675_p10 = por %p3674_p9, %p3673_p8 }
  0x51   :  { %p3676_p11 = pnand %p3675_p10, %p3669_p7 }
  0x53   :  { %3679 = shalt.err (!%p3676_p11)
}
  0x54   :  { %s3741_s2 = smov 256   ;;  %s3742_s26 = smov 16  }
  0x55   :  { %75 = dma.hbm_to_vmem [thread:$0]  %s4488_s4, 1024, %s70_s22, [#allocation9], %s3741_s2, %s3741_s2, %s3742_s26  }
  0x56   :  { %s3743_s24 = smov [#allocation11]   ;;  %s3680_s15 = scalar_lea.hbm %s4489_s5, 384 }
  0x57   :  { %s81_s12 = sshll.u32 %s3743_s24, 4  ;;  %p3681_p12 = scmp.ne.s32.totalorder %s4489_s5, %s3680_s15  ;;  %s82_s12 = int_to_ptr.vmem [resolvable:$true] %s81_s12 }
  0x58   :  { %p3684_p13 = scmp.lt.u32.totalorder %s3680_s15, %s4489_s5 }
  0x5a   :  { %p3686_p0 = pnand %p3684_p13, %p3681_p12 }
  0x5c   :  { %3689 = shalt.err (!%p3686_p0)
}
  0x5d   :  { %s3690_s20 = scalar_lea.vmem %s82_s12, 384  ;;  %p3695_p2 = scmp.lt.s32.totalorder %s82_s12, %s82_s12 }
  0x5e   :  { %p3691_p1 = scmp.ne.s32.totalorder %s82_s12, %s3690_s20  ;;  %p3696_p3 = scmp.lt.s32.totalorder %s3690_s20, %s3690_s20 }
  0x60   :  { %p3697_p4 = por %p3696_p3, %p3695_p2 }
  0x62   :  { %p3698_p5 = pnand %p3697_p4, %p3691_p1 }
  0x64   :  { %3701 = shalt.err (!%p3698_p5)
}
  0x65   :  { %87 = dma.hbm_to_vmem [thread:$0]  %s4489_s5, 384, %s82_s12, [#allocation12], %s3736_s9, %s3736_s9, %s3737_s10  }
  0x66   :  { %3724 = dma.done.wait [#allocation3], 256  }
  0x67   :  { %3725 = vsyncadd [#allocation3], 4294967040 }
  0x68   :  { %3726 = dma.done.wait [#allocation6], 512  }
  0x69   :  { %3727 = vsyncadd [#allocation6], 4294966784 }
  0x6a   :  { %3728 = dma.done.wait [#allocation9], 1792  }
  0x6b   :  { %3729 = vsyncadd [#allocation9], 4294965504 }
  0x6c   :  { %3730 = dma.done.wait [#allocation12], 384  }
  0x6d   :  { %3731 = vsyncadd [#allocation12], 4294966912  ;;  %vm125_vm0 = vcmask 261120   ;;  %v3895_v0 = vld [vmem:[#allocation2] sm:$0xff]  ;;  %v3897_v1 = vld [vmem:[#allocation2 + $0x8] sm:$0xff]  ;;  %v3744_v16 = vmov 0.0  }
  0x6e   :  { %v126_v2 = vsel %vm125_vm0, %v3895_v0, 0.0  ;;  %v129_v3 = vsel %vm125_vm0, %v3897_v1, 0.0  ;;  %v3907_v14 = vld [vmem:[#allocation10] sm:$0xf]  ;;  %v3909_v15 = vld [vmem:[#allocation10 + $0x10] sm:$0xf]  ;;  %3133 = vmatprep.subr.bf16.mxu1 %v3744_v16  ;;  %3147 = vmatprep.subr.bf16.mxu0 %v3744_v16 }
  0x6f   :  { %127 = vadd.xlane.f32.xlu0 %v126_v2  ;;  %v2959_v17 = vcombine.low %v3907_v14, %v3909_v15  ;;  %v3914_v18 = vld [vmem:[#allocation10 + $0x20] sm:$0xf]  ;;  %v3916_v19 = vld [vmem:[#allocation10 + $0x30] sm:$0xf]  ;;  %vm3745_vm1 = vmmov 0   ;;  %s3746_s5 = smov 32  }
  0x70   :  { %3137 = vmatprep.mubr.msk.bf16.mxu1 %vm3745_vm1, %v3744_v16  ;;  %3149 = vmatprep.mubr.msk.bf16.mxu0 %vm3745_vm1, %v3744_v16  ;;  %v2960_v20 = vcombine.low %v3914_v18, %v3916_v19  ;;  %v2963_v21 = vld [vmem:[#allocation11 + $0x1] ss:$0 sm:$0xff]  ;;  %v2957_v38 = vld [vmem:[#allocation11 + $0xc] ss:$0 sm:$0xff]  ;;  %v2958_v44 = vld [vmem:[#allocation11 + $0xf] ss:$0 sm:$0xff] }
  0x71   :  { %3134 = vmatpush3.bf16.msra.mxu1 %v2959_v17  ;;  %v2962_v50 = vld [vmem:[#allocation11] ss:$0 sm:$0xff]  ;;  %s3747_s1 = smov 96   ;;  %s3748_s21 = smov 88   ;;  %vm274_vm6 = vcmask 64512   ;;  %vm326_vm7 = vcmask 130048  }
  0x72   :  { %3135 = vmatprep.subr.bf16.mxu1 %v3744_v16  ;;  %s3749_s22 = smov 120   ;;  %s3750_s23 = smov 64   ;;  %vm532_vm8 = vcmask 1043456   ;;  %vm2882_vm13 = vcmask 523264  }
  0x73   :  { %130 = vadd.xlane.f32.xlu0 %v129_v3  ;;  %s3751_s25 = smov 56   ;;  %s3752_s27 = smov 80  }
  0x74   :  { %s3753_s28 = smov 112   ;;  %s3754_s29 = smov 48  }
  0x75   :  { %3136 = vmatpush3.bf16.msra.mxu1 %v2960_v20  ;;  %s3755_s30 = smov 72   ;;  %s3756_s7 = smov 104  }
  0x76   :  { %3141 = vmatprep.subr.bf16.mxu1 %v3744_v16  ;;  %s3757_s8 = smov 40   ;;  %s3758_s2 = smov [#allocation13]  }
  0x77   :  { %s2942_s26 = sshll.u32 %s3758_s2, 4  ;;  %s2943_s26 = int_to_ptr.vmem [resolvable:$true] %s2942_s26 }
  0x78   :  { %s3702_s11 = scalar_lea.vmem %s2943_s26, 256  ;;  %p3707_p7 = scmp.lt.s32.totalorder %s2943_s26, %s2943_s26 }
  0x79   :  { %p3703_p6 = scmp.ne.s32.totalorder %s2943_s26, %s3702_s11  ;;  %p3708_p8 = scmp.lt.s32.totalorder %s3702_s11, %s3702_s11 }
  0x7b   :  { %p3709_p9 = por %p3708_p8, %p3707_p7 }
  0x7d   :  { %p3710_p10 = pnand %p3709_p9, %p3703_p6 }
  0x89   :  { %252 = vrot.lane.b32.xlu0 %v2963_v21, %s3746_s5 }
  0xfc   :  { %v128_v4 = vpop.xlane.xlu0 %127 }
  0xfd   :  { %v132_v5 = vmul.f32 0.03125, %v128_v4 }
  0xff   :  { %v134_v6 = vsub.f32 %v3895_v0, %v132_v5  ;;  %v3960_v5 = vld [vmem:[#allocation8] sm:$0xff] }
 0x100   :  { %v131_v7 = vpop.xlane.xlu0 %130 }
 0x101   :  { %v133_v8 = vmul.f32 0.03125, %v131_v7  ;;  %v136_v9 = vmul.f32 %v134_v6, %v134_v6  ;;  %v150_v40 = vmul.f32 %v2957_v38, %v134_v6 }
 0x103   :  { %v135_v10 = vsub.f32 %v3897_v1, %v133_v8  ;;  %v138_v11 = vsel %vm125_vm0, %v136_v9, 0.0  ;;  %v3962_v9 = vld [vmem:[#allocation8 + $0x8] sm:$0xff] }
 0x104   :  { %139 = vadd.xlane.f32.xlu1 %v138_v11  ;;  %v253_v51 = vpop.permute.xlu0 %252 }
 0x105   :  { %v137_v12 = vmul.f32 %v135_v10, %v135_v10  ;;  %v151_v41 = vmul.f32 %v2957_v38, %v135_v10 }
 0x107   :  { %v141_v13 = vsel %vm125_vm0, %v137_v12, 0.0 }
 0x108   :  { %142 = vadd.xlane.f32.xlu1 %v141_v13 }
 0x191   :  { %v140_v22 = vpop.xlane.xlu1 %139 }
 0x192   :  { %v144_v23 = vmul.f32 0.032258064, %v140_v22 }
 0x194   :  { %3450 = vrsqrt.f32 %v144_v23  ;;  %vm154_vm2 = vcmp.eq.f32.partialorder %v144_v23, inf  ;;  %v157_v28 = vand.u32 2147483648, %v144_v23  ;;  %vm156_vm3 = vcmp.eq.f32.partialorder %v144_v23, 0.0 }
 0x195   :  { %v143_v24 = vpop.xlane.xlu1 %142 }
 0x196   :  { %v145_v25 = vmul.f32 0.032258064, %v143_v24 }
 0x198   :  { %3452 = vrsqrt.f32 %v145_v25  ;;  %vm161_vm4 = vcmp.eq.f32.partialorder %v145_v25, inf  ;;  %v164_v34 = vand.u32 2147483648, %v145_v25  ;;  %vm163_vm5 = vcmp.eq.f32.partialorder %v145_v25, 0.0 }
 0x19e   :  { %v3451_v26 = vpop.eup %3450 }
 0x19f   :  { %v153_v27 = vmul.f32 %v3451_v26, %v144_v23 }
 0x1a1   :  { %v155_v29 = vsel %vm154_vm2, %v144_v23, %v153_v27 }
 0x1a2   :  { %v3453_v30 = vpop.eup %3452  ;;  %v158_v31 = vsel %vm156_vm3, %v157_v28, %v155_v29 }
 0x1a3   :  { %v166_v32 = vadd.f32 1e-06, %v158_v31  ;;  %v160_v33 = vmul.f32 %v3453_v30, %v145_v25  ;;  %v2964_v31 = vld [vmem:[#allocation11 + $0x2] ss:$0 sm:$0xff] }
 0x1a5   :  { %v162_v35 = vsel %vm161_vm4, %v145_v25, %v160_v33  ;;  %3454 = vrcp.f32 %v166_v32 }
 0x1a6   :  { %v165_v36 = vsel %vm163_vm5, %v164_v34, %v162_v35 }
 0x1a7   :  { %v167_v37 = vadd.f32 1e-06, %v165_v36 }
 0x1a9   :  { %3456 = vrcp.f32 %v167_v37 }
 0x1af   :  { %v3455_v39 = vpop.eup %3454 }
 0x1b0   :  { %v169_v42 = vmul.f32 %v3455_v39, %v150_v40 }
 0x1b2   :  { %v176_v46 = vadd.f32 %v2958_v44, %v169_v42 }
 0x1b3   :  { %v3457_v43 = vpop.eup %3456 }
 0x1b4   :  { %v171_v45 = vmul.f32 %v3457_v43, %v151_v41 }
 0x1b6   :  { %v177_v47 = vadd.f32 %v2958_v44, %v171_v45 }
 0x1b8   :  { %v178_v48 = vpack.c.bf16 %v177_v47, %v176_v46 }
 0x1ba   :  { %3138 = vmatmul.mubr.msk.bf16.vlgmr.msra.gmra.mrb[0].mxu1 %vm125_vm0, %v178_v48 }
 0x1bb   :  { %3143 = vmatprep.mubr.msk.bf16.mxu1 %vm3745_vm1, %v3744_v16 }
 0x28d   :  { %v3931_v49 = vpop.f32.mrb[0].mxu1 }
 0x28e   :  { %v3139_v52 = vpop.f32.mrb[1].mxu1  ;;  %v244_v54 = vadd.f32 %v2962_v50, %v3931_v49  ;;  %v255_v55 = vadd.f32 %v253_v51, %v3931_v49 }
 0x28f   :  { %v3933_v53 = vpop.f32.mrb[2].mxu1 }
 0x290   :  { %v245_v56 = vadd.f32 %v2962_v50, %v3933_v53  ;;  %v256_v57 = vadd.f32 %v253_v51, %v3933_v53  ;;  %v3140_v58 = vpop.f32.mrb[3].mxu1 }
 0x292   :  { %v3939_v59 = vpack.c.bf16 %v245_v56, %v244_v54  ;;  %v3941_v60 = vpack.c.bf16 %v256_v57, %v255_v55  ;;  %v2969_v54 = vcombine.low %v3909_v15, %v3909_v15 }
 0x294   :  { %272 = vrot.lane.b32.xlu1 %v3941_v60, %s3747_s1 }
 0x298   :  { %402 = vrot.lane.b32.xlu1 %v3941_v60, %s3748_s21 }
 0x29c   :  { %400 = vrot.lane.b32.xlu1 %v3939_v59, %s3749_s22 }
 0x306   :  { %v273_v61 = vpop.permute.xlu1 %272 }
 0x307   :  { %v279_v62 = vsel %vm274_vm6, %v273_v61, 0 }
 0x308   :  { %3142 = vmatpush3.bf16.xpose.msra.mxu1 %v279_v62 }
 0x309   :  { %3153 = vmatprep.subr.bf16.mxu1 %v3744_v16 }
 0x30a   :  { %v403_v63 = vpop.permute.xlu1 %402 }
 0x30b   :  { %v408_v2 = vsel %vm274_vm6, %v403_v63, 0 }
 0x30e   :  { %v401_v3 = vpop.permute.xlu1 %400 }
 0x30f   :  { %3144 = vmatmul.mubr.msk.bf16.vlgmr.msra.gmra.mrb[4].mxu1 %vm274_vm6, %v3939_v59 }
 0x310   :  { %3154 = vmatpush3.bf16.xpose.msra.mxu1 %v408_v2  ;;  %3155 = vmatprep.mubr.msk.bf16.mxu1 %vm3745_vm1, %v3744_v16 }
 0x311   :  { %3165 = vmatprep.subr.bf16.mxu1 %v3744_v16 }
 0x317   :  { %3156 = vmatmul.mubr.msk.bf16.vlgmr.msra.gmra.mrb[8].mxu1 %vm274_vm6, %v401_v3 }
 0x318   :  { %3167 = vmatprep.mubr.msk.bf16.mxu1 %vm3745_vm1, %v3744_v16 }
 0x3e2   :  { %v315_v4 = vpop.f32.mrb[4].mxu1 }
 0x3e3   :  { %v322_v6 = vmul.f32 0.35355338, %v315_v4  ;;  %v3145_v7 = vpop.f32.mrb[5].mxu1 }
 0x3e4   :  { %v318_v8 = vpop.f32.mrb[6].mxu1 }
 0x3e5   :  { %v323_v10 = vmul.f32 0.35355338, %v318_v8  ;;  %v3146_v11 = vpop.f32.mrb[7].mxu1  ;;  %v324_v12 = vadd.f32 %v322_v6, %v3960_v5 }
 0x3e7   :  { %v327_v13 = vsel %vm326_vm7, %v324_v12, -inf  ;;  %v325_v17 = vadd.f32 %v323_v10, %v3962_v9 }
 0x3e8   :  { %328 = vmax.xlane.f32.xlu0 %v327_v13 }
 0x3e9   :  { %v330_v20 = vsel %vm326_vm7, %v325_v17, -inf }
 0x3ea   :  { %331 = vmax.xlane.f32.xlu1 %v330_v20  ;;  %v444_v21 = vpop.f32.mrb[8].mxu1 }
 0x3eb   :  { %v451_v22 = vmul.f32 0.35355338, %v444_v21  ;;  %v3157_v23 = vpop.f32.mrb[9].mxu1 }
 0x3ec   :  { %v447_v24 = vpop.f32.mrb[10].mxu1 }
 0x3ed   :  { %v452_v25 = vmul.f32 0.35355338, %v447_v24  ;;  %v3158_v26 = vpop.f32.mrb[11].mxu1  ;;  %v453_v27 = vadd.f32 %v451_v22, %v3960_v5 }
 0x3ef   :  { %v455_v28 = vsel %vm326_vm7, %v453_v27, -inf  ;;  %v454_v29 = vadd.f32 %v452_v25, %v3962_v9 }
 0x3f0   :  { %456 = vmax.xlane.f32.xlu0 %v455_v28 }
 0x3f1   :  { %v458_v30 = vsel %vm326_vm7, %v454_v29, -inf }
 0x3f4   :  { %459 = vmax.xlane.f32.xlu0 %v458_v30 }
 0x40a   :  { %263 = vrot.lane.b32.xlu0 %v2964_v31, %s3750_s23 }
 0x475   :  { %v329_v32 = vpop.xlane.xlu0 %328 }
 0x476   :  { %v333_v33 = vsub.f32 %v324_v12, %v329_v32 }
 0x477   :  { %v332_v34 = vpop.xlane.xlu1 %331 }
 0x478   :  { %v335_v35 = vmul.f32 1.442695, %v333_v33  ;;  %v334_v36 = vsub.f32 %v325_v17, %v332_v34 }
 0x47a   :  { %3458 = vpow2.f32 %v335_v35  ;;  %v337_v37 = vmul.f32 1.442695, %v334_v36 }
 0x47c   :  { %3460 = vpow2.f32 %v337_v37 }
 0x47d   :  { %v457_v38 = vpop.xlane.xlu0 %456 }
 0x47e   :  { %v461_v39 = vsub.f32 %v453_v27, %v457_v38 }
 0x480   :  { %v463_v40 = vmul.f32 1.442695, %v461_v39 }
 0x481   :  { %v460_v41 = vpop.xlane.xlu0 %459 }
 0x482   :  { %3462 = vpow2.f32 %v463_v40  ;;  %v462_v42 = vsub.f32 %v454_v29, %v460_v41 }
 0x484   :  { %v3459_v43 = vpop.eup %3458  ;;  %v465_v44 = vmul.f32 1.442695, %v462_v42 }
 0x485   :  { %v264_v45 = vpop.permute.xlu0 %263  ;;  %v339_v46 = vsel %vm326_vm7, %v3459_v43, 0.0 }
 0x486   :  { %v3461_v47 = vpop.eup %3460  ;;  %3464 = vpow2.f32 %v465_v44  ;;  %v266_v48 = vadd.f32 %v264_v45, %v3931_v49  ;;  %v267_v50 = vadd.f32 %v264_v45, %v3933_v53  ;;  %340 = vadd.xlane.f32.xlu1 %v339_v46 }
 0x487   :  { %v342_v52 = vsel %vm326_vm7, %v3461_v47, 0.0 }
 0x488   :  { %v3976_v51 = vpack.c.bf16 %v267_v50, %v266_v48 }
 0x48a   :  { %478 = vrot.lane.b32.xlu0 %v3976_v51, %s3751_s25  ;;  %343 = vadd.xlane.f32.xlu1 %v342_v52 }
 0x48c   :  { %v3463_v55 = vpop.eup %3462 }
 0x48d   :  { %v467_v56 = vsel %vm326_vm7, %v3463_v55, 0.0 }
 0x48e   :  { %527 = vrot.lane.b32.xlu0 %v2969_v54, %s3746_s5  ;;  %468 = vadd.xlane.f32.xlu1 %v467_v56 }
 0x490   :  { %v3465_v49 = vpop.eup %3464 }
 0x491   :  { %v470_v53 = vsel %vm326_vm7, %v3465_v49, 0.0 }
 0x492   :  { %629 = vrot.lane.b32.xlu0 %v3941_v60, %s3752_s27  ;;  %471 = vadd.xlane.f32.xlu1 %v470_v53 }
 0x4a3   :  { %351 = vrot.lane.b32.xlu1 %v3976_v51, %s3750_s23 }
 0x4a7   :  { %627 = vrot.lane.b32.xlu1 %v3939_v59, %s3753_s28 }
 0x4fc   :  { %v479_v15 = vpop.permute.xlu0 %478 }
 0x500   :  { %v528_v57 = vpop.permute.xlu0 %527 }
 0x501   :  { %v534_v58 = vsel %vm532_vm8, %v528_v57, 0 }
 0x502   :  { %3166 = vmatpush3.bf16.msra.mxu1 %v534_v58 }
 0x503   :  { %3177 = vmatprep.subr.bf16.mxu1 %v3744_v16 }
 0x504   :  { %v630_v28 = vpop.permute.xlu0 %629 }
 0x505   :  { %v635_v32 = vsel %vm274_vm6, %v630_v28, 0 }
 0x513   :  { %v341_v61 = vpop.xlane.xlu1 %340 }
 0x514   :  { %3466 = vrcp.f32 %v341_v61 }
 0x517   :  { %v344_v62 = vpop.xlane.xlu1 %343 }
 0x518   :  { %3468 = vrcp.f32 %v344_v62 }
 0x51b   :  { %v469_v63 = vpop.xlane.xlu1 %468 }
 0x51c   :  { %3470 = vrcp.f32 %v469_v63 }
 0x51e   :  { %v3467_v3 = vpop.eup %3466 }
 0x51f   :  { %v472_v2 = vpop.xlane.xlu1 %471  ;;  %v347_v7 = vmul.f32 %v3467_v3, %v3459_v43 }
 0x520   :  { %3472 = vrcp.f32 %v472_v2 }
 0x522   :  { %v3469_v4 = vpop.eup %3468 }
 0x523   :  { %v352_v6 = vpop.permute.xlu1 %351  ;;  %v348_v8 = vmul.f32 %v3469_v4, %v3461_v47 }
 0x524   :  { %3148 = vmatpush3.bf16.msra.mxu0 %v352_v6 }
 0x525   :  { %v349_v10 = vpack.c.bf16 %v348_v8, %v347_v7  ;;  %3159 = vmatprep.subr.bf16.mxu0 %v3744_v16 }
 0x526   :  { %v3471_v11 = vpop.eup %3470 }
 0x527   :  { %3150 = vmatmul.mubr.msk.bf16.vlgmr.msra.gmra.mrb[0].mxu0 %vm326_vm7, %v349_v10  ;;  %v475_v13 = vmul.f32 %v3471_v11, %v3463_v55  ;;  %v628_v33 = vpop.permute.xlu1 %627 }
 0x528   :  { %3160 = vmatpush3.bf16.msra.mxu0 %v479_v15  ;;  %3161 = vmatprep.mubr.msk.bf16.mxu0 %vm3745_vm1, %v3744_v16 }
 0x529   :  { %3171 = vmatprep.subr.bf16.mxu0 %v3744_v16 }
 0x52a   :  { %v3473_v12 = vpop.eup %3472 }
 0x52b   :  { %v476_v17 = vmul.f32 %v3473_v12, %v3465_v49 }
 0x52d   :  { %v477_v20 = vpack.c.bf16 %v476_v17, %v475_v13 }
 0x52f   :  { %3162 = vmatmul.mubr.msk.bf16.vlgmr.msra.gmra.mrb[4].mxu0 %vm326_vm7, %v477_v20 }
 0x530   :  { %3173 = vmatprep.mubr.msk.bf16.mxu0 %vm3745_vm1, %v3744_v16 }
 0x5fa   :  { %v4001_v21 = vpop.f32.mrb[0].mxu0 }
 0x5fb   :  { %v3151_v22 = vpop.f32.mrb[1].mxu0 }
 0x5fc   :  { %v4003_v23 = vpop.f32.mrb[2].mxu0 }
 0x5fd   :  { %v398_v24 = vpack.c.bf16 %v4003_v23, %v4001_v21  ;;  %v3152_v25 = vpop.f32.mrb[3].mxu0 }
 0x602   :  { %v518_v26 = vpop.f32.mrb[4].mxu0 }
 0x603   :  { %v3163_v27 = vpop.f32.mrb[5].mxu0 }
 0x604   :  { %v521_v29 = vpop.f32.mrb[6].mxu0 }
 0x605   :  { %v525_v30 = vpack.c.bf16 %v521_v29, %v518_v26  ;;  %v3164_v31 = vpop.f32.mrb[7].mxu0 }
 0x607   :  { %3168 = vmatmul.mubr.msk.bf16.vlgmr.msra.gmra.mrb[12].mxu1 %vm274_vm6, %v525_v30 }
 0x608   :  { %3178 = vmatpush3.bf16.xpose.msra.mxu1 %v635_v32  ;;  %3179 = vmatprep.mubr.msk.bf16.mxu1 %vm3745_vm1, %v3744_v16 }
 0x609   :  { %3189 = vmatprep.subr.bf16.mxu1 %v3744_v16 }
 0x60f   :  { %3180 = vmatmul.mubr.msk.bf16.vlgmr.msra.gmra.mrb[16].mxu1 %vm274_vm6, %v628_v33 }
 0x610   :  { %3191 = vmatprep.mubr.msk.bf16.mxu1 %vm3745_vm1, %v3744_v16 }
 0x6da   :  { %v4015_v34 = vpop.f32.mrb[12].mxu1 }
 0x6db   :  { %v3169_v35 = vpop.f32.mrb[13].mxu1 }
 0x6dc   :  { %v4017_v36 = vpop.f32.mrb[14].mxu1 }
 0x6dd   :  { %v3170_v37 = vpop.f32.mrb[15].mxu1 }
 0x6e2   :  { %v671_v38 = vpop.f32.mrb[16].mxu1 }
 0x6e3   :  { %v678_v39 = vmul.f32 0.35355338, %v671_v38  ;;  %v3181_v40 = vpop.f32.mrb[17].mxu1 }
 0x6e4   :  { %v674_v41 = vpop.f32.mrb[18].mxu1 }
 0x6e5   :  { %v679_v42 = vmul.f32 0.35355338, %v674_v41  ;;  %v3182_v43 = vpop.f32.mrb[19].mxu1  ;;  %v680_v44 = vadd.f32 %v678_v39, %v3960_v5 }
 0x6e7   :  { %v682_v45 = vsel %vm326_vm7, %v680_v44, -inf  ;;  %v681_v46 = vadd.f32 %v679_v42, %v3962_v9 }
 0x6e8   :  { %683 = vmax.xlane.f32.xlu0 %v682_v45  ;;  %v2975_v45 = vcombine.low %v3914_v18, %v3914_v18 }
 0x6e9   :  { %v685_v47 = vsel %vm326_vm7, %v681_v46, -inf }
 0x6ea   :  { %686 = vmax.xlane.f32.xlu1 %v685_v47 }
 0x6fb   :  { %705 = vrot.lane.b32.xlu1 %v3976_v51, %s3754_s29 }
 0x6ff   :  { %807 = vrot.lane.b32.xlu1 %v3941_v60, %s3755_s30  ;;  %v2971_v60 = vcombine.low %v3907_v14, %v3907_v14 }
 0x703   :  { %805 = vrot.lane.b32.xlu1 %v3939_v59, %s3756_s7 }
 0x775   :  { %v684_v48 = vpop.xlane.xlu0 %683 }
 0x776   :  { %v688_v50 = vsub.f32 %v680_v44, %v684_v48 }
 0x777   :  { %v687_v52 = vpop.xlane.xlu1 %686 }
 0x778   :  { %v690_v54 = vmul.f32 1.442695, %v688_v50  ;;  %v689_v55 = vsub.f32 %v681_v46, %v687_v52 }
 0x77a   :  { %3474 = vpow2.f32 %v690_v54  ;;  %v692_v56 = vmul.f32 1.442695, %v689_v55 }
 0x77b   :  { %v706_v2 = vpop.permute.xlu1 %705 }
 0x77c   :  { %3476 = vpow2.f32 %v692_v56 }
 0x77f   :  { %v808_v7 = vpop.permute.xlu1 %807 }
 0x780   :  { %v813_v8 = vsel %vm274_vm6, %v808_v7, 0 }
 0x783   :  { %v806_v10 = vpop.permute.xlu1 %805 }
 0x784   :  { %v3475_v49 = vpop.eup %3474 }
 0x785   :  { %v694_v53 = vsel %vm326_vm7, %v3475_v49, 0.0 }
 0x786   :  { %v3477_v15 = vpop.eup %3476  ;;  %695 = vadd.xlane.f32.xlu0 %v694_v53 }
 0x787   :  { %v697_v57 = vsel %vm326_vm7, %v3477_v15, 0.0 }
 0x78a   :  { %698 = vadd.xlane.f32.xlu0 %v697_v57 }
 0x7a0   :  { %578 = vrot.lane.b32.xlu0 %v2971_v60, %s3746_s5 }
 0x813   :  { %v696_v59 = vpop.xlane.xlu0 %695 }
 0x814   :  { %3478 = vrcp.f32 %v696_v59 }
 0x817   :  { %v699_v58 = vpop.xlane.xlu0 %698 }
 0x818   :  { %3480 = vrcp.f32 %v699_v58 }
 0x81b   :  { %v579_v61 = vpop.permute.xlu0 %578 }
 0x81c   :  { %v584_v62 = vsel %vm532_vm8, %v579_v61, 0 }
 0x81d   :  { %3172 = vmatpush3.bf16.msra.mxu0 %v584_v62 }
 0x81e   :  { %3183 = vmatprep.subr.bf16.mxu0 %v3744_v16  ;;  %v3479_v63 = vpop.eup %3478 }
 0x81f   :  { %v702_v3 = vmul.f32 %v3479_v63, %v3475_v49 }
 0x820   :  { %3174 = vmatmul.mubr.msk.bf16.vlgmr.msra.gmra.mrb[8].mxu0 %vm274_vm6, %v398_v24 }
 0x821   :  { %3184 = vmatpush3.bf16.msra.mxu0 %v706_v2  ;;  %3185 = vmatprep.mubr.msk.bf16.mxu0 %vm3745_vm1, %v3744_v16 }
 0x822   :  { %v3481_v14 = vpop.eup %3480  ;;  %3195 = vmatprep.subr.bf16.mxu0 %v3744_v16 }
 0x823   :  { %v703_v4 = vmul.f32 %v3481_v14, %v3477_v15 }
 0x825   :  { %v704_v6 = vpack.c.bf16 %v703_v4, %v702_v3 }
 0x828   :  { %3186 = vmatmul.mubr.msk.bf16.vlgmr.msra.gmra.mrb[12].mxu0 %vm326_vm7, %v704_v6  ;;  %v2981_v6 = vld [vmem:[#allocation11 + $0x3] ss:$0 sm:$0xff] }
 0x829   :  { %3197 = vmatprep.mubr.msk.bf16.mxu0 %vm3745_vm1, %v3744_v16 }
 0x82a   :  { %3196 = vmatpush3.bf16.xpose.msra.mxu0 %v813_v8 }
 0x82b   :  { %3207 = vmatprep.subr.bf16.mxu0 %v3744_v16 }
 0x831   :  { %3198 = vmatmul.mubr.msk.bf16.vlgmr.msra.gmra.mrb[16].mxu0 %vm274_vm6, %v806_v10 }
 0x832   :  { %3209 = vmatprep.mubr.msk.bf16.mxu0 %vm3745_vm1, %v3744_v16 }
 0x8f3   :  { %v620_v11 = vpop.f32.mrb[8].mxu0 }
 0x8f4   :  { %v4051_v12 = vadd.f32 %v620_v11, %v4015_v34  ;;  %v3175_v13 = vpop.f32.mrb[9].mxu0 }
 0x8f5   :  { %v623_v17 = vpop.f32.mrb[10].mxu0 }
 0x8f6   :  { %v4054_v20 = vadd.f32 %v623_v17, %v4017_v36  ;;  %v3176_v21 = vpop.f32.mrb[11].mxu0 }
 0x8fb   :  { %v745_v22 = vpop.f32.mrb[12].mxu0 }
 0x8fc   :  { %v3187_v23 = vpop.f32.mrb[13].mxu0 }
 0x8fd   :  { %v748_v24 = vpop.f32.mrb[14].mxu0 }
 0x8fe   :  { %v752_v25 = vpack.c.bf16 %v748_v24, %v745_v22  ;;  %v3188_v26 = vpop.f32.mrb[15].mxu0  ;;  %v4095_v24 = vld [vmem:[#allocation10 + $0x4] sm:$0xf] }
 0x8ff   :  { %v4101_v26 = vld [vmem:[#allocation10 + $0x24] sm:$0xf] }
 0x904   :  { %v849_v27 = vpop.f32.mrb[16].mxu0 }
 0x905   :  { %v856_v28 = vmul.f32 0.35355338, %v849_v27  ;;  %v3199_v29 = vpop.f32.mrb[17].mxu0  ;;  %v4103_v27 = vld [vmem:[#allocation10 + $0x34] sm:$0xf] }
 0x906   :  { %v852_v30 = vpop.f32.mrb[18].mxu0 }
 0x907   :  { %v857_v31 = vmul.f32 0.35355338, %v852_v30  ;;  %v3200_v32 = vpop.f32.mrb[19].mxu0  ;;  %v858_v33 = vadd.f32 %v856_v28, %v3960_v5 }
 0x909   :  { %v860_v34 = vsel %vm326_vm7, %v858_v33, -inf  ;;  %v859_v35 = vadd.f32 %v857_v31, %v3962_v9 }
 0x90a   :  { %861 = vmax.xlane.f32.xlu0 %v860_v34 }
 0x90b   :  { %v863_v36 = vsel %vm326_vm7, %v859_v35, -inf }
 0x90c   :  { %864 = vmax.xlane.f32.xlu1 %v863_v36 }
 0x91d   :  { %883 = vrot.lane.b32.xlu1 %v3976_v51, %s3757_s8  ;;  %v2979_v51 = vcombine.low %v3916_v19, %v3916_v19 }
 0x921   :  { %932 = vrot.lane.b32.xlu1 %v2979_v51, %s3746_s5 }
 0x997   :  { %v862_v37 = vpop.xlane.xlu0 %861 }
 0x998   :  { %v866_v38 = vsub.f32 %v858_v33, %v862_v37 }
 0x999   :  { %v865_v39 = vpop.xlane.xlu1 %864 }
 0x99a   :  { %v868_v40 = vmul.f32 1.442695, %v866_v38  ;;  %v867_v41 = vsub.f32 %v859_v35, %v865_v39 }
 0x99c   :  { %3482 = vpow2.f32 %v868_v40  ;;  %v870_v42 = vmul.f32 1.442695, %v867_v41 }
 0x99d   :  { %v884_v54 = vpop.permute.xlu1 %883 }
 0x99e   :  { %3484 = vpow2.f32 %v870_v42 }
 0x9a1   :  { %v933_v49 = vpop.permute.xlu1 %932 }
 0x9a2   :  { %v938_v53 = vsel %vm532_vm8, %v933_v49, 0  ;;  %v2982_v49 = vld [vmem:[#allocation11 + $0xd] ss:$0 sm:$0xff] }
 0x9a3   :  { %3208 = vmatpush3.bf16.msra.mxu0 %v938_v53 }
 0x9a4   :  { %3221 = vmatprep.subr.bf16.mxu0 %v3744_v16 }
 0x9a6   :  { %v3483_v5 = vpop.eup %3482 }
 0x9a7   :  { %v872_v43 = vsel %vm326_vm7, %v3483_v5, 0.0 }
 0x9a8   :  { %v3485_v44 = vpop.eup %3484  ;;  %873 = vadd.xlane.f32.xlu0 %v872_v43  ;;  %v110_v43 = vld [vmem:[#allocation5 + $0x8] sm:$0xff] }
 0x9a9   :  { %v875_v9 = vsel %vm326_vm7, %v3485_v44, 0.0 }
 0x9ac   :  { %876 = vadd.xlane.f32.xlu0 %v875_v9 }
 0x9c2   :  { %754 = vrot.lane.b32.xlu0 %v2975_v45, %s3746_s5 }
 0xa35   :  { %v874_v46 = vpop.xlane.xlu0 %873 }
 0xa36   :  { %3486 = vrcp.f32 %v874_v46 }
 0xa39   :  { %v877_v47 = vpop.xlane.xlu0 %876 }
 0xa3a   :  { %3488 = vrcp.f32 %v877_v47 }
 0xa3d   :  { %v755_v48 = vpop.permute.xlu0 %754 }
 0xa3e   :  { %v760_v50 = vsel %vm532_vm8, %v755_v48, 0 }
 0xa3f   :  { %3190 = vmatpush3.bf16.msra.mxu1 %v760_v50 }
 0xa40   :  { %3201 = vmatprep.subr.bf16.mxu1 %v3744_v16  ;;  %v3487_v52 = vpop.eup %3486 }
 0xa41   :  { %v880_v19 = vmul.f32 %v3487_v52, %v3483_v5  ;;  %v109_v5 = vld [vmem:[#allocation5] sm:$0xff] }
 0xa42   :  { %3192 = vmatmul.mubr.msk.bf16.vlgmr.msra.gmra.mrb[20].mxu1 %vm274_vm6, %v752_v25  ;;  %v4097_v25 = vld [vmem:[#allocation10 + $0x14] sm:$0xf]  ;;  %v111_v9 = vpack.c.bf16 %v110_v43, %v109_v5 }
 0xa43   :  { %3202 = vmatpush3.bf16.msra.mxu1 %v884_v54  ;;  %3203 = vmatprep.mubr.msk.bf16.mxu1 %vm3745_vm1, %v3744_v16 }
 0xa44   :  { %v3489_v18 = vpop.eup %3488  ;;  %3213 = vmatprep.subr.bf16.mxu1 %v3744_v16 }
 0xa45   :  { %v881_v55 = vmul.f32 %v3489_v18, %v3485_v44 }
 0xa47   :  { %v882_v56 = vpack.c.bf16 %v881_v55, %v880_v19 }
 0xa4a   :  { %3204 = vmatmul.mubr.msk.bf16.vlgmr.msra.gmra.mrb[24].mxu1 %vm326_vm7, %v882_v56 }
 0xa4b   :  { %3217 = vmatprep.mubr.msk.bf16.mxu1 %vm3745_vm1, %v3744_v16 }
 0xb15   :  { %v796_v15 = vpop.f32.mrb[20].mxu1 }
 0xb16   :  { %v803_v57 = vadd.f32 %v796_v15, %v4051_v12  ;;  %v3193_v60 = vpop.f32.mrb[21].mxu1 }
 0xb17   :  { %v799_v59 = vpop.f32.mrb[22].mxu1 }
 0xb18   :  { %v804_v58 = vadd.f32 %v799_v59, %v4054_v20  ;;  %v3194_v61 = vpop.f32.mrb[23].mxu1 }
 0xb1d   :  { %v923_v62 = vpop.f32.mrb[24].mxu1 }
 0xb1e   :  { %v3205_v63 = vpop.f32.mrb[25].mxu1 }
 0xb1f   :  { %v926_v2 = vpop.f32.mrb[26].mxu1 }
 0xb20   :  { %v930_v14 = vpack.c.bf16 %v926_v2, %v923_v62  ;;  %v3206_v3 = vpop.f32.mrb[27].mxu1 }
 0xb22   :  { %3210 = vmatmul.mubr.msk.bf16.vlgmr.msra.gmra.mrb[20].mxu0 %vm274_vm6, %v930_v14  ;;  %v2989_v14 = vld [vmem:[#allocation11 + $0x5] ss:$0 sm:$0xff] }
 0xb23   :  { %3225 = vmatprep.mubr.msk.bf16.mxu0 %vm3745_vm1, %v3744_v16 }
 0xbf5   :  { %v974_v4 = vpop.f32.mrb[20].mxu0 }
 0xbf6   :  { %v981_v7 = vadd.f32 %v974_v4, %v803_v57  ;;  %v3211_v8 = vpop.f32.mrb[21].mxu0 }
 0xbf7   :  { %v977_v10 = vpop.f32.mrb[22].mxu0 }
 0xbf8   :  { %v988_v11 = vadd.f32 %v2981_v6, %v981_v7  ;;  %v982_v12 = vadd.f32 %v977_v10, %v804_v58  ;;  %v3212_v13 = vpop.f32.mrb[23].mxu0  ;;  %v2983_v58 = vld [vmem:[#allocation11 + $0x10] ss:$0 sm:$0xff] }
 0xbf9   :  { %v2984_v13 = vld [vmem:[#allocation11 + $0x4] ss:$0 sm:$0xff] }
 0xbfa   :  { %v4086_v17 = vadd.f32 %v988_v11, %v3895_v0  ;;  %v989_v20 = vadd.f32 %v2981_v6, %v982_v12  ;;  %v2985_v0 = vcombine.low %v4095_v24, %v4097_v25 }
 0xbfc   :  { %v4089_v21 = vadd.f32 %v989_v20, %v3897_v1  ;;  %v994_v22 = vsel %vm125_vm0, %v4086_v17, 0.0  ;;  %3214 = vmatpush3.bf16.msra.mxu1 %v2985_v0  ;;  %v2986_v1 = vcombine.low %v4101_v26, %v4103_v27 }
 0xbfd   :  { %995 = vadd.xlane.f32.xlu1 %v994_v22  ;;  %3215 = vmatprep.subr.bf16.mxu1 %v3744_v16 }
 0xbfe   :  { %v997_v23 = vsel %vm125_vm0, %v4089_v21, 0.0 }
 0xbff   :  { %998 = vadd.xlane.f32.xlu0 %v997_v23 }
 0xc00   :  { %3216 = vmatpush3.bf16.msra.mxu1 %v2986_v1 }
 0xc01   :  { %3229 = vmatprep.subr.bf16.mxu1 %v3744_v16 }
 0xc0e   :  { %1112 = vrot.lane.b32.xlu1 %v2985_v0, %s3747_s1 }
 0xc8a   :  { %v996_v28 = vpop.xlane.xlu1 %995 }
 0xc8b   :  { %v1000_v29 = vmul.f32 0.03125, %v996_v28 }
 0xc8c   :  { %v999_v30 = vpop.xlane.xlu0 %998 }
 0xc8d   :  { %v1002_v31 = vsub.f32 %v4086_v17, %v1000_v29  ;;  %v1001_v32 = vmul.f32 0.03125, %v999_v30 }
 0xc8e   :  { %v1113_v38 = vpop.permute.xlu1 %1112 }
 0xc8f   :  { %v1003_v33 = vsub.f32 %v4089_v21, %v1001_v32  ;;  %v1004_v34 = vmul.f32 %v1002_v31, %v1002_v31  ;;  %3222 = vmatpush3.bf16.msra.mxu0 %v1113_v38  ;;  %v1018_v15 = vmul.f32 %v2982_v49, %v1002_v31  ;;  %v4151_v38 = vld [vmem:[#allocation8 + $0x18] sm:$0xff] }
 0xc90   :  { %3223 = vmatprep.subr.bf16.mxu0 %v3744_v16 }
 0xc91   :  { %v1006_v35 = vsel %vm125_vm0, %v1004_v34, 0.0  ;;  %v1005_v36 = vmul.f32 %v1003_v33, %v1003_v33  ;;  %v1019_v57 = vmul.f32 %v2982_v49, %v1003_v33  ;;  %v4149_v34 = vld [vmem:[#allocation8 + $0x10] sm:$0xff] }
 0xc92   :  { %1007 = vadd.xlane.f32.xlu0 %v1006_v35 }
 0xc93   :  { %v1009_v37 = vsel %vm125_vm0, %v1005_v36, 0.0 }
 0xc96   :  { %1010 = vadd.xlane.f32.xlu0 %v1009_v37 }
 0xcac   :  { %1114 = vrot.lane.b32.xlu0 %v2986_v1, %s3747_s1 }
 0xd1f   :  { %v1008_v39 = vpop.xlane.xlu0 %1007 }
 0xd20   :  { %v1012_v40 = vmul.f32 0.032258064, %v1008_v39 }
 0xd22   :  { %3490 = vrsqrt.f32 %v1012_v40  ;;  %vm1022_vm9 = vcmp.eq.f32.partialorder %v1012_v40, inf  ;;  %v1025_v46 = vand.u32 2147483648, %v1012_v40  ;;  %vm1024_vm10 = vcmp.eq.f32.partialorder %v1012_v40, 0.0 }
 0xd23   :  { %v1011_v41 = vpop.xlane.xlu0 %1010 }
 0xd24   :  { %v1013_v42 = vmul.f32 0.032258064, %v1011_v41 }
 0xd26   :  { %3492 = vrsqrt.f32 %v1013_v42  ;;  %vm1029_vm11 = vcmp.eq.f32.partialorder %v1013_v42, inf  ;;  %v1032_v18 = vand.u32 2147483648, %v1013_v42  ;;  %vm1031_vm12 = vcmp.eq.f32.partialorder %v1013_v42, 0.0 }
 0xd27   :  { %v1115_v44 = vpop.permute.xlu0 %1114 }
 0xd28   :  { %3224 = vmatpush3.bf16.msra.mxu0 %v1115_v44  ;;  %v2990_v44 = vld [vmem:[#allocation11 + $0x6] ss:$0 sm:$0xff] }
 0xd29   :  { %3235 = vmatprep.subr.bf16.mxu0 %v3744_v16 }
 0xd2b   :  { %3226 = vmatmul.mubr.msk.bf16.vlgmr.msra.gmra.mrb[24].mxu0 %vm125_vm0, %v111_v9 }
 0xd2c   :  { %v3491_v45 = vpop.eup %3490  ;;  %3237 = vmatprep.mubr.msk.bf16.mxu0 %vm3745_vm1, %v3744_v16 }
 0xd2d   :  { %v1021_v51 = vmul.f32 %v3491_v45, %v1012_v40 }
 0xd2f   :  { %v1023_v47 = vsel %vm1022_vm9, %v1012_v40, %v1021_v51 }
 0xd30   :  { %v3493_v48 = vpop.eup %3492  ;;  %v1026_v50 = vsel %vm1024_vm10, %v1025_v46, %v1023_v47 }
 0xd31   :  { %v1034_v52 = vadd.f32 1e-06, %v1026_v50  ;;  %v1028_v54 = vmul.f32 %v3493_v48, %v1013_v42 }
 0xd33   :  { %3494 = vrcp.f32 %v1034_v52  ;;  %v1030_v19 = vsel %vm1029_vm11, %v1013_v42, %v1028_v54 }
 0xd34   :  { %v1033_v55 = vsel %vm1031_vm12, %v1032_v18, %v1030_v19 }
 0xd35   :  { %v1035_v56 = vadd.f32 1e-06, %v1033_v55 }
 0xd37   :  { %3496 = vrcp.f32 %v1035_v56 }
 0xd3d   :  { %v3495_v53 = vpop.eup %3494 }
 0xd3e   :  { %v1037_v60 = vmul.f32 %v3495_v53, %v1018_v15 }
 0xd40   :  { %v1044_v62 = vadd.f32 %v2983_v58, %v1037_v60 }
 0xd41   :  { %v3497_v59 = vpop.eup %3496 }
 0xd42   :  { %v1039_v61 = vmul.f32 %v3497_v59, %v1019_v57 }
 0xd44   :  { %v1045_v63 = vadd.f32 %v2983_v58, %v1039_v61  ;;  %v2995_v61 = vcombine.low %v4097_v25, %v4097_v25 }
 0xd46   :  { %v1046_v2 = vpack.c.bf16 %v1045_v63, %v1044_v62 }
 0xd48   :  { %3218 = vmatmul.mubr.msk.bf16.vlgmr.msra.gmra.mrb[28].mxu1 %vm125_vm0, %v1046_v2 }
 0xd49   :  { %3231 = vmatprep.mubr.msk.bf16.mxu1 %vm3745_vm1, %v3744_v16 }
 0xdfe   :  { %v4123_v3 = vpop.f32.mrb[24].mxu0 }
 0xdff   :  { %v1167_v4 = vadd.f32 %v2989_v14, %v4123_v3  ;;  %v3227_v6 = vpop.f32.mrb[25].mxu0 }
 0xe00   :  { %v4126_v7 = vpop.f32.mrb[26].mxu0 }
 0xe01   :  { %v1168_v8 = vadd.f32 %v2989_v14, %v4126_v7  ;;  %v3228_v10 = vpop.f32.mrb[27].mxu0 }
 0xe03   :  { %v4129_v11 = vpack.c.bf16 %v1168_v8, %v1167_v4 }
 0xe05   :  { %1310 = vrot.lane.b32.xlu1 %v4129_v11, %s3749_s22  ;;  %v1187_v12 = vsel %vm274_vm6, %v4129_v11, 0 }
 0xe06   :  { %3230 = vmatpush3.bf16.xpose.msra.mxu1 %v1187_v12 }
 0xe07   :  { %3241 = vmatprep.subr.bf16.mxu1 %v3744_v16 }
 0xe1b   :  { %v1105_v20 = vpop.f32.mrb[28].mxu1 }
 0xe1c   :  { %v3219_v22 = vpop.f32.mrb[29].mxu1  ;;  %v1106_v0 = vadd.f32 %v2984_v13, %v1105_v20 }
 0xe1d   :  { %v1108_v23 = vpop.f32.mrb[30].mxu1 }
 0xe1e   :  { %v1109_v1 = vadd.f32 %v2984_v13, %v1108_v23  ;;  %v3220_v28 = vpop.f32.mrb[31].mxu1 }
 0xe20   :  { %v4136_v29 = vpack.c.bf16 %v1109_v1, %v1106_v0 }
 0xe22   :  { %1307 = vrot.lane.b32.xlu1 %v4136_v29, %s3749_s22  ;;  %3232 = vmatmul.mubr.msk.bf16.vlgmr.msra.gmra.mrb[32].mxu1 %vm274_vm6, %v4136_v29 }
 0xe23   :  { %3243 = vmatprep.mubr.msk.bf16.mxu1 %vm3745_vm1, %v3744_v16 }
 0xe77   :  { %v1311_v30 = vpop.permute.xlu1 %1310 }
 0xe78   :  { %v1316_v31 = vsel %vm274_vm6, %v1311_v30, 0 }
 0xe79   :  { %3242 = vmatpush3.bf16.xpose.msra.mxu1 %v1316_v31 }
 0xe7a   :  { %3253 = vmatprep.subr.bf16.mxu1 %v3744_v16 }
 0xe94   :  { %v1308_v32 = vpop.permute.xlu1 %1307 }
 0xe95   :  { %3244 = vmatmul.mubr.msk.bf16.vlgmr.msra.gmra.mrb[36].mxu1 %vm274_vm6, %v1308_v32 }
 0xe96   :  { %3255 = vmatprep.mubr.msk.bf16.mxu1 %vm3745_vm1, %v3744_v16 }
 0xef5   :  { %v1223_v33 = vpop.f32.mrb[32].mxu1 }
 0xef6   :  { %v1230_v35 = vmul.f32 0.35355338, %v1223_v33  ;;  %v3233_v36 = vpop.f32.mrb[33].mxu1 }
 0xef7   :  { %v1226_v37 = vpop.f32.mrb[34].mxu1 }
 0xef8   :  { %v1231_v39 = vmul.f32 0.35355338, %v1226_v37  ;;  %v3234_v40 = vpop.f32.mrb[35].mxu1  ;;  %v1232_v41 = vadd.f32 %v1230_v35, %v4149_v34 }
 0xefa   :  { %v1234_v42 = vsel %vm326_vm7, %v1232_v41, -inf  ;;  %v1233_v5 = vadd.f32 %v1231_v39, %v4151_v38 }
 0xefb   :  { %1235 = vmax.xlane.f32.xlu1 %v1234_v42 }
 0xefc   :  { %v1237_v43 = vsel %vm326_vm7, %v1233_v5, -inf }
 0xefd   :  { %1238 = vmax.xlane.f32.xlu0 %v1237_v43 }
 0xf0c   :  { %1175 = vrot.lane.b32.xlu1 %v2990_v44, %s3746_s5 }
 0xf68   :  { %v1352_v9 = vpop.f32.mrb[36].mxu1 }
 0xf69   :  { %v1359_v45 = vmul.f32 0.35355338, %v1352_v9  ;;  %v3245_v51 = vpop.f32.mrb[37].mxu1 }
 0xf6a   :  { %v1355_v46 = vpop.f32.mrb[38].mxu1 }
 0xf6b   :  { %v1360_v47 = vmul.f32 0.35355338, %v1355_v46  ;;  %v3246_v48 = vpop.f32.mrb[39].mxu1  ;;  %v1361_v50 = vadd.f32 %v1359_v45, %v4149_v34 }
 0xf6d   :  { %v1363_v52 = vsel %vm326_vm7, %v1361_v50, -inf  ;;  %v1362_v54 = vadd.f32 %v1360_v47, %v4151_v38 }
 0xf6e   :  { %1364 = vmax.xlane.f32.xlu0 %v1363_v52 }
 0xf6f   :  { %v1366_v18 = vsel %vm326_vm7, %v1362_v54, -inf }
 0xf72   :  { %1367 = vmax.xlane.f32.xlu0 %v1366_v18 }
 0xf88   :  { %v1236_v19 = vpop.xlane.xlu1 %1235 }
 0xf89   :  { %v1240_v55 = vsub.f32 %v1232_v41, %v1236_v19 }
 0xf8a   :  { %v1239_v56 = vpop.xlane.xlu0 %1238 }
 0xf8b   :  { %v1242_v49 = vmul.f32 1.442695, %v1240_v55  ;;  %v1241_v53 = vsub.f32 %v1233_v5, %v1239_v56 }
 0xf8c   :  { %v1176_v15 = vpop.permute.xlu1 %1175 }
 0xf8d   :  { %3498 = vpow2.f32 %v1242_v49  ;;  %v1244_v57 = vmul.f32 1.442695, %v1241_v53  ;;  %v1178_v60 = vadd.f32 %v1176_v15, %v4123_v3  ;;  %v1179_v59 = vadd.f32 %v1176_v15, %v4126_v7 }
 0xf8f   :  { %3500 = vpow2.f32 %v1244_v57  ;;  %v4164_v58 = vpack.c.bf16 %v1179_v59, %v1178_v60 }
 0xf91   :  { %1258 = vrot.lane.b32.xlu1 %v4164_v58, %s3747_s1 }
 0xf95   :  { %1435 = vrot.lane.b32.xlu1 %v2995_v61, %s3746_s5 }
 0xf97   :  { %v3499_v62 = vpop.eup %3498 }
 0xf98   :  { %v1246_v63 = vsel %vm326_vm7, %v3499_v62, 0.0 }
 0xf99   :  { %v3501_v2 = vpop.eup %3500  ;;  %1536 = vrot.lane.b32.xlu1 %v4129_v11, %s3753_s28  ;;  %1247 = vadd.xlane.f32.xlu0 %v1246_v63 }
 0xf9a   :  { %v1249_v14 = vsel %vm326_vm7, %v3501_v2, 0.0 }
 0xf9d   :  { %1534 = vrot.lane.b32.xlu1 %v4136_v29, %s3753_s28  ;;  %1250 = vadd.xlane.f32.xlu0 %v1249_v14 }
 0xffb   :  { %v1365_v3 = vpop.xlane.xlu0 %1364 }
 0xffc   :  { %v1369_v4 = vsub.f32 %v1361_v50, %v1365_v3 }
 0xffe   :  { %v1371_v6 = vmul.f32 1.442695, %v1369_v4 }
 0xfff   :  { %v1368_v25 = vpop.xlane.xlu0 %1367 }
0x1000   :  { %3502 = vpow2.f32 %v1371_v6  ;;  %v1370_v7 = vsub.f32 %v1362_v54, %v1368_v25  ;;  %v2997_v6 = vcombine.low %v4095_v24, %v4095_v24 }
0x1002   :  { %v1373_v8 = vmul.f32 1.442695, %v1370_v7 }
0x1003   :  { %v1259_v10 = vpop.permute.xlu1 %1258 }
0x1004   :  { %3504 = vpow2.f32 %v1373_v8  ;;  %3236 = vmatpush3.bf16.msra.mxu0 %v1259_v10 }
0x1005   :  { %3247 = vmatprep.subr.bf16.mxu0 %v3744_v16 }
0x1007   :  { %v1436_v12 = vpop.permute.xlu1 %1435 }
0x1008   :  { %v1441_v13 = vsel %vm532_vm8, %v1436_v12, 0 }
0x1009   :  { %3254 = vmatpush3.bf16.msra.mxu1 %v1441_v13 }
0x100a   :  { %v3503_v20 = vpop.eup %3502  ;;  %3265 = vmatprep.subr.bf16.mxu1 %v3744_v16 }
0x100b   :  { %v1375_v22 = vsel %vm326_vm7, %v3503_v20, 0.0  ;;  %v1537_v50 = vpop.permute.xlu1 %1536 }
0x100c   :  { %1376 = vadd.xlane.f32.xlu0 %v1375_v22  ;;  %v1542_v19 = vsel %vm274_vm6, %v1537_v50, 0 }
0x100e   :  { %v3505_v23 = vpop.eup %3504 }
0x100f   :  { %v1378_v0 = vsel %vm326_vm7, %v3505_v23, 0.0  ;;  %v1535_v55 = vpop.permute.xlu1 %1534 }
0x1010   :  { %1379 = vadd.xlane.f32.xlu0 %v1378_v0 }
0x1026   :  { %1386 = vrot.lane.b32.xlu0 %v4164_v58, %s3748_s21  ;;  %v1248_v1 = vpop.xlane.xlu0 %1247 }
0x1027   :  { %3506 = vrcp.f32 %v1248_v1 }
0x102a   :  { %v1251_v28 = vpop.xlane.xlu0 %1250 }
0x102b   :  { %3508 = vrcp.f32 %v1251_v28 }
0x1031   :  { %v3507_v30 = vpop.eup %3506 }
0x1032   :  { %v1254_v32 = vmul.f32 %v3507_v30, %v3499_v62 }
0x1035   :  { %v3509_v31 = vpop.eup %3508 }
0x1036   :  { %v1255_v33 = vmul.f32 %v3509_v31, %v3501_v2 }
0x1038   :  { %v1256_v35 = vpack.c.bf16 %v1255_v33, %v1254_v32 }
0x103a   :  { %3238 = vmatmul.mubr.msk.bf16.vlgmr.msra.gmra.mrb[28].mxu0 %vm326_vm7, %v1256_v35 }
0x103b   :  { %3249 = vmatprep.mubr.msk.bf16.mxu0 %vm3745_vm1, %v3744_v16 }
0x1099   :  { %v1377_v36 = vpop.xlane.xlu0 %1376 }
0x109a   :  { %3510 = vrcp.f32 %v1377_v36 }
0x109d   :  { %v1380_v37 = vpop.xlane.xlu0 %1379 }
0x109e   :  { %3512 = vrcp.f32 %v1380_v37 }
0x10a1   :  { %v1387_v39 = vpop.permute.xlu0 %1386 }
0x10a2   :  { %3248 = vmatpush3.bf16.msra.mxu0 %v1387_v39 }
0x10a3   :  { %3259 = vmatprep.subr.bf16.mxu0 %v3744_v16 }
0x10a4   :  { %v3511_v40 = vpop.eup %3510 }
0x10a5   :  { %v1383_v42 = vmul.f32 %v3511_v40, %v3503_v20 }
0x10a8   :  { %v3513_v41 = vpop.eup %3512 }
0x10a9   :  { %v1384_v5 = vmul.f32 %v3513_v41, %v3505_v23 }
0x10ab   :  { %v1385_v43 = vpack.c.bf16 %v1384_v5, %v1383_v42 }
0x10ad   :  { %3250 = vmatmul.mubr.msk.bf16.vlgmr.msra.gmra.mrb[32].mxu0 %vm326_vm7, %v1385_v43 }
0x10ae   :  { %3261 = vmatprep.mubr.msk.bf16.mxu0 %vm3745_vm1, %v3744_v16 }
0x110d   :  { %v1298_v44 = vpop.f32.mrb[28].mxu0 }
0x110e   :  { %v3239_v9 = vpop.f32.mrb[29].mxu0 }
0x110f   :  { %v1301_v45 = vpop.f32.mrb[30].mxu0 }
0x1110   :  { %v1305_v51 = vpack.c.bf16 %v1301_v45, %v1298_v44  ;;  %v3240_v46 = vpop.f32.mrb[31].mxu0 }
0x1180   :  { %v1426_v47 = vpop.f32.mrb[32].mxu0 }
0x1181   :  { %v3251_v48 = vpop.f32.mrb[33].mxu0 }
0x1182   :  { %v1429_v52 = vpop.f32.mrb[34].mxu0 }
0x1183   :  { %v1433_v54 = vpack.c.bf16 %v1429_v52, %v1426_v47  ;;  %v3252_v18 = vpop.f32.mrb[35].mxu0 }
0x1185   :  { %3256 = vmatmul.mubr.msk.bf16.vlgmr.msra.gmra.mrb[40].mxu1 %vm274_vm6, %v1433_v54 }
0x1186   :  { %3266 = vmatpush3.bf16.xpose.msra.mxu1 %v1542_v19  ;;  %3267 = vmatprep.mubr.msk.bf16.mxu1 %vm3745_vm1, %v3744_v16 }
0x1187   :  { %3277 = vmatprep.subr.bf16.mxu1 %v3744_v16 }
0x118d   :  { %3268 = vmatmul.mubr.msk.bf16.vlgmr.msra.gmra.mrb[44].mxu1 %vm274_vm6, %v1535_v55 }
0x118e   :  { %3279 = vmatprep.mubr.msk.bf16.mxu1 %vm3745_vm1, %v3744_v16 }
0x1258   :  { %v4199_v56 = vpop.f32.mrb[40].mxu1 }
0x1259   :  { %v3257_v49 = vpop.f32.mrb[41].mxu1 }
0x125a   :  { %v4201_v53 = vpop.f32.mrb[42].mxu1 }
0x125b   :  { %v3258_v15 = vpop.f32.mrb[43].mxu1 }
0x125c   :  { %v3001_v15 = vcombine.low %v4101_v26, %v4101_v26 }
0x1260   :  { %v1578_v57 = vpop.f32.mrb[44].mxu1 }
0x1261   :  { %v1585_v60 = vmul.f32 0.35355338, %v1578_v57  ;;  %v3269_v59 = vpop.f32.mrb[45].mxu1 }
0x1262   :  { %v1581_v61 = vpop.f32.mrb[46].mxu1 }
0x1263   :  { %v1586_v62 = vmul.f32 0.35355338, %v1581_v61  ;;  %v3270_v63 = vpop.f32.mrb[47].mxu1  ;;  %v1587_v2 = vadd.f32 %v1585_v60, %v4149_v34 }
0x1265   :  { %v1589_v14 = vsel %vm326_vm7, %v1587_v2, -inf  ;;  %v1588_v3 = vadd.f32 %v1586_v62, %v4151_v38 }
0x1266   :  { %1590 = vmax.xlane.f32.xlu1 %v1589_v14 }
0x1267   :  { %v1592_v4 = vsel %vm326_vm7, %v1588_v3, -inf }
0x1268   :  { %1593 = vmax.xlane.f32.xlu0 %v1592_v4  ;;  %v3005_v4 = vcombine.low %v4103_v27, %v4103_v27 }
0x1277   :  { %1485 = vrot.lane.b32.xlu1 %v2997_v6, %s3746_s5 }
0x12f3   :  { %v1591_v25 = vpop.xlane.xlu1 %1590 }
0x12f4   :  { %v1595_v7 = vsub.f32 %v1587_v2, %v1591_v25 }
0x12f5   :  { %v1594_v8 = vpop.xlane.xlu0 %1593 }
0x12f6   :  { %v1597_v10 = vmul.f32 1.442695, %v1595_v7  ;;  %v1596_v12 = vsub.f32 %v1588_v3, %v1594_v8 }
0x12f7   :  { %v1486_v13 = vpop.permute.xlu1 %1485 }
0x12f8   :  { %3514 = vpow2.f32 %v1597_v10  ;;  %v1599_v20 = vmul.f32 1.442695, %v1596_v12  ;;  %v1491_v22 = vsel %vm532_vm8, %v1486_v13, 0 }
0x12f9   :  { %3260 = vmatpush3.bf16.msra.mxu0 %v1491_v22 }
0x12fa   :  { %3516 = vpow2.f32 %v1599_v20  ;;  %3271 = vmatprep.subr.bf16.mxu0 %v3744_v16 }
0x12fc   :  { %3262 = vmatmul.mubr.msk.bf16.vlgmr.msra.gmra.mrb[36].mxu0 %vm274_vm6, %v1305_v51 }
0x12fd   :  { %3273 = vmatprep.mubr.msk.bf16.mxu0 %vm3745_vm1, %v3744_v16 }
0x1302   :  { %v3515_v24 = vpop.eup %3514 }
0x1303   :  { %v1601_v23 = vsel %vm326_vm7, %v3515_v24, 0.0 }
0x1304   :  { %v3517_v0 = vpop.eup %3516  ;;  %1602 = vadd.xlane.f32.xlu1 %v1601_v23 }
0x1305   :  { %v1604_v1 = vsel %vm326_vm7, %v3517_v0, 0.0 }
0x1306   :  { %1605 = vadd.xlane.f32.xlu0 %v1604_v1 }
0x1315   :  { %1714 = vrot.lane.b32.xlu1 %v4129_v11, %s3756_s7 }
0x1319   :  { %1712 = vrot.lane.b32.xlu1 %v4136_v29, %s3756_s7 }
0x131c   :  { %1612 = vrot.lane.b32.xlu0 %v4164_v58, %s3752_s27 }
0x1391   :  { %v1603_v28 = vpop.xlane.xlu1 %1602 }
0x1392   :  { %3518 = vrcp.f32 %v1603_v28 }
0x1393   :  { %v1606_v30 = vpop.xlane.xlu0 %1605 }
0x1394   :  { %3520 = vrcp.f32 %v1606_v30  ;;  %v4265_v30 = vld [vmem:[#allocation10 + $0x8] sm:$0xf] }
0x1395   :  { %v1715_v37 = vpop.permute.xlu1 %1714 }
0x1396   :  { %v1720_v39 = vsel %vm274_vm6, %v1715_v37, 0 }
0x1397   :  { %v1613_v31 = vpop.permute.xlu0 %1612 }
0x1398   :  { %3272 = vmatpush3.bf16.msra.mxu0 %v1613_v31  ;;  %v4267_v31 = vld [vmem:[#allocation10 + $0x18] sm:$0xf] }
0x1399   :  { %3283 = vmatprep.subr.bf16.mxu0 %v3744_v16  ;;  %v1713_v29 = vpop.permute.xlu1 %1712 }
0x139c   :  { %v3519_v32 = vpop.eup %3518 }
0x139d   :  { %v1609_v35 = vmul.f32 %v3519_v32, %v3515_v24  ;;  %v4269_v32 = vld [vmem:[#allocation10 + $0x28] sm:$0xf] }
0x139e   :  { %v3521_v33 = vpop.eup %3520 }
0x139f   :  { %v1610_v36 = vmul.f32 %v3521_v33, %v3517_v0  ;;  %v3009_v33 = vcombine.low %v4265_v30, %v4267_v31 }
0x13a1   :  { %v1611_v11 = vpack.c.bf16 %v1610_v36, %v1609_v35  ;;  %v4273_v35 = vld [vmem:[#allocation10 + $0x38] sm:$0xf] }
0x13a2   :  { %v3010_v36 = vcombine.low %v4269_v32, %v4273_v35 }
0x13a3   :  { %3274 = vmatmul.mubr.msk.bf16.vlgmr.msra.gmra.mrb[40].mxu0 %vm326_vm7, %v1611_v11 }
0x13a4   :  { %3284 = vmatpush3.bf16.xpose.msra.mxu0 %v1720_v39  ;;  %3285 = vmatprep.mubr.msk.bf16.mxu0 %vm3745_vm1, %v3744_v16 }
0x13a5   :  { %3295 = vmatprep.subr.bf16.mxu0 %v3744_v16 }
0x13ab   :  { %3286 = vmatmul.mubr.msk.bf16.vlgmr.msra.gmra.mrb[44].mxu0 %vm274_vm6, %v1713_v29 }
0x13ac   :  { %3297 = vmatprep.mubr.msk.bf16.mxu0 %vm3745_vm1, %v3744_v16 }
0x13cf   :  { %v1527_v40 = vpop.f32.mrb[36].mxu0 }
0x13d0   :  { %v4233_v41 = vadd.f32 %v1527_v40, %v4199_v56  ;;  %v3263_v42 = vpop.f32.mrb[37].mxu0 }
0x13d1   :  { %v1530_v5 = vpop.f32.mrb[38].mxu0  ;;  %v112_v42 = vld [vmem:[#allocation7] sm:$0xff] }
0x13d2   :  { %v4236_v43 = vadd.f32 %v1530_v5, %v4201_v53  ;;  %v3264_v44 = vpop.f32.mrb[39].mxu0  ;;  %v113_v5 = vld [vmem:[#allocation7 + $0x8] sm:$0xff] }
0x13d3   :  { %v114_v44 = vpack.c.bf16 %v113_v5, %v112_v42 }
0x1476   :  { %v1652_v9 = vpop.f32.mrb[40].mxu0 }
0x1477   :  { %v3275_v45 = vpop.f32.mrb[41].mxu0 }
0x1478   :  { %v1655_v51 = vpop.f32.mrb[42].mxu0 }
0x1479   :  { %v1659_v46 = vpack.c.bf16 %v1655_v51, %v1652_v9  ;;  %v3276_v47 = vpop.f32.mrb[43].mxu0 }
0x147e   :  { %v1756_v48 = vpop.f32.mrb[44].mxu0 }
0x147f   :  { %v1763_v50 = vmul.f32 0.35355338, %v1756_v48  ;;  %v3287_v52 = vpop.f32.mrb[45].mxu0 }
0x1480   :  { %v1759_v54 = vpop.f32.mrb[46].mxu0 }
0x1481   :  { %v1764_v18 = vmul.f32 0.35355338, %v1759_v54  ;;  %v3288_v19 = vpop.f32.mrb[47].mxu0  ;;  %v1765_v55 = vadd.f32 %v1763_v50, %v4149_v34 }
0x1483   :  { %v1767_v56 = vsel %vm326_vm7, %v1765_v55, -inf  ;;  %v1766_v49 = vadd.f32 %v1764_v18, %v4151_v38  ;;  %v3013_v18 = vld [vmem:[#allocation11 + $0x9] ss:$0 sm:$0xff] }
0x1484   :  { %1768 = vmax.xlane.f32.xlu1 %v1767_v56 }
0x1485   :  { %v1770_v53 = vsel %vm326_vm7, %v1766_v49, -inf }
0x1486   :  { %1771 = vmax.xlane.f32.xlu0 %v1770_v53 }
0x1495   :  { %1661 = vrot.lane.b32.xlu1 %v3001_v15, %s3746_s5 }
0x1499   :  { %1839 = vrot.lane.b32.xlu1 %v3005_v4, %s3746_s5 }
0x149d   :  { %1963 = vrot.lane.b32.xlu1 %v3009_v33, %s3747_s1 }
0x14a1   :  { %1965 = vrot.lane.b32.xlu1 %v3010_v36, %s3747_s1 }
0x1511   :  { %v1769_v57 = vpop.xlane.xlu1 %1768 }
0x1512   :  { %v1773_v60 = vsub.f32 %v1765_v55, %v1769_v57 }
0x1513   :  { %v1772_v59 = vpop.xlane.xlu0 %1771 }
0x1514   :  { %v1775_v61 = vmul.f32 1.442695, %v1773_v60  ;;  %v1774_v62 = vsub.f32 %v1766_v49, %v1772_v59 }
0x1515   :  { %v1662_v63 = vpop.permute.xlu1 %1661 }
0x1516   :  { %3522 = vpow2.f32 %v1775_v61  ;;  %v1777_v34 = vmul.f32 1.442695, %v1774_v62  ;;  %v1667_v2 = vsel %vm532_vm8, %v1662_v63, 0  ;;  %v3008_v61 = vld [vmem:[#allocation11 + $0x8] ss:$0 sm:$0xff] }
0x1517   :  { %3278 = vmatpush3.bf16.msra.mxu1 %v1667_v2 }
0x1518   :  { %3524 = vpow2.f32 %v1777_v34  ;;  %3289 = vmatprep.subr.bf16.mxu1 %v3744_v16 }
0x1519   :  { %v1840_v27 = vpop.permute.xlu1 %1839 }
0x151a   :  { %3280 = vmatmul.mubr.msk.bf16.vlgmr.msra.gmra.mrb[48].mxu1 %vm274_vm6, %v1659_v46  ;;  %v3007_v46 = vld [vmem:[#allocation11 + $0x7] ss:$0 sm:$0xff] }
0x151b   :  { %3291 = vmatprep.mubr.msk.bf16.mxu1 %vm3745_vm1, %v3744_v16 }
0x151d   :  { %v1964_v39 = vpop.permute.xlu1 %1963 }
0x1520   :  { %v3523_v26 = vpop.eup %3522 }
0x1521   :  { %v1779_v38 = vsel %vm326_vm7, %v3523_v26, 0.0 }
0x1522   :  { %v3525_v14 = vpop.eup %3524  ;;  %1780 = vadd.xlane.f32.xlu0 %v1779_v38 }
0x1523   :  { %v1782_v3 = vsel %vm326_vm7, %v3525_v14, 0.0 }
0x1526   :  { %1783 = vadd.xlane.f32.xlu0 %v1782_v3 }
0x153c   :  { %1790 = vrot.lane.b32.xlu0 %v4164_v58, %s3755_s30  ;;  %v1845_v58 = vsel %vm532_vm8, %v1840_v27, 0 }
0x153d   :  { %3296 = vmatpush3.bf16.msra.mxu0 %v1845_v58 }
0x153e   :  { %3309 = vmatprep.subr.bf16.mxu0 %v3744_v16 }
0x15af   :  { %v1781_v6 = vpop.xlane.xlu0 %1780 }
0x15b0   :  { %3526 = vrcp.f32 %v1781_v6 }
0x15b3   :  { %v1784_v25 = vpop.xlane.xlu0 %1783 }
0x15b4   :  { %3528 = vrcp.f32 %v1784_v25 }
0x15b7   :  { %v1791_v7 = vpop.permute.xlu0 %1790 }
0x15b8   :  { %3290 = vmatpush3.bf16.msra.mxu1 %v1791_v7  ;;  %v4318_v7 = vld [vmem:[#allocation8 + $0x20] sm:$0xff] }
0x15b9   :  { %3301 = vmatprep.subr.bf16.mxu1 %v3744_v16 }
0x15ba   :  { %v3527_v8 = vpop.eup %3526 }
0x15bb   :  { %v1787_v12 = vmul.f32 %v3527_v8, %v3523_v26 }
0x15be   :  { %v3529_v10 = vpop.eup %3528 }
0x15bf   :  { %v1788_v13 = vmul.f32 %v3529_v10, %v3525_v14 }
0x15c1   :  { %v1789_v20 = vpack.c.bf16 %v1788_v13, %v1787_v12  ;;  %v4320_v13 = vld [vmem:[#allocation8 + $0x28] sm:$0xff] }
0x15c3   :  { %3292 = vmatmul.mubr.msk.bf16.vlgmr.msra.gmra.mrb[52].mxu1 %vm326_vm7, %v1789_v20 }
0x15c4   :  { %3305 = vmatprep.mubr.msk.bf16.mxu1 %vm3745_vm1, %v3744_v16  ;;  %3302 = vmatpush3.bf16.msra.mxu1 %v3009_v33 }
0x15c5   :  { %3303 = vmatprep.subr.bf16.mxu1 %v3744_v16 }
0x15c8   :  { %3304 = vmatpush3.bf16.msra.mxu1 %v3010_v36 }
0x15c9   :  { %3317 = vmatprep.subr.bf16.mxu1 %v3744_v16 }
0x15ed   :  { %v1703_v22 = vpop.f32.mrb[48].mxu1 }
0x15ee   :  { %v1710_v24 = vadd.f32 %v1703_v22, %v4233_v41  ;;  %v3281_v23 = vpop.f32.mrb[49].mxu1 }
0x15ef   :  { %v1706_v0 = vpop.f32.mrb[50].mxu1 }
0x15f0   :  { %v1711_v1 = vadd.f32 %v1706_v0, %v4236_v43  ;;  %v3282_v28 = vpop.f32.mrb[51].mxu1  ;;  %v1966_v43 = vpop.permute.xlu1 %1965 }
0x1696   :  { %v1830_v37 = vpop.f32.mrb[52].mxu1 }
0x1697   :  { %v3293_v11 = vpop.f32.mrb[53].mxu1 }
0x1698   :  { %v1833_v29 = vpop.f32.mrb[54].mxu1 }
0x1699   :  { %v1837_v40 = vpack.c.bf16 %v1833_v29, %v1830_v37  ;;  %v3294_v41 = vpop.f32.mrb[55].mxu1 }
0x169a   :  { %v3014_v41 = vld [vmem:[#allocation11 + $0xa] ss:$0 sm:$0xff] }
0x169b   :  { %3298 = vmatmul.mubr.msk.bf16.vlgmr.msra.gmra.mrb[48].mxu0 %vm274_vm6, %v1837_v40 }
0x169c   :  { %3310 = vmatpush3.bf16.msra.mxu0 %v1964_v39  ;;  %3313 = vmatprep.mubr.msk.bf16.mxu0 %vm3745_vm1, %v3744_v16 }
0x169d   :  { %3311 = vmatprep.subr.bf16.mxu0 %v3744_v16 }
0x16a0   :  { %3312 = vmatpush3.bf16.msra.mxu0 %v1966_v43 }
0x16a1   :  { %3323 = vmatprep.subr.bf16.mxu0 %v3744_v16 }
0x16a3   :  { %3314 = vmatmul.mubr.msk.bf16.vlgmr.msra.gmra.mrb[52].mxu0 %vm125_vm0, %v114_v44 }
0x16a4   :  { %3325 = vmatprep.mubr.msk.bf16.mxu0 %vm3745_vm1, %v3744_v16 }
0x176e   :  { %v1881_v9 = vpop.f32.mrb[48].mxu0 }
0x176f   :  { %v1888_v45 = vadd.f32 %v1881_v9, %v1710_v24  ;;  %v3299_v51 = vpop.f32.mrb[49].mxu0 }
0x1770   :  { %v1884_v47 = vpop.f32.mrb[50].mxu0 }
0x1771   :  { %v1889_v48 = vadd.f32 %v1884_v47, %v1711_v1  ;;  %v3300_v50 = vpop.f32.mrb[51].mxu0  ;;  %v1895_v52 = vadd.f32 %v3007_v46, %v1888_v45 }
0x1773   :  { %v1896_v54 = vadd.f32 %v3007_v46, %v1889_v48 }
0x1775   :  { %v1897_v19 = vpack.c.bf16 %v1896_v54, %v1895_v52 }
0x1776   :  { %v4289_v55 = vpop.f32.mrb[52].mxu0 }
0x1777   :  { %3306 = vmatmul.mubr.msk.bf16.vlgmr.msra.gmra.mrb[56].mxu1 %vm125_vm0, %v1897_v19  ;;  %v2018_v56 = vadd.f32 %v3013_v18, %v4289_v55  ;;  %v3315_v49 = vpop.f32.mrb[53].mxu0 }
0x1778   :  { %v4293_v53 = vpop.f32.mrb[54].mxu0  ;;  %3319 = vmatprep.mubr.msk.bf16.mxu1 %vm3745_vm1, %v3744_v16 }
0x1779   :  { %v2019_v15 = vadd.f32 %v3013_v18, %v4293_v53  ;;  %v3316_v57 = vpop.f32.mrb[55].mxu0 }
0x177b   :  { %v4298_v60 = vpack.c.bf16 %v2019_v15, %v2018_v56 }
0x177d   :  { %2161 = vrot.lane.b32.xlu0 %v4298_v60, %s3749_s22  ;;  %v2038_v59 = vsel %vm274_vm6, %v4298_v60, 0 }
0x177e   :  { %3318 = vmatpush3.bf16.xpose.msra.mxu1 %v2038_v59 }
0x177f   :  { %3329 = vmatprep.subr.bf16.mxu1 %v3744_v16 }
0x17ef   :  { %v2162_v2 = vpop.permute.xlu0 %2161 }
0x17f0   :  { %v2167_v4 = vsel %vm274_vm6, %v2162_v2, 0 }
0x184a   :  { %v1956_v62 = vpop.f32.mrb[56].mxu1 }
0x184b   :  { %v3307_v63 = vpop.f32.mrb[57].mxu1  ;;  %v1957_v26 = vadd.f32 %v3008_v61, %v1956_v62 }
0x184c   :  { %v1959_v34 = vpop.f32.mrb[58].mxu1 }
0x184d   :  { %v1960_v38 = vadd.f32 %v3008_v61, %v1959_v34  ;;  %v3308_v14 = vpop.f32.mrb[59].mxu1  ;;  %v3019_v61 = vcombine.low %v4267_v31, %v4267_v31 }
0x184f   :  { %v4305_v3 = vpack.c.bf16 %v1960_v38, %v1957_v26 }
0x1851   :  { %2158 = vrot.lane.b32.xlu1 %v4305_v3, %s3749_s22  ;;  %3320 = vmatmul.mubr.msk.bf16.vlgmr.msra.gmra.mrb[60].mxu1 %vm274_vm6, %v4305_v3 }
0x1852   :  { %3330 = vmatpush3.bf16.xpose.msra.mxu1 %v2167_v4  ;;  %3331 = vmatprep.mubr.msk.bf16.mxu1 %vm3745_vm1, %v3744_v16 }
0x1853   :  { %3341 = vmatprep.subr.bf16.mxu1 %v3744_v16 }
0x18c3   :  { %v2159_v6 = vpop.permute.xlu1 %2158 }
0x18c4   :  { %3332 = vmatmul.mubr.msk.bf16.vlgmr.msra.gmra.mrb[64].mxu1 %vm274_vm6, %v2159_v6 }
0x18c5   :  { %3343 = vmatprep.mubr.msk.bf16.mxu1 %vm3745_vm1, %v3744_v16 }
0x1924   :  { %v2074_v25 = vpop.f32.mrb[60].mxu1 }
0x1925   :  { %v2081_v8 = vmul.f32 0.35355338, %v2074_v25  ;;  %v3321_v10 = vpop.f32.mrb[61].mxu1 }
0x1926   :  { %v2077_v12 = vpop.f32.mrb[62].mxu1 }
0x1927   :  { %v2082_v20 = vmul.f32 0.35355338, %v2077_v12  ;;  %v3322_v27 = vpop.f32.mrb[63].mxu1  ;;  %v2083_v58 = vadd.f32 %v2081_v8, %v4318_v7 }
0x1929   :  { %v2085_v22 = vsel %vm326_vm7, %v2083_v58, -inf  ;;  %v2084_v24 = vadd.f32 %v2082_v20, %v4320_v13 }
0x192a   :  { %2086 = vmax.xlane.f32.xlu0 %v2085_v22 }
0x192b   :  { %v2088_v23 = vsel %vm326_vm7, %v2084_v24, -inf }
0x192c   :  { %2089 = vmax.xlane.f32.xlu1 %v2088_v23 }
0x1997   :  { %v2203_v0 = vpop.f32.mrb[64].mxu1 }
0x1998   :  { %v2210_v1 = vmul.f32 0.35355338, %v2203_v0  ;;  %v3333_v28 = vpop.f32.mrb[65].mxu1 }
0x1999   :  { %v2206_v33 = vpop.f32.mrb[66].mxu1 }
0x199a   :  { %v2211_v36 = vmul.f32 0.35355338, %v2206_v33  ;;  %v3334_v37 = vpop.f32.mrb[67].mxu1  ;;  %v2212_v11 = vadd.f32 %v2210_v1, %v4318_v7 }
0x199c   :  { %v2214_v39 = vsel %vm326_vm7, %v2212_v11, -inf  ;;  %v2213_v29 = vadd.f32 %v2211_v36, %v4320_v13 }
0x199d   :  { %2215 = vmax.xlane.f32.xlu0 %v2214_v39 }
0x199e   :  { %v2217_v40 = vsel %vm326_vm7, %v2213_v29, -inf }
0x19a1   :  { %2218 = vmax.xlane.f32.xlu0 %v2217_v40 }
0x19b7   :  { %v2087_v42 = vpop.xlane.xlu0 %2086  ;;  %2026 = vrot.lane.b32.xlu0 %v3014_v41, %s3746_s5 }
0x19b8   :  { %v2091_v5 = vsub.f32 %v2083_v58, %v2087_v42 }
0x19b9   :  { %v2090_v43 = vpop.xlane.xlu1 %2089 }
0x19ba   :  { %v2093_v44 = vmul.f32 1.442695, %v2091_v5  ;;  %v2092_v9 = vsub.f32 %v2084_v24, %v2090_v43 }
0x19bc   :  { %3530 = vpow2.f32 %v2093_v44  ;;  %v2095_v45 = vmul.f32 1.442695, %v2092_v9 }
0x19be   :  { %3532 = vpow2.f32 %v2095_v45 }
0x19c6   :  { %v3531_v51 = vpop.eup %3530 }
0x19c7   :  { %v2097_v46 = vsel %vm326_vm7, %v3531_v51, 0.0 }
0x19c8   :  { %v3533_v47 = vpop.eup %3532  ;;  %2098 = vadd.xlane.f32.xlu1 %v2097_v46 }
0x19c9   :  { %v2100_v48 = vsel %vm326_vm7, %v3533_v47, 0.0 }
0x19cc   :  { %2101 = vadd.xlane.f32.xlu1 %v2100_v48 }
0x1a2a   :  { %v2216_v50 = vpop.xlane.xlu0 %2215 }
0x1a2b   :  { %v2220_v52 = vsub.f32 %v2212_v11, %v2216_v50 }
0x1a2d   :  { %v2222_v54 = vmul.f32 1.442695, %v2220_v52 }
0x1a2e   :  { %v2219_v18 = vpop.xlane.xlu0 %2218 }
0x1a2f   :  { %3534 = vpow2.f32 %v2222_v54  ;;  %v2221_v19 = vsub.f32 %v2213_v29, %v2219_v18 }
0x1a31   :  { %v2224_v56 = vmul.f32 1.442695, %v2221_v19 }
0x1a32   :  { %v2027_v49 = vpop.permute.xlu0 %2026 }
0x1a33   :  { %3536 = vpow2.f32 %v2224_v56  ;;  %v2029_v15 = vadd.f32 %v2027_v49, %v4289_v55  ;;  %v2030_v57 = vadd.f32 %v2027_v49, %v4293_v53 }
0x1a35   :  { %v4335_v59 = vpack.c.bf16 %v2030_v57, %v2029_v15 }
0x1a37   :  { %2237 = vrot.lane.b32.xlu0 %v4335_v59, %s3748_s21 }
0x1a39   :  { %v3535_v62 = vpop.eup %3534 }
0x1a3a   :  { %v2226_v63 = vsel %vm326_vm7, %v3535_v62, 0.0 }
0x1a3b   :  { %2227 = vadd.xlane.f32.xlu1 %v2226_v63  ;;  %2286 = vrot.lane.b32.xlu0 %v3019_v61, %s3746_s5 }
0x1a3d   :  { %v3537_v34 = vpop.eup %3536 }
0x1a3e   :  { %v2229_v2 = vsel %vm326_vm7, %v3537_v34, 0.0 }
0x1a3f   :  { %2230 = vadd.xlane.f32.xlu1 %v2229_v2  ;;  %2387 = vrot.lane.b32.xlu0 %v4298_v60, %s3753_s28 }
0x1a50   :  { %2109 = vrot.lane.b32.xlu1 %v4335_v59, %s3747_s1 }
0x1a54   :  { %2385 = vrot.lane.b32.xlu1 %v4305_v3, %s3753_s28 }
0x1a55   :  { %v2099_v26 = vpop.xlane.xlu1 %2098 }
0x1a59   :  { %v2102_v38 = vpop.xlane.xlu1 %2101 }
0x1a5a   :  { %3538 = vrcp.f32 %v2102_v38 }
0x1a5b   :  { %3540 = vrcp.f32 %v2099_v26 }
0x1a64   :  { %v3539_v4 = vpop.eup %3538 }
0x1a65   :  { %v3541_v25 = vpop.eup %3540  ;;  %v2106_v8 = vmul.f32 %v3539_v4, %v3533_v47 }
0x1a66   :  { %v2105_v10 = vmul.f32 %v3541_v25, %v3531_v51 }
0x1a68   :  { %v2107_v20 = vpack.c.bf16 %v2106_v8, %v2105_v10 }
0x1aa9   :  { %v2238_v31 = vpop.permute.xlu0 %2237 }
0x1aad   :  { %v2287_v55 = vpop.permute.xlu0 %2286 }
0x1aae   :  { %v2292_v53 = vsel %vm532_vm8, %v2287_v55, 0 }
0x1aaf   :  { %3342 = vmatpush3.bf16.msra.mxu1 %v2292_v53 }
0x1ab0   :  { %3353 = vmatprep.subr.bf16.mxu1 %v3744_v16 }
0x1ab1   :  { %v2388_v39 = vpop.permute.xlu0 %2387 }
0x1ab2   :  { %v2393_v42 = vsel %vm274_vm6, %v2388_v39, 0 }
0x1ac8   :  { %v2228_v14 = vpop.xlane.xlu1 %2227 }
0x1ac9   :  { %3542 = vrcp.f32 %v2228_v14 }
0x1acc   :  { %v2231_v6 = vpop.xlane.xlu1 %2230 }
0x1acd   :  { %3544 = vrcp.f32 %v2231_v6 }
0x1ad0   :  { %v2110_v12 = vpop.permute.xlu1 %2109 }
0x1ad1   :  { %3324 = vmatpush3.bf16.msra.mxu0 %v2110_v12 }
0x1ad2   :  { %3335 = vmatprep.subr.bf16.mxu0 %v3744_v16 }
0x1ad3   :  { %v3543_v27 = vpop.eup %3542 }
0x1ad4   :  { %3326 = vmatmul.mubr.msk.bf16.vlgmr.msra.gmra.mrb[56].mxu0 %vm326_vm7, %v2107_v20  ;;  %v2234_v22 = vmul.f32 %v3543_v27, %v3535_v62  ;;  %v2386_v5 = vpop.permute.xlu1 %2385 }
0x1ad5   :  { %3336 = vmatpush3.bf16.msra.mxu0 %v2238_v31  ;;  %3337 = vmatprep.mubr.msk.bf16.mxu0 %vm3745_vm1, %v3744_v16 }
0x1ad6   :  { %3347 = vmatprep.subr.bf16.mxu0 %v3744_v16 }
0x1ad7   :  { %v3545_v58 = vpop.eup %3544 }
0x1ad8   :  { %v2235_v24 = vmul.f32 %v3545_v58, %v3537_v34 }
0x1ada   :  { %v2236_v23 = vpack.c.bf16 %v2235_v24, %v2234_v22 }
0x1adc   :  { %3338 = vmatmul.mubr.msk.bf16.vlgmr.msra.gmra.mrb[60].mxu0 %vm326_vm7, %v2236_v23 }
0x1add   :  { %3349 = vmatprep.mubr.msk.bf16.mxu0 %vm3745_vm1, %v3744_v16 }
0x1ba7   :  { %v4360_v0 = vpop.f32.mrb[56].mxu0 }
0x1ba8   :  { %v3327_v1 = vpop.f32.mrb[57].mxu0 }
0x1ba9   :  { %v4362_v28 = vpop.f32.mrb[58].mxu0 }
0x1baa   :  { %v2156_v33 = vpack.c.bf16 %v4362_v28, %v4360_v0  ;;  %v3328_v36 = vpop.f32.mrb[59].mxu0 }
0x1baf   :  { %v2277_v37 = vpop.f32.mrb[60].mxu0 }
0x1bb0   :  { %v3339_v11 = vpop.f32.mrb[61].mxu0 }
0x1bb1   :  { %v2280_v29 = vpop.f32.mrb[62].mxu0 }
0x1bb2   :  { %v2284_v40 = vpack.c.bf16 %v2280_v29, %v2277_v37  ;;  %v3340_v41 = vpop.f32.mrb[63].mxu0 }
0x1bb4   :  { %3344 = vmatmul.mubr.msk.bf16.vlgmr.msra.gmra.mrb[68].mxu1 %vm274_vm6, %v2284_v40 }
0x1bb5   :  { %3354 = vmatpush3.bf16.xpose.msra.mxu1 %v2393_v42  ;;  %3355 = vmatprep.mubr.msk.bf16.mxu1 %vm3745_vm1, %v3744_v16 }
0x1bb6   :  { %3365 = vmatprep.subr.bf16.mxu1 %v3744_v16 }
0x1bbc   :  { %3356 = vmatmul.mubr.msk.bf16.vlgmr.msra.gmra.mrb[72].mxu1 %vm274_vm6, %v2386_v5 }
0x1bbd   :  { %3367 = vmatprep.mubr.msk.bf16.mxu1 %vm3745_vm1, %v3744_v16 }
0x1c87   :  { %v4374_v43 = vpop.f32.mrb[68].mxu1 }
0x1c88   :  { %v3345_v44 = vpop.f32.mrb[69].mxu1 }
0x1c89   :  { %v4376_v9 = vpop.f32.mrb[70].mxu1 }
0x1c8a   :  { %v3346_v45 = vpop.f32.mrb[71].mxu1 }
0x1c8b   :  { %v3029_v45 = vcombine.low %v4273_v35, %v4273_v35 }
0x1c8f   :  { %v2429_v51 = vpop.f32.mrb[72].mxu1 }
0x1c90   :  { %v2436_v46 = vmul.f32 0.35355338, %v2429_v51  ;;  %v3357_v47 = vpop.f32.mrb[73].mxu1 }
0x1c91   :  { %v2432_v48 = vpop.f32.mrb[74].mxu1 }
0x1c92   :  { %v2437_v50 = vmul.f32 0.35355338, %v2432_v48  ;;  %v3358_v52 = vpop.f32.mrb[75].mxu1  ;;  %v2438_v54 = vadd.f32 %v2436_v46, %v4318_v7 }
0x1c94   :  { %v2440_v18 = vsel %vm326_vm7, %v2438_v54, -inf  ;;  %v2439_v19 = vadd.f32 %v2437_v50, %v4320_v13 }
0x1c95   :  { %2441 = vmax.xlane.f32.xlu0 %v2440_v18 }
0x1c96   :  { %v2443_v56 = vsel %vm326_vm7, %v2439_v19, -inf }
0x1c97   :  { %2444 = vmax.xlane.f32.xlu1 %v2443_v56 }
0x1ca8   :  { %2463 = vrot.lane.b32.xlu1 %v4335_v59, %s3752_s27 }
0x1cac   :  { %2565 = vrot.lane.b32.xlu1 %v4298_v60, %s3756_s7  ;;  %v3021_v60 = vcombine.low %v4265_v30, %v4265_v30 }
0x1cb0   :  { %2563 = vrot.lane.b32.xlu1 %v4305_v3, %s3756_s7 }
0x1d22   :  { %v2442_v49 = vpop.xlane.xlu0 %2441 }
0x1d23   :  { %v2446_v15 = vsub.f32 %v2438_v54, %v2442_v49 }
0x1d24   :  { %v2445_v57 = vpop.xlane.xlu1 %2444 }
0x1d25   :  { %v2448_v61 = vmul.f32 1.442695, %v2446_v15  ;;  %v2447_v62 = vsub.f32 %v2439_v19, %v2445_v57 }
0x1d27   :  { %3546 = vpow2.f32 %v2448_v61  ;;  %v2450_v63 = vmul.f32 1.442695, %v2447_v62 }
0x1d28   :  { %v2464_v4 = vpop.permute.xlu1 %2463 }
0x1d29   :  { %3548 = vpow2.f32 %v2450_v63 }
0x1d2c   :  { %v2566_v10 = vpop.permute.xlu1 %2565 }
0x1d2d   :  { %v2571_v12 = vsel %vm274_vm6, %v2566_v10, 0 }
0x1d30   :  { %v2564_v20 = vpop.permute.xlu1 %2563 }
0x1d31   :  { %v3547_v34 = vpop.eup %3546 }
0x1d32   :  { %v2452_v2 = vsel %vm326_vm7, %v3547_v34, 0.0 }
0x1d33   :  { %v3549_v31 = vpop.eup %3548  ;;  %2453 = vadd.xlane.f32.xlu0 %v2452_v2 }
0x1d34   :  { %v2455_v55 = vsel %vm326_vm7, %v3549_v31, 0.0 }
0x1d37   :  { %2456 = vadd.xlane.f32.xlu0 %v2455_v55 }
0x1d4d   :  { %2336 = vrot.lane.b32.xlu0 %v3021_v60, %s3746_s5 }
0x1dc0   :  { %v2454_v3 = vpop.xlane.xlu0 %2453 }
0x1dc1   :  { %3550 = vrcp.f32 %v2454_v3 }
0x1dc4   :  { %v2457_v53 = vpop.xlane.xlu0 %2456 }
0x1dc5   :  { %3552 = vrcp.f32 %v2457_v53 }
0x1dc8   :  { %v2337_v26 = vpop.permute.xlu0 %2336 }
0x1dc9   :  { %v2342_v38 = vsel %vm532_vm8, %v2337_v26, 0 }
0x1dca   :  { %3348 = vmatpush3.bf16.msra.mxu0 %v2342_v38 }
0x1dcb   :  { %3359 = vmatprep.subr.bf16.mxu0 %v3744_v16  ;;  %v3551_v14 = vpop.eup %3550 }
0x1dcc   :  { %v2460_v6 = vmul.f32 %v3551_v14, %v3547_v34 }
0x1dcd   :  { %3350 = vmatmul.mubr.msk.bf16.vlgmr.msra.gmra.mrb[64].mxu0 %vm274_vm6, %v2156_v33 }
0x1dce   :  { %3360 = vmatpush3.bf16.msra.mxu0 %v2464_v4  ;;  %3361 = vmatprep.mubr.msk.bf16.mxu0 %vm3745_vm1, %v3744_v16 }
0x1dcf   :  { %v3553_v30 = vpop.eup %3552  ;;  %3371 = vmatprep.subr.bf16.mxu0 %v3744_v16 }
0x1dd0   :  { %v2461_v25 = vmul.f32 %v3553_v30, %v3549_v31 }
0x1dd2   :  { %v2462_v8 = vpack.c.bf16 %v2461_v25, %v2460_v6 }
0x1dd5   :  { %3362 = vmatmul.mubr.msk.bf16.vlgmr.msra.gmra.mrb[68].mxu0 %vm326_vm7, %v2462_v8  ;;  %v3031_v8 = vld [vmem:[#allocation11 + $0xb] ss:$0 sm:$0xff] }
0x1dd6   :  { %3373 = vmatprep.mubr.msk.bf16.mxu0 %vm3745_vm1, %v3744_v16 }
0x1dd7   :  { %3372 = vmatpush3.bf16.xpose.msra.mxu0 %v2571_v12 }
0x1dd8   :  { %3383 = vmatprep.subr.bf16.mxu0 %v3744_v16 }
0x1dde   :  { %3374 = vmatmul.mubr.msk.bf16.vlgmr.msra.gmra.mrb[72].mxu0 %vm274_vm6, %v2564_v20 }
0x1ddf   :  { %3385 = vmatprep.mubr.msk.bf16.mxu0 %vm3745_vm1, %v3744_v16 }
0x1ea0   :  { %v2378_v27 = vpop.f32.mrb[64].mxu0 }
0x1ea1   :  { %v4408_v58 = vadd.f32 %v2378_v27, %v4374_v43  ;;  %v3351_v22 = vpop.f32.mrb[65].mxu0 }
0x1ea2   :  { %v2381_v24 = vpop.f32.mrb[66].mxu0 }
0x1ea3   :  { %v4411_v23 = vadd.f32 %v2381_v24, %v4376_v9  ;;  %v3352_v0 = vpop.f32.mrb[67].mxu0 }
0x1ea8   :  { %v2503_v1 = vpop.f32.mrb[68].mxu0 }
0x1ea9   :  { %v3363_v28 = vpop.f32.mrb[69].mxu0 }
0x1eaa   :  { %v2506_v33 = vpop.f32.mrb[70].mxu0 }
0x1eab   :  { %v2510_v36 = vpack.c.bf16 %v2506_v33, %v2503_v1  ;;  %v3364_v37 = vpop.f32.mrb[71].mxu0 }
0x1eb1   :  { %v2607_v11 = vpop.f32.mrb[72].mxu0 }
0x1eb2   :  { %v2614_v39 = vmul.f32 0.35355338, %v2607_v11  ;;  %v3375_v29 = vpop.f32.mrb[73].mxu0 }
0x1eb3   :  { %v2610_v40 = vpop.f32.mrb[74].mxu0 }
0x1eb4   :  { %v2616_v41 = vadd.f32 %v2614_v39, %v4318_v7  ;;  %v2615_v42 = vmul.f32 0.35355338, %v2610_v40  ;;  %v3376_v5 = vpop.f32.mrb[75].mxu0 }
0x1eb5   :  { %v3449_v5 = vld [vmem:[#allocation10 + $0x2c] ss:$16 sps:$4 sm:$0xff]  }
0x1eb6   :  { %v2617_v43 = vadd.f32 %v2615_v42, %v4320_v13  ;;  %v2618_v44 = vsel %vm326_vm7, %v2616_v41, -inf  ;;  %v3448_v42 = vld [vmem:[#allocation10 + $0xc] ss:$16 sps:$4 sm:$0xff]  }
0x1eb7   :  { %2619 = vmax.xlane.f32.xlu0 %v2618_v44 }
0x1eb8   :  { %v2621_v9 = vsel %vm326_vm7, %v2617_v43, -inf }
0x1eb9   :  { %2622 = vmax.xlane.f32.xlu1 %v2621_v9 }
0x1eca   :  { %2641 = vrot.lane.b32.xlu1 %v4335_v59, %s3755_s30  ;;  %v3025_v59 = vcombine.low %v4269_v32, %v4269_v32 }
0x1ece   :  { %2690 = vrot.lane.b32.xlu1 %v3029_v45, %s3746_s5 }
0x1f44   :  { %v2620_v51 = vpop.xlane.xlu0 %2619 }
0x1f45   :  { %v2624_v7 = vsub.f32 %v2616_v41, %v2620_v51 }
0x1f46   :  { %v2623_v46 = vpop.xlane.xlu1 %2622 }
0x1f47   :  { %v2626_v47 = vmul.f32 1.442695, %v2624_v7  ;;  %v2625_v48 = vsub.f32 %v2617_v43, %v2623_v46 }
0x1f49   :  { %3554 = vpow2.f32 %v2626_v47  ;;  %v2628_v13 = vmul.f32 1.442695, %v2625_v48 }
0x1f4a   :  { %v2642_v57 = vpop.permute.xlu1 %2641 }
0x1f4b   :  { %3556 = vpow2.f32 %v2628_v13 }
0x1f4e   :  { %v2691_v34 = vpop.permute.xlu1 %2690 }
0x1f4f   :  { %v2696_v2 = vsel %vm532_vm8, %v2691_v34, 0  ;;  %v3033_v34 = vld [vmem:[#allocation11 + $0x11] ss:$0 sm:$0xff] }
0x1f50   :  { %3384 = vmatpush3.bf16.msra.mxu0 %v2696_v2 }
0x1f51   :  { %3397 = vmatprep.subr.bf16.mxu0 %v3744_v16 }
0x1f53   :  { %v3555_v50 = vpop.eup %3554 }
0x1f54   :  { %v2630_v52 = vsel %vm326_vm7, %v3555_v50, 0.0 }
0x1f55   :  { %v3557_v54 = vpop.eup %3556  ;;  %2631 = vadd.xlane.f32.xlu0 %v2630_v52 }
0x1f56   :  { %v2633_v35 = vsel %vm326_vm7, %v3557_v54, 0.0 }
0x1f59   :  { %2634 = vadd.xlane.f32.xlu0 %v2633_v35 }
0x1f6f   :  { %2512 = vrot.lane.b32.xlu0 %v3025_v59, %s3746_s5 }
0x1fe2   :  { %v2632_v18 = vpop.xlane.xlu0 %2631 }
0x1fe3   :  { %3558 = vrcp.f32 %v2632_v18 }
0x1fe6   :  { %v2635_v19 = vpop.xlane.xlu0 %2634 }
0x1fe7   :  { %3560 = vrcp.f32 %v2635_v19 }
0x1fea   :  { %v2513_v56 = vpop.permute.xlu0 %2512 }
0x1feb   :  { %v2518_v49 = vsel %vm532_vm8, %v2513_v56, 0 }
0x1fec   :  { %3366 = vmatpush3.bf16.msra.mxu1 %v2518_v49 }
0x1fed   :  { %3377 = vmatprep.subr.bf16.mxu1 %v3744_v16  ;;  %v3559_v15 = vpop.eup %3558 }
0x1fee   :  { %v2638_v61 = vmul.f32 %v3559_v15, %v3555_v50 }
0x1fef   :  { %3368 = vmatmul.mubr.msk.bf16.vlgmr.msra.gmra.mrb[76].mxu1 %vm274_vm6, %v2510_v36 }
0x1ff0   :  { %3378 = vmatpush3.bf16.msra.mxu1 %v2642_v57  ;;  %3379 = vmatprep.mubr.msk.bf16.mxu1 %vm3745_vm1, %v3744_v16  ;;  %v3032_v57 = vld [vmem:[#allocation11 + $0xe] ss:$0 sm:$0xff] }
0x1ff1   :  { %v3561_v32 = vpop.eup %3560  ;;  %3389 = vmatprep.subr.bf16.mxu1 %v3744_v16 }
0x1ff2   :  { %v2639_v62 = vmul.f32 %v3561_v32, %v3557_v54 }
0x1ff4   :  { %v2640_v63 = vpack.c.bf16 %v2639_v62, %v2638_v61 }
0x1ff7   :  { %3380 = vmatmul.mubr.msk.bf16.vlgmr.msra.gmra.mrb[80].mxu1 %vm326_vm7, %v2640_v63 }
0x1ff8   :  { %3393 = vmatprep.mubr.msk.bf16.mxu1 %vm3745_vm1, %v3744_v16  ;;  %3390 = vmatpush3.bf16.msra.mxu1 %v3448_v42 }
0x1ff9   :  { %3391 = vmatprep.subr.bf16.mxu1 %v3744_v16 }
0x1ffc   :  { %3392 = vmatpush3.bf16.msra.mxu1 %v3449_v5 }
0x20c2   :  { %v2554_v31 = vpop.f32.mrb[76].mxu1 }
0x20c3   :  { %v2561_v55 = vadd.f32 %v2554_v31, %v4408_v58  ;;  %v3369_v60 = vpop.f32.mrb[77].mxu1 }
0x20c4   :  { %v2557_v3 = vpop.f32.mrb[78].mxu1 }
0x20c5   :  { %v2562_v53 = vadd.f32 %v2557_v3, %v4411_v23  ;;  %v3370_v26 = vpop.f32.mrb[79].mxu1  ;;  %v3034_v3 = vld [vmem:[#allocation11 + $0x13] ss:$0 sm:$0xff] }
0x20ca   :  { %v2681_v38 = vpop.f32.mrb[80].mxu1 }
0x20cb   :  { %v3381_v14 = vpop.f32.mrb[81].mxu1 }
0x20cc   :  { %v2684_v4 = vpop.f32.mrb[82].mxu1 }
0x20cd   :  { %v2688_v30 = vpack.c.bf16 %v2684_v4, %v2681_v38  ;;  %v3382_v6 = vpop.f32.mrb[83].mxu1 }
0x20cf   :  { %3386 = vmatmul.mubr.msk.bf16.vlgmr.msra.gmra.mrb[76].mxu0 %vm274_vm6, %v2688_v30 }
0x20d0   :  { %3401 = vmatprep.mubr.msk.bf16.mxu0 %vm3745_vm1, %v3744_v16 }
0x21a2   :  { %v2732_v25 = vpop.f32.mrb[76].mxu0 }
0x21a3   :  { %v2739_v10 = vadd.f32 %v2732_v25, %v2561_v55  ;;  %v3387_v12 = vpop.f32.mrb[77].mxu0 }
0x21a4   :  { %v2735_v20 = vpop.f32.mrb[78].mxu0 }
0x21a5   :  { %v2746_v27 = vadd.f32 %v3031_v8, %v2739_v10  ;;  %v2740_v58 = vadd.f32 %v2735_v20, %v2562_v53  ;;  %v3388_v22 = vpop.f32.mrb[79].mxu0  ;;  %v3038_v10 = vld [vmem:[#allocation11 + $0x12] ss:$0 sm:$0xff] }
0x21a7   :  { %v4444_v24 = vadd.f32 %v2746_v27, %v4086_v17  ;;  %v2747_v23 = vadd.f32 %v3031_v8, %v2740_v58 }
0x21a9   :  { %v4447_v0 = vadd.f32 %v2747_v23, %v4089_v21  ;;  %v2752_v1 = vsel %vm125_vm0, %v4444_v24, 0.0 }
0x21aa   :  { %2753 = vadd.xlane.f32.xlu1 %v2752_v1 }
0x21ab   :  { %v2755_v28 = vsel %vm125_vm0, %v4447_v0, 0.0 }
0x21ac   :  { %2756 = vadd.xlane.f32.xlu0 %v2755_v28 }
0x21bb   :  { %2878 = vrot.lane.b32.xlu1 %v3448_v42, %s3750_s23 }
0x2237   :  { %v2754_v33 = vpop.xlane.xlu1 %2753 }
0x2238   :  { %v2758_v36 = vmul.f32 0.03125, %v2754_v33 }
0x2239   :  { %v2757_v37 = vpop.xlane.xlu0 %2756 }
0x223a   :  { %v2760_v11 = vsub.f32 %v4444_v24, %v2758_v36  ;;  %v2759_v39 = vmul.f32 0.03125, %v2757_v37 }
0x223b   :  { %v2879_v51 = vpop.permute.xlu1 %2878 }
0x223c   :  { %v2761_v17 = vsub.f32 %v4447_v0, %v2759_v39  ;;  %v2762_v29 = vmul.f32 %v2760_v11, %v2760_v11  ;;  %v2887_v46 = vsel %vm2882_vm13, %v2879_v51, 0  ;;  %v2776_v32 = vmul.f32 %v3032_v57, %v2760_v11 }
0x223d   :  { %3398 = vmatpush3.bf16.xpose.msra.mxu0 %v2887_v46 }
0x223e   :  { %v2764_v21 = vsel %vm125_vm0, %v2762_v29, 0.0  ;;  %v2763_v40 = vmul.f32 %v2761_v17, %v2761_v17  ;;  %3399 = vmatprep.subr.bf16.mxu0 %v3744_v16  ;;  %v2777_v61 = vmul.f32 %v3032_v57, %v2761_v17 }
0x223f   :  { %2765 = vadd.xlane.f32.xlu0 %v2764_v21 }
0x2240   :  { %v2767_v41 = vsel %vm125_vm0, %v2763_v40, 0.0 }
0x2243   :  { %2768 = vadd.xlane.f32.xlu0 %v2767_v41 }
0x2259   :  { %2880 = vrot.lane.b32.xlu0 %v3449_v5, %s3750_s23 }
0x22cc   :  { %v2766_v43 = vpop.xlane.xlu0 %2765 }
0x22cd   :  { %v2770_v44 = vmul.f32 0.032258064, %v2766_v43 }
0x22cf   :  { %3562 = vrsqrt.f32 %v2770_v44  ;;  %vm2780_vm14 = vcmp.eq.f32.partialorder %v2770_v44, inf  ;;  %v2783_v48 = vand.u32 2147483648, %v2770_v44  ;;  %vm2782_vm15 = vcmp.eq.f32.partialorder %v2770_v44, 0.0 }
0x22d0   :  { %v2769_v9 = vpop.xlane.xlu0 %2768 }
0x22d1   :  { %v2771_v45 = vmul.f32 0.032258064, %v2769_v9 }
0x22d3   :  { %3564 = vrsqrt.f32 %v2771_v45  ;;  %vm2787_vm1 = vcmp.eq.f32.partialorder %v2771_v45, inf  ;;  %v2790_v18 = vand.u32 2147483648, %v2771_v45  ;;  %vm2789_vm2 = vcmp.eq.f32.partialorder %v2771_v45, 0.0 }
0x22d4   :  { %v2881_v50 = vpop.permute.xlu0 %2880 }
0x22d5   :  { %v2890_v19 = vsel %vm2882_vm13, %v2881_v50, 0 }
0x22d6   :  { %3400 = vmatpush3.bf16.xpose.msra.mxu0 %v2890_v19 }
0x22d9   :  { %v3563_v7 = vpop.eup %3562 }
0x22da   :  { %v2779_v47 = vmul.f32 %v3563_v7, %v2770_v44 }
0x22dc   :  { %v2781_v13 = vsel %vm2780_vm14, %v2770_v44, %v2779_v47 }
0x22dd   :  { %v3565_v52 = vpop.eup %3564  ;;  %v2784_v54 = vsel %vm2782_vm15, %v2783_v48, %v2781_v13 }
0x22de   :  { %v2792_v35 = vadd.f32 1e-06, %v2784_v54  ;;  %v2786_v59 = vmul.f32 %v3565_v52, %v2771_v45 }
0x22e0   :  { %3566 = vrcp.f32 %v2792_v35  ;;  %v2788_v56 = vsel %vm2787_vm1, %v2771_v45, %v2786_v59 }
0x22e1   :  { %v2791_v49 = vsel %vm2789_vm2, %v2790_v18, %v2788_v56 }
0x22e2   :  { %v2793_v15 = vadd.f32 1e-06, %v2791_v49 }
0x22e4   :  { %3568 = vrcp.f32 %v2793_v15 }
0x22ea   :  { %v3567_v16 = vpop.eup %3566 }
0x22eb   :  { %v2795_v62 = vmul.f32 %v3567_v16, %v2776_v32 }
0x22ed   :  { %v2802_v31 = vadd.f32 %v3033_v34, %v2795_v62 }
0x22ee   :  { %v3569_v63 = vpop.eup %3568 }
0x22ef   :  { %v2797_v2 = vmul.f32 %v3569_v63, %v2777_v61 }
0x22f1   :  { %v2803_v55 = vadd.f32 %v3033_v34, %v2797_v2 }
0x22f3   :  { %v2804_v60 = vpack.c.bf16 %v2803_v55, %v2802_v31 }
0x22f5   :  { %3394 = vmatmul.mubr.msk.bf16.vlgmr.msra.gmra.mrb[84].mxu1 %vm125_vm0, %v2804_v60 }
0x23c8   :  { %v2863_v53 = vpop.f32.mrb[84].mxu1 }
0x23c9   :  { %v2864_v26 = vadd.f32 %v3034_v3, %v2863_v53  ;;  %v3395_v38 = vpop.f32.mrb[85].mxu1 }
0x23ca   :  { %v2866_v14 = vpop.f32.mrb[86].mxu1 }
0x23cb   :  { %v2867_v4 = vadd.f32 %v3034_v3, %v2866_v14  ;;  %v3396_v30 = vpop.f32.mrb[87].mxu1  ;;  %v2870_v6 = vmax.f32 %v2864_v26, 0.0 }
0x23cd   :  { %v2871_v25 = vmax.f32 %v2867_v4, 0.0 }
0x23cf   :  { %v2872_v8 = vpack.c.bf16 %v2871_v25, %v2870_v6 }
0x23d1   :  { %3402 = vmatmul.mubr.msk.bf16.vlgmr.msra.gmra.mrb[80].mxu0 %vm2882_vm13, %v2872_v8 }
0x24a4   :  { %v2926_v12 = vpop.f32.mrb[80].mxu0 }
0x24a5   :  { %v2927_v20 = vadd.f32 %v3038_v10, %v2926_v12  ;;  %v3403_v27 = vpop.f32.mrb[81].mxu0 }
0x24a6   :  { %v2929_v58 = vpop.f32.mrb[82].mxu0 }
0x24a7   :  { %v2933_v22 = vadd.f32 %v2927_v20, %v4444_v24  ;;  %v2930_v23 = vadd.f32 %v3038_v10, %v2929_v58  ;;  %v3404_v1 = vpop.f32.mrb[83].mxu0 }
0x24a9   :  { %2935 = vst.msk [vmem:[#allocation13] sm:$0xff] %vm125_vm0, %v2933_v22  ;;  %v2934_v28 = vadd.f32 %v2930_v23, %v4447_v0 }
0x24ab   :  { %2936 = vst.msk [vmem:[#allocation13 + $0x8] sm:$0xff] %vm125_vm0, %v2934_v28 }
0x24ac   :  { %3713 = shalt.err (!%p3710_p10)
}
0x24ad   :  { %s3714_s12 = scalar_lea.hbm %s4490_s6, 256 }
0x24ae   :  { %p3715_p11 = scmp.ne.s32.totalorder %s4490_s6, %s3714_s12  ;;  %p3718_p12 = scmp.lt.u32.totalorder %s3714_s12, %s4490_s6 }
0x24b0   :  { %p3720_p13 = pnand %p3718_p12, %p3715_p11 }
0x24b2   :  { %3723 = shalt.err (!%p3720_p13)
}
0x24b3   :  { %2948 = dma.vmem_to_hbm [thread:$0]  %s2943_s26, 256, %s4490_s6, [#allocation4], %s3736_s9, %s3736_s9, %s3737_s10  }
0x24b4   :  { %3732 = dma.done.wait [#allocation4], 256  }
0x24b5   :  { %3733 = vsyncadd [#allocation4], 4294967040 }
0x24b6   :  { %2952 = vsyncpa [#allocation3], 1 }
0x24b7   :  { %2953 = vsyncpa [#allocation6], 1 }
0x24b8   :  { %2954 = vsyncpa [#allocation9], 1 }
0x24b9   :  { %2955 = vsyncpa [#allocation12], 1 }
0x24ba   :  { %2956 = vsyncpa [#allocation4], 1 }

</bundles_post_ra>
